<compile_context>
chip_gen: v7x
topology: tpu7x:2x2x1
jax: 0.10.0
libtpu: 0.0.40
codegen_flags: <defaults>
</compile_context>

<pallas_src>
import jax
import jax.numpy as jnp
from jax import lax
from jax.experimental import pallas as pl
from jax.experimental.pallas import tpu as pltpu

SCALE = 512.0                 # the PyTorch module divides by the literal 512
INV_SCALE = 1.0 / SCALE       # exact (power of two)


# ----------------------------------------------------------------------------
# Kernels
# ----------------------------------------------------------------------------
def _attn_kernel_single(q_ref, k_ref, v_ref, o_ref):
    """Whole key axis resident in one block (n_kv == 1): plain softmax."""
    # Fold the 1/512 scale into Q (exact), then cast to bf16 for the MXU.
    q = (q_ref[0] * INV_SCALE).astype(jnp.bfloat16)            # (tq, D)
    k = k_ref[0].astype(jnp.bfloat16)                          # (S,  D)

    # scores (tq, S): contract over D directly -- no k.T / XLU relayout.
    s = lax.dot_general(q, k, (((1,), (1,)), ((), ())),
                        preferred_element_type=jnp.float32)

    # numerically stable softmax over the key axis (f32 VPU/EUP work)
    m = jnp.max(s, axis=-1, keepdims=True)
    e = jnp.exp(s - m)
    denom = jnp.sum(e, axis=-1, keepdims=True)
    p = e * pl.reciprocal(denom, approx=True)                  # EUP vrcp, free slot

    # TODO(synk): nn.Dropout() (p=0.5, training mode) is stochastic; eval-mode
    # identity is modeled here.  Add pltpu.prng_seed + pltpu.prng_random_bits
    # Bernoulli mask + 1/(1-p) rescale if train-mode parity is required.

    v = v_ref[0].astype(jnp.bfloat16)                          # (S, D)
    o = jnp.dot(p.astype(jnp.bfloat16), v, preferred_element_type=jnp.float32)
    o_ref[0] = o.astype(o_ref.dtype)


def _attn_kernel_flash(q_ref, k_ref, v_ref, o_ref, m_sc, l_sc, acc_sc):
    """Tiled key/value axis (n_kv > 1): flash-style online softmax."""
    kv = pl.program_id(2)

    @pl.when(kv == 0)
    def _():
        m_sc[...] = jnp.full(m_sc.shape, -jnp.inf, dtype=m_sc.dtype)
        l_sc[...] = jnp.zeros(l_sc.shape, dtype=l_sc.dtype)
        acc_sc[...] = jnp.zeros(acc_sc.shape, dtype=acc_sc.dtype)

    q = (q_ref[0] * INV_SCALE).astype(jnp.bfloat16)            # (tq,  D)
    k = k_ref[0].astype(jnp.bfloat16)                          # (tkv, D)

    s = lax.dot_general(q, k, (((1,), (1,)), ((), ())),
                        preferred_element_type=jnp.float32)    # (tq, tkv)

    m_prev = m_sc[...]
    m_new = jnp.maximum(m_prev, jnp.max(s, axis=-1, keepdims=True))
    alpha = jnp.exp(m_prev - m_new)
    p = jnp.exp(s - m_new)
    l_sc[...] = alpha * l_sc[...] + jnp.sum(p, axis=-1, keepdims=True)

    v = v_ref[0].astype(jnp.bfloat16)                          # (tkv, D)
    acc_sc[...] = alpha * acc_sc[...] + jnp.dot(
        p.astype(jnp.bfloat16), v, preferred_element_type=jnp.float32)
    m_sc[...] = m_new

    @pl.when(kv == pl.num_programs(2) - 1)
    def _():
        # TODO(synk): dropout modeled as identity (eval mode), as above.
        inv_l = pl.reciprocal(l_sc[...], approx=True)
        o_ref[0] = (acc_sc[...] * inv_l).astype(o_ref.dtype)


# ----------------------------------------------------------------------------
# Tile / occupancy selection
# ----------------------------------------------------------------------------
def _num_tensorcores():
    """Best-effort TensorCore-per-device count (occupancy heuristic only)."""
    try:
        info = pltpu.get_tpu_info()
        for attr in ("num_cores", "core_count", "num_tensorcores", "tensorcore_count"):
            n = getattr(info, attr, None)
            if isinstance(n, int) and n > 0:
                return n
    except Exception:
        pass
    try:
        n = getattr(jax.devices()[0], "num_cores", None)
        if isinstance(n, int) and n > 0:
            return n
    except Exception:
        pass
    return 1  # conservative: never adds extra grid steps


def _largest_tile(extent, cap):
    """Largest t <= cap with extent % t == 0 and t a multiple of 128 (or full extent)."""
    if extent <= cap:
        return extent
    t = (cap // 128) * 128
    while t >= 128:
        if extent % t == 0:
            return t
        t -= 128
    return extent  # no 128-multiple divisor; fall back to the full extent


def _select_q_tile(B, S):
    # Cap the query tile on ALL generations: the f32 (tq, tkv) score
    # intermediates scale with tq, so never let it track S unbounded.
    tq = _largest_tile(S, cap=512)
    # Split query rows further only when batch alone cannot occupy all cores.
    ncores = _num_tensorcores()
    while B * (S // tq) < ncores and tq >= 256 and (tq // 2) % 128 == 0:
        tq //= 2
    return tq


# ----------------------------------------------------------------------------
# Wrapper (mirrors Model.forward(query, value, key, dropout_p))
# ----------------------------------------------------------------------------
def attention_model(query, value, key, dropout_p=0.5, q_tile=None, kv_tile=None):
    del dropout_p  # the module uses nn.Dropout()'s default p, not dropout_p
    B, S, D = query.shape
    assert key.shape == (B, S, D) and value.shape == (B, S, D)

    tq = _select_q_tile(B, S) if q_tile is None else q_tile
    tkv = _largest_tile(S, cap=1024) if kv_tile is None else kv_tile
    assert S % tq == 0 and S % tkv == 0, (S, tq, tkv)
    n_q, n_kv = S // tq, S // tkv

    # ---- explicit VMEM budget from the actual block sizes -------------------
    bpe_in = jnp.dtype(query.dtype).itemsize
    bpe_out = jnp.dtype(query.dtype).itemsize
    q_bytes = 2 * tq * D * bpe_in            # double-buffered query block
    o_bytes = 2 * tq * D * bpe_out           # double-buffered output block
    kv_bytes = 2 * 2 * tkv * D * bpe_in      # K + V blocks, double-buffered
    scratch_bytes = (tq * D + 2 * tq) * 4 if n_kv > 1 else 0
    inter_bytes = 4 * tq * tkv * 4           # s / exp / p f32 temporaries
    budget = int(1.5 * (q_bytes + o_bytes + kv_bytes + scratch_bytes + inter_bytes))
    vmem_limit = max(16 << 20, min(budget + (8 << 20), 64 << 20))  # v7x-safe cap

    # ---- grid / specs --------------------------------------------------------
    if n_kv == 1:
        grid = (B, n_q)
        q_spec = pl.BlockSpec((1, tq, D), lambda b, qi: (b, qi, 0))
        kv_spec = pl.BlockSpec((1, tkv, D), lambda b, qi: (b, 0, 0))
        o_spec = pl.BlockSpec((1, tq, D), lambda b, qi: (b, qi, 0))
        kernel = _attn_kernel_single
        scratch = []
        dims = ("parallel", "parallel")
    else:
        grid = (B, n_q, n_kv)
        q_spec = pl.BlockSpec((1, tq, D), lambda b, qi, kv: (b, qi, 0))
        kv_spec = pl.BlockSpec((1, tkv, D), lambda b, qi, kv: (b, kv, 0))
        o_spec = pl.BlockSpec((1, tq, D), lambda b, qi, kv: (b, qi, 0))
        kernel = _attn_kernel_flash
        scratch = [pltpu.VMEM((tq, 1), jnp.float32),   # m (running max)
                   pltpu.VMEM((tq, 1), jnp.float32),   # l (running denom)
                   pltpu.VMEM((tq, D), jnp.float32)]   # acc
        dims = ("parallel", "parallel", "arbitrary")

    return pl.pallas_call(
        kernel,
        out_shape=jax.ShapeDtypeStruct((B, S, D), query.dtype),
        grid_spec=pltpu.PrefetchScalarGridSpec(
            num_scalar_prefetch=0,
            grid=grid,
            in_specs=[q_spec, kv_spec, kv_spec],
            out_specs=o_spec,
            scratch_shapes=scratch,
        ),
        compiler_params=pltpu.CompilerParams(
            dimension_semantics=dims,
            vmem_limit_bytes=vmem_limit,
        ),
    )(query, key, value)


def _reference(query, value, key):
    s = jnp.einsum("bqd,bkd->bqk", query, key) / SCALE
    p = jax.nn.softmax(s, axis=-1)
    return jnp.einsum("bqk,bkd->bqd", p, value)


if __name__ == "__main__":
    # Small but module-consistent shapes: batch=2, seq=256, hidden=512.
    # (The module's self.q/k/v Parameters of shape (256, 512) are never used
    #  in forward(), so they are not materialized here.)
    B, S, D = 2, 256, 512
    root = jax.random.PRNGKey(0)
    kq, kk, kv_ = jax.random.split(root, 3)

    query = jax.random.normal(kq, (B, S, D), dtype=jnp.float32)
    key = jax.random.normal(kk, (B, S, D), dtype=jnp.float32)
    value = jax.random.normal(kv_, (B, S, D), dtype=jnp.float32)

    ref = _reference(query, value, key)

    # Path 1: auto-selected tiles (full-KV, single softmax pass at this shape).
    out = jax.block_until_ready(attention_model(query, value, key, dropout_p=0.5))
    assert out.shape == (B, S, D)
    assert jnp.allclose(out, ref, atol=5e-3, rtol=5e-3)

    # Path 2: forced K/V tiling -> exercises the online-softmax (flash) kernel
    # used for large S where full-S K/V residency would blow past VMEM.
    out2 = jax.block_until_ready(
        attention_model(query, value, key, dropout_p=0.5, q_tile=128, kv_tile=128))
    assert jnp.allclose(out2, ref, atol=5e-3, rtol=5e-3)

    print("KERNEL_OK")
</pallas_src>

<mosaic_0001>
module attributes {stable_mosaic.version = 11 : i64} {
  func.func @_attn_kernel_single(%arg0: i32, %arg1: i32, %arg2: memref<1x256x512xf32, #tpu.memory_space<vmem>>, %arg3: memref<1x256x512xf32, #tpu.memory_space<vmem>>, %arg4: memref<1x256x512xf32, #tpu.memory_space<vmem>>, %arg5: memref<1x256x512xf32, #tpu.memory_space<vmem>>) attributes {dimension_semantics = [#tpu.dimension_semantics<parallel>, #tpu.dimension_semantics<parallel>], iteration_bounds = array<i64: 2, 1>, scalar_prefetch = 0 : i64, scratch_operands = 0 : i64, tpu.core_type = #tpu.core_type<tc>, window_params = [{transform_indices = @transform_0, window_bounds = array<i64: 1, 256, 512>}, {transform_indices = @transform_1, window_bounds = array<i64: 1, 256, 512>}, {transform_indices = @transform_2, window_bounds = array<i64: 1, 256, 512>}, {transform_indices = @transform_3, window_bounds = array<i64: 1, 256, 512>}]} {
    %c0 = arith.constant 0 : index
    %c0_0 = arith.constant 0 : index
    %c0_1 = arith.constant 0 : index
    %0 = vector.load %arg2[%c0, %c0_0, %c0_1] : memref<1x256x512xf32, #tpu.memory_space<vmem>>, vector<1x256x512xf32>
    %1 = vector.shape_cast %0 : vector<1x256x512xf32> to vector<256x512xf32>
    %cst = arith.constant 0.001953125 : f32
    %2 = vector.broadcast %cst : f32 to vector<256x512xf32>
    %3 = arith.mulf %1, %2 : vector<256x512xf32>
    %4 = arith.truncf %3 : vector<256x512xf32> to vector<256x512xbf16>
    %c0_2 = arith.constant 0 : index
    %c0_3 = arith.constant 0 : index
    %c0_4 = arith.constant 0 : index
    %5 = vector.load %arg3[%c0_2, %c0_3, %c0_4] : memref<1x256x512xf32, #tpu.memory_space<vmem>>, vector<1x256x512xf32>
    %6 = vector.shape_cast %5 : vector<1x256x512xf32> to vector<256x512xf32>
    %7 = arith.truncf %6 : vector<256x512xf32> to vector<256x512xbf16>
    %cst_5 = arith.constant dense<0.000000e+00> : vector<256x256xf32>
    %8 = tpu.matmul %4, %7, %cst_5 {dimension_numbers = #tpu.dot_dimension_numbers<[1], [1], [0], [0], [0, 0, 1, 0], [], []>} : vector<256x512xbf16>, vector<256x512xbf16>, vector<256x256xf32> -> vector<256x256xf32>
    %cst_6 = arith.constant dense<0xFF800000> : vector<256xf32>
    %9 = vector.multi_reduction <maximumf>, %8, %cst_6 [1] : vector<256x256xf32> to vector<256xf32>
    %10 = vector.shape_cast %9 : vector<256xf32> to vector<256x1xf32>
    %11 = vector.broadcast %10 : vector<256x1xf32> to vector<256x256xf32>
    %12 = arith.subf %8, %11 : vector<256x256xf32>
    %13 = math.exp %12 : vector<256x256xf32>
    %cst_7 = arith.constant dense<0.000000e+00> : vector<256xf32>
    %14 = vector.multi_reduction <add>, %13, %cst_7 [1] : vector<256x256xf32> to vector<256xf32>
    %15 = vector.shape_cast %14 : vector<256xf32> to vector<256x1xf32>
    %16 = tpu.reciprocal %15 {approx = true} : vector<256x1xf32> -> vector<256x1xf32>
    %17 = vector.broadcast %16 : vector<256x1xf32> to vector<256x256xf32>
    %18 = arith.mulf %13, %17 : vector<256x256xf32>
    %c0_8 = arith.constant 0 : index
    %c0_9 = arith.constant 0 : index
    %c0_10 = arith.constant 0 : index
    %19 = vector.load %arg4[%c0_8, %c0_9, %c0_10] : memref<1x256x512xf32, #tpu.memory_space<vmem>>, vector<1x256x512xf32>
    %20 = vector.shape_cast %19 : vector<1x256x512xf32> to vector<256x512xf32>
    %21 = arith.truncf %20 : vector<256x512xf32> to vector<256x512xbf16>
    %22 = arith.truncf %18 : vector<256x256xf32> to vector<256x256xbf16>
    %cst_11 = arith.constant dense<0.000000e+00> : vector<256x512xf32>
    %23 = tpu.matmul %22, %21, %cst_11 {dimension_numbers = #tpu.dot_dimension_numbers<[1], [0], [0], [1], [0, 0, 1, 1], [], []>} : vector<256x256xbf16>, vector<256x512xbf16>, vector<256x512xf32> -> vector<256x512xf32>
    %c0_12 = arith.constant 0 : index
    %c0_13 = arith.constant 0 : index
    %c0_14 = arith.constant 0 : index
    %24 = vector.load %arg5[%c0_12, %c0_13, %c0_14] : memref<1x256x512xf32, #tpu.memory_space<vmem>>, vector<1x256x512xf32>
    %25 = vector.shape_cast %24 : vector<1x256x512xf32> to vector<256x512xf32>
    %26 = vector.shape_cast %23 : vector<256x512xf32> to vector<1x256x512xf32>
    tpu.vector_store %arg5[%c0_12, %c0_13, %c0_14], %26 {strides = array<i32>} : memref<1x256x512xf32, #tpu.memory_space<vmem>>, vector<1x256x512xf32>,
    return
  }
  func.func @transform_0(%arg0: i32, %arg1: i32) -> (i32, i32, i32) {
    %c0_i32 = arith.constant 0 : i32
    %c0_i32_0 = arith.constant 0 : i32
    return %arg0, %arg1, %c0_i32 : i32, i32, i32
  }
  func.func @transform_1(%arg0: i32, %arg1: i32) -> (i32, i32, i32) {
    %c0_i32 = arith.constant 0 : i32
    %c0_i32_0 = arith.constant 0 : i32
    %c0_i32_1 = arith.constant 0 : i32
    return %arg0, %c0_i32, %c0_i32_0 : i32, i32, i32
  }
  func.func @transform_2(%arg0: i32, %arg1: i32) -> (i32, i32, i32) {
    %c0_i32 = arith.constant 0 : i32
    %c0_i32_0 = arith.constant 0 : i32
    %c0_i32_1 = arith.constant 0 : i32
    return %arg0, %c0_i32, %c0_i32_0 : i32, i32, i32
  }
  func.func @transform_3(%arg0: i32, %arg1: i32) -> (i32, i32, i32) {
    %c0_i32 = arith.constant 0 : i32
    %c0_i32_0 = arith.constant 0 : i32
    return %arg0, %arg1, %c0_i32 : i32, i32, i32
  }
}

</mosaic_0001>

<bundles_post_ra>
// kernel: tpu_custom_call.1
= control target key start
LH: loop header
LB: loop body
LE: loop exit
PB: predicated region body
PF: predicated region fallthrough
CT: control target
= control target key end

     0   :  { %s4584_s0 = inlined_call_operand.hbm [shape: f32[2,256,512], index: 0, kind: input, shape index: {}]   ;;  %s4585_s1 = inlined_call_operand.hbm [shape: f32[2,256,512], index: 1, kind: input, shape index: {}]   ;;  %s4586_s2 = inlined_call_operand.hbm [shape: f32[2,256,512], index: 2, kind: input, shape index: {}]   ;;  %s4587_s3 = inlined_call_operand.hbm [shape: f32[2,256,512], index: 3, kind: output, shape index: {}]  }
   0x1   :  { %4629 = sst [smem:[#allocation33_spill]] %s4585_s1 }
   0x2   :  { %8 = vsyncpa [#allocation3], 0 }
   0x3   :  { %10 = vsyncpa [#allocation3 + $0x1], 0 }
   0x4   :  { %11 = vsyncpa [#allocation6], 0 }
   0x5   :  { %13 = vsyncpa [#allocation6 + $0x1], 0 }
   0x6   :  { %14 = vsyncpa [#allocation4], 0 }
   0x7   :  { %16 = vsyncpa [#allocation4 + $0x1], 0  ;;  %s3115_s12 = smov 0   ;;  %s3117_s13 = smov 0  }
   0x8   :  { %s3119_s14 = smov 0   ;;  %s3121_s15 = smov 0  }
   0x9   :  { %s3123_s16 = smov 0   ;;  %s3125_s17 = smov 0  }
   0xa LB: > { %4630 = sst [smem:[#allocation12_spill]] %s3081_s16  ;;  %s3146_s18 = sadd.s32 4294967295, %s3085_s17   ;;  %s3085_s17 = sphi %s3125_s17, %s22_s17   ;;  %s3081_s16 = sphi %s3123_s16, %s4725_s16   ;;  %s3077_s15 = sphi %s3121_s15, %s4724_s15   ;;  %s3073_s14 = sphi %s3119_s14, %s4728_s14   ;;  %s3069_s13 = sphi %s3117_s13, %s4727_s13   ;;  %s3065_s12 = sphi %s3115_s12, %s4726_s12  }
   0xb   : > { %s2551_s19 = sadd.s32 4294967294, %s3085_s17   ;;  %s34_s20 = sadd.s32 1, %s3081_s16 }
   0xc   : > { %s43_s21 = sadd.s32 1, %s3073_s14  ;;  %p36_p0 = scmp.ge.s32.totalorder %s34_s20, 2 }
   0xd   : > { %p50_p1 = scmp.ne.s32.totalorder %s3073_s14, %s3069_s13  ;;  %p51_p2 = scmp.eq.s32.totalorder %s3085_s17, 0 }
   0xe   : > { %p56_p3 = scmp.ne.s32.totalorder %s3069_s13, %s3065_s12  ;;  %s4730_s20 = smov (%p36_p0, %s34_s20), 0 }
   0xf   : > { %4631 = sst [smem:[#allocation13_spill]] %s4730_s20  ;;  %p3158_p4 = por %p51_p2, %p50_p1 }
  0x10   : > { %p57_p5 = scmp.eq.s32.totalorder %s3146_s18, 0  ;;  %s38_s23 = ssub.s32 %s3081_s16, %s4730_s20 }
  0x11   : > { %p134_p6 = scmp.eq.s32.totalorder %s3146_s18, 1  ;;  %p41_p7 = scmp.eq.s32.totalorder %s38_s23, 0 }
  0x12   : > { %p3166_p8 = por %p57_p5, %p56_p3  ;;  %p140_p10 = scmp.eq.s32.totalorder %s2551_s19, 1 }
  0x13   : > { %p3170_p9 = por %p134_p6, %p50_p1  ;;  %p2663_p13 = scmp.lt.s32.totalorder %s3085_s17, 2 }
  0x14   : > { %s4633_s24 = scalar_select %p3166_p8, 1, 0 }
  0x15   : > { %s4634_s25 = scalar_select %p3170_p9, 1, 0 }
  0x16   : > { %s3175_s26 = scalar_select %p41_p7, %s3073_s14, %s43_s21  }
  0x17   : > { %p3177_p11 = por %p140_p10, %p56_p3  ;;  %s4590_s28 = sand.u32 1, %s3073_s14  }
  0x18   : > { %4635 = sst [smem:[#allocation14_spill]] %s3175_s26  ;;  %s3186_s29 = sshll.u32 %s4590_s28, 10 }
  0x19   : > { %s4636_s27 = scalar_select %p3177_p11, 1, 0 }
  0x1a   : > { %s3189_s30 = sshll.u32 %s3081_s16, 14  ;;  %p3193_p0 = pnand %p2663_p13, %p3158_p4 }
  0x1b   : > { %s184_s5 = sand.u32 1, %s3085_s17   ;;  %s4638_s1 = sld [smem:[#allocation33_spill]] }
  0x1c   : > { %s188_s9 = scalar_lea.vmem [#allocation5], %s3186_s29  ;;  %s3209_s11 = scalar_lea.sflag [#allocation6], %s184_s5 }
  0x1d   : > { %s195_s10 = sshll.u32 %s188_s9, 4  ;;  %p3215_p4 = pneg %p3193_p0  ;;  %s3206_s10 = int_to_ptr.vmem [resolvable:$true] %s195_s10 }
  0x21   : > { %s3202_s8 = scalar_lea.hbm %s4638_s1, %s3189_s30  ;;  %s2914_s6 = scalar_lea.hbm %s4638_s1, 32768 }
  0x22   : > { %s2909_s19 = scalar_lea.hbm %s3202_s8, 16384  ;;  %p2915_p7 = scmp.lt.u32.totalorder %s3202_s8, %s4638_s1 }
  0x23   : > { %p2910_p3 = scmp.ne.s32.totalorder %s3202_s8, %s2909_s19  ;;  %p2916_p10 = scmp.lt.u32.totalorder %s2914_s6, %s2909_s19 }
  0x24   : > { %p2918_p12 = scmp.lt.u32.totalorder %s2909_s19, %s3202_s8 }
  0x25   : > { %p2912_p5 = pnand %p3215_p4, %p2910_p3  ;;  %p2917_p13 = por %p2916_p10, %p2915_p7 }
  0x27   : > { %p2913_p6 = pneg %p2912_p5  ;;  %p2919_p1 = por %p2918_p12, %p2917_p13 }
  0x29   : > { %p2920_p2 = pnand %p2919_p1, %p2913_p6 }
  0x2b   : > { %2923 = shalt.err (!%p2920_p2)
}
  0x2c   : > { %s2924_s5 = scalar_lea.vmem %s3206_s10, 16384  ;;  %s3087_s22 = smov [#allocation5]  }
  0x2d   : > { %p2925_p3 = scmp.ne.s32.totalorder %s3206_s10, %s2924_s5  ;;  %s2929_s23 = sshll.u32 %s3087_s22, 4  ;;  %s2930_s23 = int_to_ptr.vmem [resolvable:$false] %s2929_s23 }
  0x2e   : > { %s2931_s7 = scalar_lea.vmem %s2930_s23, 32768  ;;  %p2932_p9 = scmp.lt.s32.totalorder %s3206_s10, %s2930_s23 }
  0x2f   : > { %p2927_p5 = pnand %p2925_p3, %p3215_p4  ;;  %p2933_p8 = scmp.lt.s32.totalorder %s2931_s7, %s2924_s5 }
  0x31   : > { %p2928_p11 = pneg %p2927_p5  ;;  %p2934_p7 = por %p2933_p8, %p2932_p9 }
  0x33   : > { %p2935_p10 = pnand %p2934_p7, %p2928_p11 }
  0x35   : > { %2938 = shalt.err (!%p2935_p10)
}
  0x36   : > { %s4591_s19 = smov 512   ;;  %s4593_s6 = smov 32  }
  0x37   : > { %2655 = dma.hbm_to_vmem [thread:$0]  (!%p3193_p0), %s3202_s8, 16384, %s3206_s10, %s3209_s11, %s4591_s19, %s4591_s19, %s4593_s6  }
  0x38   : > { %p4640_p8 = scmp.lt.s32.totalorder %s3085_s17, 3  ;;  %p4641_p9 = scmp.ge.s32.totalorder %s3085_s17, 1 }
  0x39   : > { %s3254_s23 = scalar_lea.hbm %s4584_s0, %s3189_s30  ;;  %s164_s7 = scalar_lea.vmem [#allocation2], %s3186_s29 }
  0x3a   : > { %p3246_p11 = pnand %p4641_p9, %p4640_p8  ;;  %s174_s28 = sshll.u32 %s164_s7, 4  ;;  %s3257_s28 = int_to_ptr.vmem [resolvable:$true] %s174_s28 }
  0x3b   : > { %s3263_s19 = scalar_lea.hbm %s4586_s2, %s3189_s30  ;;  %s4643_s6 = sand.u32 1, %s3073_s14  }
  0x3c   : > { %s4642_s9 = scalar_select %p3246_p11, 1, 0 }
  0x3d   : > { %s3267_s1 = scalar_lea.sflag [#allocation3], %s4643_s6  ;;  %s2939_s20 = scalar_lea.hbm %s3254_s23, 16384 }
  0x3e   : > { %p2940_p12 = scmp.ne.s32.totalorder %s3254_s23, %s2939_s20  ;;  %s2944_s16 = scalar_lea.hbm %s4584_s0, 32768 }
  0x3f   : > { %p2945_p6 = scmp.lt.u32.totalorder %s3254_s23, %s4584_s0  ;;  %p2946_p13 = scmp.lt.u32.totalorder %s2944_s16, %s2939_s20 }
  0x40   : > { %p2942_p1 = pnand %p2940_p12, %p3215_p4  ;;  %p2948_p5 = scmp.lt.u32.totalorder %s2939_s20, %s3254_s23 }
  0x41   : > { %p2947_p3 = por %p2946_p13, %p2945_p6 }
  0x42   : > { %p2943_p2 = pneg %p2942_p1 }
  0x43   : > { %p2949_p7 = por %p2948_p5, %p2947_p3 }
  0x45   : > { %p2950_p10 = pnand %p2949_p7, %p2943_p2 }
  0x47   : > { %2953 = shalt.err (!%p2950_p10)
}
  0x48   : > { %s2954_s30 = scalar_lea.vmem %s3257_s28, 16384  ;;  %s3090_s6 = smov [#allocation2]  }
  0x49   : > { %p2955_p8 = scmp.ne.s32.totalorder %s3257_s28, %s2954_s30  ;;  %s2959_s8 = sshll.u32 %s3090_s6, 4  ;;  %s2960_s8 = int_to_ptr.vmem [resolvable:$false] %s2959_s8 }
  0x4a   : > { %s2961_s26 = scalar_lea.vmem %s2960_s8, 32768  ;;  %p2962_p1 = scmp.lt.s32.totalorder %s3257_s28, %s2960_s8 }
  0x4b   : > { %p2957_p9 = pnand %p2955_p8, %p3215_p4  ;;  %p2963_p11 = scmp.lt.s32.totalorder %s2961_s26, %s2954_s30 }
  0x4d   : > { %p2958_p12 = pneg %p2957_p9  ;;  %p2964_p6 = por %p2963_p11, %p2962_p1 }
  0x4f   : > { %p2965_p13 = pnand %p2964_p6, %p2958_p12 }
  0x51   : > { %2968 = shalt.err (!%p2965_p13)
}
  0x52   : > { %s4644_s16 = smov 32   ;;  %s4645_s20 = smov 512  }
  0x53   : > { %2652 = dma.hbm_to_vmem [thread:$0]  (!%p3193_p0), %s3254_s23, 16384, %s3257_s28, %s3267_s1, %s4645_s20, %s4645_s20, %s4644_s16  }
  0x54   : > { %s209_s10 = scalar_lea.vmem [#allocation7], %s3186_s29  ;;  %s2969_s22 = scalar_lea.hbm %s3263_s19, 16384 }
  0x55   : > { %s216_s5 = sshll.u32 %s209_s10, 4  ;;  %p2970_p11 = scmp.ne.s32.totalorder %s3263_s19, %s2969_s22  ;;  %s3295_s5 = int_to_ptr.vmem [resolvable:$true] %s216_s5 }
  0x56   : > { %s2974_s6 = scalar_lea.hbm %s4586_s2, 32768  ;;  %p2975_p5 = scmp.lt.u32.totalorder %s3263_s19, %s4586_s2 }
  0x57   : > { %p2972_p2 = pnand %p2970_p11, %p3215_p4  ;;  %p2976_p7 = scmp.lt.u32.totalorder %s2974_s6, %s2969_s22 }
  0x58   : > { %p2978_p8 = scmp.lt.u32.totalorder %s2969_s22, %s3263_s19 }
  0x59   : > { %p2973_p3 = pneg %p2972_p2  ;;  %p2977_p10 = por %p2976_p7, %p2975_p5 }
  0x5b   : > { %p2979_p9 = por %p2978_p8, %p2977_p10 }
  0x5d   : > { %p2980_p12 = pnand %p2979_p9, %p2973_p3 }
  0x5f   : > { %2983 = shalt.err (!%p2980_p12)
}
  0x60   : > { %s2984_s1 = scalar_lea.vmem %s3295_s5, 16384  ;;  %s3091_s28 = smov [#allocation7]  }
  0x61   : > { %p2985_p1 = scmp.ne.s32.totalorder %s3295_s5, %s2984_s1  ;;  %s2989_s29 = sshll.u32 %s3091_s28, 4  ;;  %s2990_s29 = int_to_ptr.vmem [resolvable:$false] %s2989_s29 }
  0x62   : > { %s2991_s23 = scalar_lea.vmem %s2990_s29, 32768  ;;  %p2992_p11 = scmp.lt.s32.totalorder %s3295_s5, %s2990_s29 }
  0x63   : > { %p2987_p6 = pnand %p2985_p1, %p3215_p4  ;;  %p2993_p2 = scmp.lt.s32.totalorder %s2991_s23, %s2984_s1 }
  0x65   : > { %p2988_p13 = pneg %p2987_p6  ;;  %p2994_p5 = por %p2993_p2, %p2992_p11 }
  0x67   : > { %p2995_p7 = pnand %p2994_p5, %p2988_p13 }
  0x69   : > { %2998 = shalt.err (!%p2995_p7)
}
  0x6a   : > { %2658 = dma.hbm_to_vmem [thread:$0]  (!%p3193_p0), %s3263_s19, 16384, %s3295_s5, %s3209_s11, %s4645_s20, %s4645_s20, %s4644_s16  }
  0x6b   : > { %p4646_p4 = scmp.ne.s32.totalorder %s4642_s9, 0 }
  0x6d   : > { %228 = sbr.rel (%p4646_p4) target bundleno = 1466 (0x5ba), region = 32 }
  0x74   : > { %s3325_s21 = sand.u32 1, %s3069_s13   ;;  %p4647_p3 = scmp.ne.s32.totalorder %s4633_s24, 0 }
  0x75   : > { %s3328_s10 = sshll.u32 %s3325_s21, 10  ;;  %s231_s4 = scalar_lea.sflag [#allocation3], %s3325_s21 }
  0x76   : > { %s3332_s22 = scalar_lea.vmem [#allocation2], %s3328_s10 }
  0x77   : > { %3052 = dma.done.wait (%p4647_p3), %s231_s4, 16384  }
  0x78   : > { %3054 = vsyncadd (%p4647_p3), %s231_s4, 4294950912  ;;  %s239_s11 = sand.u32 1, %s3146_s18   ;;  %s3340_s9 = scalar_lea.vmem [#allocation5], %s3328_s10 }
  0x79   : > { %s240_s19 = scalar_lea.sflag [#allocation6], %s239_s11 }
  0x7a   : > { %3056 = dma.done.wait (%p4647_p3), %s240_s19, 32768  }
  0x7b   : > { %3058 = vsyncadd (%p4647_p3), %s240_s19, 4294934528  ;;  %v608_v0 = vld [vmem:[%s3340_s9 + $0x8] sm:$0xff]  ;;  %v607_v2 = vld [vmem:[%s3340_s9] sm:$0xff]  ;;  %s3795_s18 = scalar_lea.vmem [#allocation7], %s3328_s10  ;;  %s4371_s24 = scalar_lea.vmem [#allocation8], %s3328_s10 }
  0x7c   : > { %v612_v1 = vld [vmem:[%s3340_s9 + $0x28] sm:$0xff]  ;;  %v611_v4 = vld [vmem:[%s3340_s9 + $0x20] sm:$0xff]  ;;  %s2576_s16 = sshll.u32 %s3077_s15, 14  ;;  %s2420_s20 = sshll.u32 %s4371_s24, 4  ;;  %s4532_s20 = int_to_ptr.vmem [resolvable:$true] %s2420_s20 }
  0x7d   : > { %v736_v3 = vpack.c.bf16 %v612_v1, %v608_v0  ;;  %v616_v5 = vld [vmem:[%s3340_s9 + $0x48] sm:$0xff]  ;;  %v735_v7 = vpack.c.bf16 %v611_v4, %v607_v2  ;;  %v615_v9 = vld [vmem:[%s3340_s9 + $0x40] sm:$0xff]  ;;  %s4530_s30 = scalar_lea.hbm %s4587_s3, %s2576_s16  ;;  %s2404_s15 = scalar_lea.sflag [#allocation4], %s3325_s21 }
  0x7e   : > { %v620_v6 = vld [vmem:[%s3340_s9 + $0x68] sm:$0xff]  ;;  %v619_v10 = vld [vmem:[%s3340_s9 + $0x60] sm:$0xff]  ;;  %s2999_s6 = scalar_lea.vmem %s4532_s20, 16384  ;;  %p4720_p10 = scmp.ne.s32.totalorder %s4634_s25, 0 }
  0x7f   : > { %v740_v8 = vpack.c.bf16 %v620_v6, %v616_v5  ;;  %799 = vmatprep.subr.bf16.mxu0 %v736_v3  ;;  %v624_v11 = vld [vmem:[%s3340_s9 + $0x88] sm:$0xff]  ;;  %v739_v13 = vpack.c.bf16 %v619_v10, %v615_v9  ;;  %v623_v15 = vld [vmem:[%s3340_s9 + $0x80] sm:$0xff]  ;;  %p3000_p0 = scmp.ne.s32.totalorder %s4532_s20, %s2999_s6  ;;  %s3092_s8 = smov [#allocation8]  }
  0x80   : > { %800 = vmatpush1.bf16.xpose.msra.mxu0 %v735_v7  ;;  %v628_v12 = vld [vmem:[%s3340_s9 + $0xa8] sm:$0xff]  ;;  %v627_v16 = vld [vmem:[%s3340_s9 + $0xa0] sm:$0xff]  ;;  %s3003_s26 = sshll.u32 %s3092_s8, 4  ;;  %s3004_s26 = int_to_ptr.vmem [resolvable:$false] %s3003_s26 }
  0x81   : > { %801 = vmatprep.subr.bf16.mxu0 %v740_v8  ;;  %v744_v14 = vpack.c.bf16 %v628_v12, %v624_v11  ;;  %v632_v17 = vld [vmem:[%s3340_s9 + $0xc8] sm:$0xff]  ;;  %v743_v19 = vpack.c.bf16 %v627_v16, %v623_v15  ;;  %v631_v21 = vld [vmem:[%s3340_s9 + $0xc0] sm:$0xff]  ;;  %p3001_p8 = pnand %p3000_p0, %p4720_p10  ;;  %s3005_s1 = scalar_lea.vmem %s3004_s26, 32768 }
  0x82   : > { %v636_v18 = vld [vmem:[%s3340_s9 + $0xe8] sm:$0xff]  ;;  %v635_v22 = vld [vmem:[%s3340_s9 + $0xe0] sm:$0xff]  ;;  %p3006_p12 = scmp.lt.s32.totalorder %s4532_s20, %s3004_s26  ;;  %p3007_p1 = scmp.lt.s32.totalorder %s3005_s1, %s2999_s6 }
  0x83   : > { %v748_v20 = vpack.c.bf16 %v636_v18, %v632_v17  ;;  %v288_v23 = vld [vmem:[%s3332_s22 + $0x8] sm:$0xff]  ;;  %v747_v29 = vpack.c.bf16 %v635_v22, %v631_v21  ;;  %v639_v32 = vld [vmem:[%s3340_s9 + $0x100] sm:$0xff]  ;;  %p3002_p9 = pneg %p3001_p8 }
  0x84   : > { %v292_v24 = vld [vmem:[%s3332_s22 + $0x28] sm:$0xff]  ;;  %v416_v27 = vmul.f32 0.001953125, %v288_v23  ;;  %v643_v33 = vld [vmem:[%s3340_s9 + $0x120] sm:$0xff]  ;;  %p3008_p6 = por %p3007_p1, %p3006_p12 }
  0x85   : > { %v640_v25 = vld [vmem:[%s3340_s9 + $0x108] sm:$0xff]  ;;  %v420_v28 = vmul.f32 0.001953125, %v292_v24  ;;  %v751_v36 = vpack.c.bf16 %v643_v33, %v639_v32  ;;  %v647_v38 = vld [vmem:[%s3340_s9 + $0x140] sm:$0xff] }
  0x86   : > { %v644_v26 = vld [vmem:[%s3340_s9 + $0x128] sm:$0xff]  ;;  %v651_v39 = vld [vmem:[%s3340_s9 + $0x160] sm:$0xff]  ;;  %p3009_p13 = pnand %p3008_p6, %p3002_p9 }
  0x87   : > { %v544_v30 = vpack.c.bf16 %v420_v28, %v416_v27  ;;  %v752_v31 = vpack.c.bf16 %v644_v26, %v640_v25  ;;  %v648_v34 = vld [vmem:[%s3340_s9 + $0x148] sm:$0xff]  ;;  %v755_v42 = vpack.c.bf16 %v651_v39, %v647_v38  ;;  %v655_v44 = vld [vmem:[%s3340_s9 + $0x180] sm:$0xff] }
  0x88   : > { %802 = vmatpush1.bf16.xpose.msra.mxu0 %v739_v13  ;;  %v652_v35 = vld [vmem:[%s3340_s9 + $0x168] sm:$0xff]  ;;  %v659_v45 = vld [vmem:[%s3340_s9 + $0x1a0] sm:$0xff] }
  0x89   : > { %803 = vmatprep.subr.bf16.mxu0 %v744_v14  ;;  %831 = vmatprep.mubr.bf16.mxu0 %v544_v30  ;;  %v756_v37 = vpack.c.bf16 %v652_v35, %v648_v34  ;;  %v656_v40 = vld [vmem:[%s3340_s9 + $0x188] sm:$0xff]  ;;  %v759_v48 = vpack.c.bf16 %v659_v45, %v655_v44  ;;  %v663_v50 = vld [vmem:[%s3340_s9 + $0x1c0] sm:$0xff] }
  0x8a   : > { %v660_v41 = vld [vmem:[%s3340_s9 + $0x1a8] sm:$0xff]  ;;  %v667_v51 = vld [vmem:[%s3340_s9 + $0x1e0] sm:$0xff] }
  0x8b   : > { %v760_v43 = vpack.c.bf16 %v660_v41, %v656_v40  ;;  %v664_v46 = vld [vmem:[%s3340_s9 + $0x1c8] sm:$0xff]  ;;  %v763_v54 = vpack.c.bf16 %v667_v51, %v663_v50  ;;  %v671_v56 = vld [vmem:[%s3340_s9 + $0x200] sm:$0xff]  ;;  %v618_v50 = vld [vmem:[%s3340_s9 + $0x58] sm:$0xff] }
  0x8c   : > { %v668_v47 = vld [vmem:[%s3340_s9 + $0x1e8] sm:$0xff]  ;;  %v675_v57 = vld [vmem:[%s3340_s9 + $0x220] sm:$0xff]  ;;  %v622_v51 = vld [vmem:[%s3340_s9 + $0x78] sm:$0xff] }
  0x8d   : > { %v764_v49 = vpack.c.bf16 %v668_v47, %v664_v46  ;;  %v672_v52 = vld [vmem:[%s3340_s9 + $0x208] sm:$0xff]  ;;  %v767_v60 = vpack.c.bf16 %v675_v57, %v671_v56  ;;  %v679_v62 = vld [vmem:[%s3340_s9 + $0x240] sm:$0xff]  ;;  %v742_v57 = vpack.c.bf16 %v622_v51, %v618_v50  ;;  %v650_v50 = vld [vmem:[%s3340_s9 + $0x158] sm:$0xff] }
  0x8e   : > { %v676_v53 = vld [vmem:[%s3340_s9 + $0x228] sm:$0xff]  ;;  %v683_v63 = vld [vmem:[%s3340_s9 + $0x260] sm:$0xff]  ;;  %v654_v51 = vld [vmem:[%s3340_s9 + $0x178] sm:$0xff] }
  0x8f   : > { %v768_v55 = vpack.c.bf16 %v676_v53, %v672_v52  ;;  %v680_v58 = vld [vmem:[%s3340_s9 + $0x248] sm:$0xff]  ;;  %v771_v2 = vpack.c.bf16 %v683_v63, %v679_v62  ;;  %v687_v4 = vld [vmem:[%s3340_s9 + $0x280] sm:$0xff] }
  0x90   : > { %804 = vmatpush1.bf16.xpose.msra.mxu0 %v743_v19  ;;  %v684_v59 = vld [vmem:[%s3340_s9 + $0x268] sm:$0xff]  ;;  %v691_v5 = vld [vmem:[%s3340_s9 + $0x2a0] sm:$0xff] }
  0x91   : > { %805 = vmatprep.subr.bf16.mxu0 %v748_v20  ;;  %v772_v61 = vpack.c.bf16 %v684_v59, %v680_v58  ;;  %v688_v0 = vld [vmem:[%s3340_s9 + $0x288] sm:$0xff]  ;;  %v775_v8 = vpack.c.bf16 %v691_v5, %v687_v4  ;;  %v695_v10 = vld [vmem:[%s3340_s9 + $0x2c0] sm:$0xff] }
  0x92   : > { %v692_v1 = vld [vmem:[%s3340_s9 + $0x2a8] sm:$0xff]  ;;  %v699_v11 = vld [vmem:[%s3340_s9 + $0x2e0] sm:$0xff] }
  0x93   : > { %v776_v3 = vpack.c.bf16 %v692_v1, %v688_v0  ;;  %v696_v6 = vld [vmem:[%s3340_s9 + $0x2c8] sm:$0xff]  ;;  %v779_v14 = vpack.c.bf16 %v699_v11, %v695_v10  ;;  %v703_v16 = vld [vmem:[%s3340_s9 + $0x300] sm:$0xff]  ;;  %v617_v0 = vld [vmem:[%s3340_s9 + $0x50] sm:$0xff] }
  0x94   : > { %v700_v7 = vld [vmem:[%s3340_s9 + $0x2e8] sm:$0xff]  ;;  %v707_v17 = vld [vmem:[%s3340_s9 + $0x320] sm:$0xff]  ;;  %v621_v1 = vld [vmem:[%s3340_s9 + $0x70] sm:$0xff] }
  0x95   : > { %v780_v9 = vpack.c.bf16 %v700_v7, %v696_v6  ;;  %v704_v12 = vld [vmem:[%s3340_s9 + $0x308] sm:$0xff]  ;;  %v783_v20 = vpack.c.bf16 %v707_v17, %v703_v16  ;;  %v711_v22 = vld [vmem:[%s3340_s9 + $0x340] sm:$0xff]  ;;  %v741_v5 = vpack.c.bf16 %v621_v1, %v617_v0  ;;  %v625_v16 = vld [vmem:[%s3340_s9 + $0x90] sm:$0xff] }
  0x96   : > { %v708_v13 = vld [vmem:[%s3340_s9 + $0x328] sm:$0xff]  ;;  %v715_v23 = vld [vmem:[%s3340_s9 + $0x360] sm:$0xff]  ;;  %v629_v17 = vld [vmem:[%s3340_s9 + $0xb0] sm:$0xff] }
  0x97   : > { %v784_v15 = vpack.c.bf16 %v708_v13, %v704_v12  ;;  %v712_v18 = vld [vmem:[%s3340_s9 + $0x348] sm:$0xff]  ;;  %v787_v26 = vpack.c.bf16 %v715_v23, %v711_v22  ;;  %v719_v28 = vld [vmem:[%s3340_s9 + $0x380] sm:$0xff]  ;;  %v649_v0 = vld [vmem:[%s3340_s9 + $0x150] sm:$0xff] }
  0x98   : > { %806 = vmatpush1.bf16.xpose.msra.mxu0 %v747_v29  ;;  %v716_v19 = vld [vmem:[%s3340_s9 + $0x368] sm:$0xff]  ;;  %v723_v29 = vld [vmem:[%s3340_s9 + $0x3a0] sm:$0xff]  ;;  %v653_v1 = vld [vmem:[%s3340_s9 + $0x170] sm:$0xff] }
  0x99   : > { %807 = vmatprep.subr.bf16.mxu0 %v752_v31  ;;  %v788_v21 = vpack.c.bf16 %v716_v19, %v712_v18  ;;  %v720_v24 = vld [vmem:[%s3340_s9 + $0x388] sm:$0xff]  ;;  %v791_v32 = vpack.c.bf16 %v723_v29, %v719_v28  ;;  %v727_v34 = vld [vmem:[%s3340_s9 + $0x3c0] sm:$0xff]  ;;  %v634_v18 = vld [vmem:[%s3340_s9 + $0xd8] sm:$0xff] }
  0x9a   : > { %v724_v25 = vld [vmem:[%s3340_s9 + $0x3a8] sm:$0xff]  ;;  %v731_v35 = vld [vmem:[%s3340_s9 + $0x3e0] sm:$0xff]  ;;  %v638_v19 = vld [vmem:[%s3340_s9 + $0xf8] sm:$0xff] }
  0x9b   : > { %v792_v27 = vpack.c.bf16 %v724_v25, %v720_v24  ;;  %v728_v30 = vld [vmem:[%s3340_s9 + $0x3c8] sm:$0xff]  ;;  %v795_v38 = vpack.c.bf16 %v731_v35, %v727_v34  ;;  %v287_v39 = vld [vmem:[%s3332_s22] sm:$0xff]  ;;  %v750_v25 = vpack.c.bf16 %v638_v19, %v634_v18  ;;  %v642_v34 = vld [vmem:[%s3340_s9 + $0x118] sm:$0xff] }
  0x9c   : > { %v732_v31 = vld [vmem:[%s3340_s9 + $0x3e8] sm:$0xff]  ;;  %v291_v40 = vld [vmem:[%s3332_s22 + $0x20] sm:$0xff]  ;;  %v415_v44 = vmul.f32 0.001953125, %v287_v39  ;;  %v646_v35 = vld [vmem:[%s3340_s9 + $0x138] sm:$0xff] }
  0x9d   : > { %v796_v33 = vpack.c.bf16 %v732_v31, %v728_v30  ;;  %v419_v45 = vmul.f32 0.001953125, %v291_v40  ;;  %v299_v56 = vld [vmem:[%s3332_s22 + $0x60] sm:$0xff]  ;;  %v304_v58 = vld [vmem:[%s3332_s22 + $0x88] sm:$0xff]  ;;  %v666_v18 = vld [vmem:[%s3340_s9 + $0x1d8] sm:$0xff] }
  0x9e   : > { %v308_v59 = vld [vmem:[%s3332_s22 + $0xa8] sm:$0xff]  ;;  %v432_v62 = vmul.f32 0.001953125, %v304_v58  ;;  %v303_v7 = vld [vmem:[%s3332_s22 + $0x80] sm:$0xff]  ;;  %v670_v19 = vld [vmem:[%s3340_s9 + $0x1f8] sm:$0xff] }
  0x9f   : > { %v543_v52 = vpack.c.bf16 %v419_v45, %v415_v44  ;;  %v436_v63 = vmul.f32 0.001953125, %v308_v59  ;;  %v312_v10 = vld [vmem:[%s3332_s22 + $0xc8] sm:$0xff]  ;;  %v431_v12 = vmul.f32 0.001953125, %v303_v7  ;;  %v311_v23 = vld [vmem:[%s3332_s22 + $0xc0] sm:$0xff] }
  0xa0   : > { %808 = vmatpush1.bf16.xpose.msra.mxu0 %v751_v36  ;;  %v610_v36 = vld [vmem:[%s3340_s9 + $0x18] sm:$0xff]  ;;  %v316_v11 = vld [vmem:[%s3332_s22 + $0xe8] sm:$0xff]  ;;  %v315_v24 = vld [vmem:[%s3332_s22 + $0xe0] sm:$0xff]  ;;  %v439_v28 = vmul.f32 0.001953125, %v311_v23 }
  0xa1   : > { %809 = vmatprep.subr.bf16.mxu0 %v756_v37  ;;  %v614_v37 = vld [vmem:[%s3340_s9 + $0x38] sm:$0xff]  ;;  %v552_v6 = vpack.c.bf16 %v436_v63, %v432_v62  ;;  %v443_v29 = vmul.f32 0.001953125, %v315_v24  ;;  %v319_v39 = vld [vmem:[%s3332_s22 + $0x100] sm:$0xff]  ;;  %v336_v58 = vld [vmem:[%s3332_s22 + $0x188] sm:$0xff] }
  0xa2   : > { %v738_v41 = vpack.c.bf16 %v614_v37, %v610_v36  ;;  %v323_v40 = vld [vmem:[%s3332_s22 + $0x120] sm:$0xff]  ;;  %v447_v44 = vmul.f32 0.001953125, %v319_v39  ;;  %v340_v59 = vld [vmem:[%s3332_s22 + $0x1a8] sm:$0xff]  ;;  %v464_v62 = vmul.f32 0.001953125, %v336_v58 }
  0xa3   : > { %v555_v36 = vpack.c.bf16 %v443_v29, %v439_v28  ;;  %v451_v45 = vmul.f32 0.001953125, %v323_v40  ;;  %v468_v63 = vmul.f32 0.001953125, %v340_v59  ;;  %v335_v7 = vld [vmem:[%s3332_s22 + $0x180] sm:$0xff]  ;;  %v368_v58 = vld [vmem:[%s3332_s22 + $0x288] sm:$0xff] }
  0xa4   : > { %v343_v23 = vld [vmem:[%s3332_s22 + $0x1c0] sm:$0xff]  ;;  %v372_v59 = vld [vmem:[%s3332_s22 + $0x2a8] sm:$0xff] }
  0xa5   : > { %v347_v24 = vld [vmem:[%s3332_s22 + $0x1e0] sm:$0xff]  ;;  %v471_v28 = vmul.f32 0.001953125, %v343_v23 }
  0xa6   : > { %v475_v29 = vmul.f32 0.001953125, %v347_v24  ;;  %v351_v39 = vld [vmem:[%s3332_s22 + $0x200] sm:$0xff] }
  0xa7   : > { %v355_v40 = vld [vmem:[%s3332_s22 + $0x220] sm:$0xff] }
  0xa8   : > { %810 = vmatpush1.bf16.xpose.msra.mxu0 %v755_v42  ;;  %v296_v42 = vld [vmem:[%s3332_s22 + $0x48] sm:$0xff]  ;;  %v375_v23 = vld [vmem:[%s3332_s22 + $0x2c0] sm:$0xff] }
  0xa9   : > { %811 = vmatprep.subr.bf16.mxu0 %v760_v43  ;;  %v300_v43 = vld [vmem:[%s3332_s22 + $0x68] sm:$0xff]  ;;  %v424_v46 = vmul.f32 0.001953125, %v296_v42  ;;  %v379_v24 = vld [vmem:[%s3332_s22 + $0x2e0] sm:$0xff] }
  0xaa   : > { %v428_v47 = vmul.f32 0.001953125, %v300_v43  ;;  %v328_v42 = vld [vmem:[%s3332_s22 + $0x148] sm:$0xff] }
  0xab   : > { %v332_v43 = vld [vmem:[%s3332_s22 + $0x168] sm:$0xff] }
  0xb0   : > { %812 = vmatpush1.bf16.xpose.msra.mxu0 %v759_v48  ;;  %v609_v48 = vld [vmem:[%s3340_s9 + $0x10] sm:$0xff] }
  0xb1   : > { %813 = vmatprep.subr.bf16.mxu0 %v764_v49  ;;  %v613_v49 = vld [vmem:[%s3340_s9 + $0x30] sm:$0xff] }
  0xb2   : > { %v737_v53 = vpack.c.bf16 %v613_v49, %v609_v48  ;;  %v641_v48 = vld [vmem:[%s3340_s9 + $0x110] sm:$0xff] }
  0xb3   : > { %v645_v49 = vld [vmem:[%s3340_s9 + $0x130] sm:$0xff] }
  0xb8   : > { %814 = vmatpush1.bf16.xpose.msra.mxu0 %v763_v54  ;;  %v548_v54 = vpack.c.bf16 %v428_v47, %v424_v46  ;;  %v456_v46 = vmul.f32 0.001953125, %v328_v42  ;;  %v460_v47 = vmul.f32 0.001953125, %v332_v43  ;;  %v360_v42 = vld [vmem:[%s3332_s22 + $0x248] sm:$0xff] }
  0xb9   : > { %815 = vmatprep.subr.bf16.mxu0 %v768_v55  ;;  %v295_v55 = vld [vmem:[%s3332_s22 + $0x40] sm:$0xff]  ;;  %v364_v43 = vld [vmem:[%s3332_s22 + $0x268] sm:$0xff] }
  0xc0   : > { %816 = vmatpush1.bf16.xpose.msra.mxu0 %v767_v60  ;;  %v423_v60 = vmul.f32 0.001953125, %v295_v55  ;;  %v327_v55 = vld [vmem:[%s3332_s22 + $0x140] sm:$0xff] }
  0xc1   : > { %817 = vmatprep.subr.bf16.mxu0 %v772_v61  ;;  %v427_v61 = vmul.f32 0.001953125, %v299_v56  ;;  %v331_v56 = vld [vmem:[%s3332_s22 + $0x160] sm:$0xff] }
  0xc3   : > { %v547_v4 = vpack.c.bf16 %v427_v61, %v423_v60  ;;  %v455_v60 = vmul.f32 0.001953125, %v327_v55  ;;  %v459_v61 = vmul.f32 0.001953125, %v331_v56  ;;  %v359_v55 = vld [vmem:[%s3332_s22 + $0x240] sm:$0xff] }
  0xc4   : > { %v363_v56 = vld [vmem:[%s3332_s22 + $0x260] sm:$0xff] }
  0xc8   : > { %818 = vmatpush1.bf16.xpose.msra.mxu0 %v771_v2  ;;  %v626_v2 = vld [vmem:[%s3340_s9 + $0x98] sm:$0xff] }
  0xc9   : > { %819 = vmatprep.subr.bf16.mxu0 %v776_v3  ;;  %v630_v3 = vld [vmem:[%s3340_s9 + $0xb8] sm:$0xff] }
  0xd0   : > { %820 = vmatpush1.bf16.xpose.msra.mxu0 %v775_v8  ;;  %v307_v8 = vld [vmem:[%s3332_s22 + $0xa0] sm:$0xff] }
  0xd1   : > { %821 = vmatprep.subr.bf16.mxu0 %v780_v9  ;;  %v746_v9 = vpack.c.bf16 %v630_v3, %v626_v2  ;;  %v435_v13 = vmul.f32 0.001953125, %v307_v8  ;;  %v658_v2 = vld [vmem:[%s3340_s9 + $0x198] sm:$0xff]  ;;  %v339_v8 = vld [vmem:[%s3332_s22 + $0x1a0] sm:$0xff] }
  0xd2   : > { %v662_v3 = vld [vmem:[%s3340_s9 + $0x1b8] sm:$0xff] }
  0xd8   : > { %822 = vmatpush1.bf16.xpose.msra.mxu0 %v779_v14  ;;  %v440_v14 = vmul.f32 0.001953125, %v312_v10  ;;  %v344_v10 = vld [vmem:[%s3332_s22 + $0x1c8] sm:$0xff] }
  0xd9   : > { %823 = vmatprep.subr.bf16.mxu0 %v784_v15  ;;  %v444_v15 = vmul.f32 0.001953125, %v316_v11  ;;  %v348_v11 = vld [vmem:[%s3332_s22 + $0x1e8] sm:$0xff] }
  0xdb   : > { %v556_v22 = vpack.c.bf16 %v444_v15, %v440_v14  ;;  %v472_v14 = vmul.f32 0.001953125, %v344_v10  ;;  %v476_v15 = vmul.f32 0.001953125, %v348_v11  ;;  %v376_v10 = vld [vmem:[%s3332_s22 + $0x2c8] sm:$0xff] }
  0xdc   : > { %v380_v11 = vld [vmem:[%s3332_s22 + $0x2e8] sm:$0xff] }
  0xe0   : > { %824 = vmatpush1.bf16.xpose.msra.mxu0 %v783_v20  ;;  %v551_v20 = vpack.c.bf16 %v435_v13, %v431_v12  ;;  %v463_v12 = vmul.f32 0.001953125, %v335_v7  ;;  %v467_v13 = vmul.f32 0.001953125, %v339_v8  ;;  %v367_v7 = vld [vmem:[%s3332_s22 + $0x280] sm:$0xff] }
  0xe1   : > { %825 = vmatprep.subr.bf16.mxu0 %v788_v21  ;;  %v745_v21 = vpack.c.bf16 %v629_v17, %v625_v16  ;;  %v657_v16 = vld [vmem:[%s3340_s9 + $0x190] sm:$0xff]  ;;  %v371_v8 = vld [vmem:[%s3332_s22 + $0x2a0] sm:$0xff] }
  0xe2   : > { %v661_v17 = vld [vmem:[%s3340_s9 + $0x1b0] sm:$0xff] }
  0xe8   : > { %826 = vmatpush1.bf16.xpose.msra.mxu0 %v787_v26  ;;  %v320_v26 = vld [vmem:[%s3332_s22 + $0x108] sm:$0xff] }
  0xe9   : > { %827 = vmatprep.subr.bf16.mxu0 %v792_v27  ;;  %v324_v27 = vld [vmem:[%s3332_s22 + $0x128] sm:$0xff]  ;;  %v448_v30 = vmul.f32 0.001953125, %v320_v26 }
  0xea   : > { %v452_v31 = vmul.f32 0.001953125, %v324_v27  ;;  %v352_v26 = vld [vmem:[%s3332_s22 + $0x208] sm:$0xff] }
  0xeb   : > { %v356_v27 = vld [vmem:[%s3332_s22 + $0x228] sm:$0xff] }
  0xf0   : > { %828 = vmatpush1.bf16.xpose.msra.mxu0 %v791_v32  ;;  %v633_v32 = vld [vmem:[%s3340_s9 + $0xd0] sm:$0xff] }
  0xf1   : > { %829 = vmatprep.subr.bf16.mxu0 %v796_v33  ;;  %v637_v33 = vld [vmem:[%s3340_s9 + $0xf0] sm:$0xff] }
  0xf2   : > { %v749_v37 = vpack.c.bf16 %v637_v33, %v633_v32  ;;  %v665_v32 = vld [vmem:[%s3340_s9 + $0x1d0] sm:$0xff] }
  0xf3   : > { %v669_v33 = vld [vmem:[%s3340_s9 + $0x1f0] sm:$0xff] }
  0xf8   : > { %830 = vmatpush1.bf16.xpose.msra.mxu0 %v795_v38  ;;  %v560_v38 = vpack.c.bf16 %v452_v31, %v448_v30  ;;  %v480_v30 = vmul.f32 0.001953125, %v352_v26  ;;  %v484_v31 = vmul.f32 0.001953125, %v356_v27  ;;  %v384_v26 = vld [vmem:[%s3332_s22 + $0x308] sm:$0xff] }
  0xf9   : > { %992 = vmatprep.subr.bf16.mxu0 %v738_v41  ;;  %v754_v41 = vpack.c.bf16 %v646_v35, %v642_v34  ;;  %v674_v34 = vld [vmem:[%s3340_s9 + $0x218] sm:$0xff]  ;;  %v388_v27 = vld [vmem:[%s3332_s22 + $0x328] sm:$0xff] }
  0xfa   : > { %v678_v35 = vld [vmem:[%s3340_s9 + $0x238] sm:$0xff] }
  0xff   : > { %832 = vmatmul.mubr.bf16.vlgmr.msra.gmra.mrb[0].mxu0 %v543_v52  ;;  %v559_v52 = vpack.c.bf16 %v451_v45, %v447_v44  ;;  %v479_v44 = vmul.f32 0.001953125, %v351_v39  ;;  %v483_v45 = vmul.f32 0.001953125, %v355_v40  ;;  %v383_v39 = vld [vmem:[%s3332_s22 + $0x300] sm:$0xff] }
 0x100   : > { %993 = vmatpush1.bf16.xpose.msra.mxu0 %v737_v53  ;;  %841 = vmatprep.mubr.bf16.mxu0 %v548_v54  ;;  %v753_v53 = vpack.c.bf16 %v645_v49, %v641_v48  ;;  %v564_v54 = vpack.c.bf16 %v460_v47, %v456_v46  ;;  %v488_v46 = vmul.f32 0.001953125, %v360_v42  ;;  %v492_v47 = vmul.f32 0.001953125, %v364_v43  ;;  %v673_v48 = vld [vmem:[%s3340_s9 + $0x210] sm:$0xff]  ;;  %v387_v40 = vld [vmem:[%s3332_s22 + $0x320] sm:$0xff]  ;;  %v392_v42 = vld [vmem:[%s3332_s22 + $0x348] sm:$0xff] }
 0x101   : > { %994 = vmatprep.subr.bf16.mxu0 %v742_v57  ;;  %v758_v57 = vpack.c.bf16 %v654_v51, %v650_v50  ;;  %v677_v49 = vld [vmem:[%s3340_s9 + $0x230] sm:$0xff]  ;;  %v682_v50 = vld [vmem:[%s3340_s9 + $0x258] sm:$0xff]  ;;  %v396_v43 = vld [vmem:[%s3332_s22 + $0x368] sm:$0xff] }
 0x102   : > { %v686_v51 = vld [vmem:[%s3340_s9 + $0x278] sm:$0xff] }
 0x107   : > { %842 = vmatmul.mubr.bf16.gmra.mrb[4].mxu0 %v547_v4  ;;  %v563_v4 = vpack.c.bf16 %v459_v61, %v455_v60  ;;  %v487_v60 = vmul.f32 0.001953125, %v359_v55  ;;  %v491_v61 = vmul.f32 0.001953125, %v363_v56  ;;  %v391_v55 = vld [vmem:[%s3332_s22 + $0x340] sm:$0xff] }
 0x108   : > { %995 = vmatpush1.bf16.xpose.msra.mxu0 %v741_v5  ;;  %851 = vmatprep.mubr.bf16.mxu0 %v552_v6  ;;  %v757_v5 = vpack.c.bf16 %v653_v1, %v649_v0  ;;  %v568_v6 = vpack.c.bf16 %v468_v63, %v464_v62  ;;  %v496_v62 = vmul.f32 0.001953125, %v368_v58  ;;  %v500_v63 = vmul.f32 0.001953125, %v372_v59  ;;  %v681_v0 = vld [vmem:[%s3340_s9 + $0x250] sm:$0xff]  ;;  %v395_v56 = vld [vmem:[%s3332_s22 + $0x360] sm:$0xff]  ;;  %v400_v58 = vld [vmem:[%s3332_s22 + $0x388] sm:$0xff] }
 0x109   : > { %996 = vmatprep.subr.bf16.mxu0 %v746_v9  ;;  %v762_v9 = vpack.c.bf16 %v662_v3, %v658_v2  ;;  %v685_v1 = vld [vmem:[%s3340_s9 + $0x270] sm:$0xff]  ;;  %v690_v2 = vld [vmem:[%s3340_s9 + $0x298] sm:$0xff]  ;;  %v404_v59 = vld [vmem:[%s3332_s22 + $0x3a8] sm:$0xff] }
 0x10a   : > { %v694_v3 = vld [vmem:[%s3340_s9 + $0x2b8] sm:$0xff] }
 0x10f   : > { %852 = vmatmul.mubr.bf16.gmra.mrb[8].mxu0 %v551_v20  ;;  %v567_v20 = vpack.c.bf16 %v467_v13, %v463_v12  ;;  %v495_v12 = vmul.f32 0.001953125, %v367_v7  ;;  %v499_v13 = vmul.f32 0.001953125, %v371_v8  ;;  %v399_v7 = vld [vmem:[%s3332_s22 + $0x380] sm:$0xff] }
 0x110   : > { %997 = vmatpush1.bf16.xpose.msra.mxu0 %v745_v21  ;;  %861 = vmatprep.mubr.bf16.mxu0 %v556_v22  ;;  %v761_v21 = vpack.c.bf16 %v661_v17, %v657_v16  ;;  %v572_v22 = vpack.c.bf16 %v476_v15, %v472_v14  ;;  %v504_v14 = vmul.f32 0.001953125, %v376_v10  ;;  %v508_v15 = vmul.f32 0.001953125, %v380_v11  ;;  %v689_v16 = vld [vmem:[%s3340_s9 + $0x290] sm:$0xff]  ;;  %v403_v8 = vld [vmem:[%s3332_s22 + $0x3a0] sm:$0xff]  ;;  %v408_v10 = vld [vmem:[%s3332_s22 + $0x3c8] sm:$0xff] }
 0x111   : > { %998 = vmatprep.subr.bf16.mxu0 %v750_v25  ;;  %v766_v25 = vpack.c.bf16 %v670_v19, %v666_v18  ;;  %v693_v17 = vld [vmem:[%s3340_s9 + $0x2b0] sm:$0xff]  ;;  %v698_v18 = vld [vmem:[%s3340_s9 + $0x2d8] sm:$0xff]  ;;  %v412_v11 = vld [vmem:[%s3332_s22 + $0x3e8] sm:$0xff] }
 0x112   : > { %v702_v19 = vld [vmem:[%s3340_s9 + $0x2f8] sm:$0xff] }
 0x117   : > { %862 = vmatmul.mubr.bf16.gmra.mrb[12].mxu0 %v555_v36  ;;  %v571_v36 = vpack.c.bf16 %v475_v29, %v471_v28  ;;  %v503_v28 = vmul.f32 0.001953125, %v375_v23  ;;  %v507_v29 = vmul.f32 0.001953125, %v379_v24  ;;  %v407_v23 = vld [vmem:[%s3332_s22 + $0x3c0] sm:$0xff] }
 0x118   : > { %999 = vmatpush1.bf16.xpose.msra.mxu0 %v749_v37  ;;  %871 = vmatprep.mubr.bf16.mxu0 %v560_v38  ;;  %v765_v37 = vpack.c.bf16 %v669_v33, %v665_v32  ;;  %v576_v38 = vpack.c.bf16 %v484_v31, %v480_v30  ;;  %v512_v30 = vmul.f32 0.001953125, %v384_v26  ;;  %v516_v31 = vmul.f32 0.001953125, %v388_v27  ;;  %v697_v32 = vld [vmem:[%s3340_s9 + $0x2d0] sm:$0xff]  ;;  %v411_v24 = vld [vmem:[%s3332_s22 + $0x3e0] sm:$0xff]  ;;  %v290_v26 = vld [vmem:[%s3332_s22 + $0x18] sm:$0xff] }
 0x119   : > { %1000 = vmatprep.subr.bf16.mxu0 %v754_v41  ;;  %v770_v41 = vpack.c.bf16 %v678_v35, %v674_v34  ;;  %v701_v33 = vld [vmem:[%s3340_s9 + $0x2f0] sm:$0xff]  ;;  %v706_v34 = vld [vmem:[%s3340_s9 + $0x318] sm:$0xff] }
 0x11a   : > { %v710_v35 = vld [vmem:[%s3340_s9 + $0x338] sm:$0xff] }
 0x11b   : > { %v294_v27 = vld [vmem:[%s3332_s22 + $0x38] sm:$0xff] }
 0x11f   : > { %872 = vmatmul.mubr.bf16.gmra.mrb[16].mxu0 %v559_v52  ;;  %v575_v52 = vpack.c.bf16 %v483_v45, %v479_v44  ;;  %v511_v44 = vmul.f32 0.001953125, %v383_v39  ;;  %v515_v45 = vmul.f32 0.001953125, %v387_v40  ;;  %v298_v39 = vld [vmem:[%s3332_s22 + $0x58] sm:$0xff] }
 0x120   : > { %1001 = vmatpush1.bf16.xpose.msra.mxu0 %v753_v53  ;;  %881 = vmatprep.mubr.bf16.mxu0 %v564_v54  ;;  %v769_v53 = vpack.c.bf16 %v677_v49, %v673_v48  ;;  %v580_v54 = vpack.c.bf16 %v492_v47, %v488_v46  ;;  %v520_v46 = vmul.f32 0.001953125, %v392_v42  ;;  %v524_v47 = vmul.f32 0.001953125, %v396_v43  ;;  %v705_v48 = vld [vmem:[%s3340_s9 + $0x310] sm:$0xff]  ;;  %v302_v40 = vld [vmem:[%s3332_s22 + $0x78] sm:$0xff] }
 0x121   : > { %1002 = vmatprep.subr.bf16.mxu0 %v758_v57  ;;  %v774_v57 = vpack.c.bf16 %v686_v51, %v682_v50  ;;  %v709_v49 = vld [vmem:[%s3340_s9 + $0x330] sm:$0xff]  ;;  %v714_v50 = vld [vmem:[%s3340_s9 + $0x358] sm:$0xff]  ;;  %v426_v43 = vmul.f32 0.001953125, %v298_v39 }
 0x122   : > { %v718_v51 = vld [vmem:[%s3340_s9 + $0x378] sm:$0xff] }
 0x127   : > { %882 = vmatmul.mubr.bf16.gmra.mrb[20].mxu0 %v563_v4  ;;  %v579_v4 = vpack.c.bf16 %v491_v61, %v487_v60  ;;  %v519_v60 = vmul.f32 0.001953125, %v391_v55  ;;  %v523_v61 = vmul.f32 0.001953125, %v395_v56 }
 0x128   : > { %1003 = vmatpush1.bf16.xpose.msra.mxu0 %v757_v5  ;;  %891 = vmatprep.mubr.bf16.mxu0 %v568_v6  ;;  %v773_v5 = vpack.c.bf16 %v685_v1, %v681_v0  ;;  %v584_v6 = vpack.c.bf16 %v500_v63, %v496_v62  ;;  %v528_v62 = vmul.f32 0.001953125, %v400_v58  ;;  %v532_v63 = vmul.f32 0.001953125, %v404_v59  ;;  %v713_v0 = vld [vmem:[%s3340_s9 + $0x350] sm:$0xff]  ;;  %v314_v59 = vld [vmem:[%s3332_s22 + $0xd8] sm:$0xff] }
 0x129   : > { %1004 = vmatprep.subr.bf16.mxu0 %v762_v9  ;;  %v778_v9 = vpack.c.bf16 %v694_v3, %v690_v2  ;;  %v717_v1 = vld [vmem:[%s3340_s9 + $0x370] sm:$0xff]  ;;  %v722_v2 = vld [vmem:[%s3340_s9 + $0x398] sm:$0xff] }
 0x12a   : > { %v726_v3 = vld [vmem:[%s3340_s9 + $0x3b8] sm:$0xff]  ;;  %v309_v58 = vld [vmem:[%s3332_s22 + $0xb0] sm:$0xff] }
 0x12f   : > { %892 = vmatmul.mubr.bf16.gmra.mrb[24].mxu0 %v567_v20  ;;  %v583_v20 = vpack.c.bf16 %v499_v13, %v495_v12  ;;  %v527_v12 = vmul.f32 0.001953125, %v399_v7  ;;  %v531_v13 = vmul.f32 0.001953125, %v403_v8 }
 0x130   : > { %1005 = vmatpush1.bf16.xpose.msra.mxu0 %v761_v21  ;;  %901 = vmatprep.mubr.bf16.mxu0 %v572_v22  ;;  %v777_v21 = vpack.c.bf16 %v693_v17, %v689_v16  ;;  %v588_v22 = vpack.c.bf16 %v508_v15, %v504_v14  ;;  %v536_v14 = vmul.f32 0.001953125, %v408_v10  ;;  %v540_v15 = vmul.f32 0.001953125, %v412_v11  ;;  %v721_v16 = vld [vmem:[%s3340_s9 + $0x390] sm:$0xff] }
 0x131   : > { %1006 = vmatprep.subr.bf16.mxu0 %v766_v25  ;;  %v782_v25 = vpack.c.bf16 %v702_v19, %v698_v18  ;;  %v725_v17 = vld [vmem:[%s3340_s9 + $0x3b0] sm:$0xff]  ;;  %v730_v18 = vld [vmem:[%s3340_s9 + $0x3d8] sm:$0xff] }
 0x132   : > { %v734_v19 = vld [vmem:[%s3340_s9 + $0x3f8] sm:$0xff] }
 0x137   : > { %902 = vmatmul.mubr.bf16.gmra.mrb[28].mxu0 %v571_v36  ;;  %v587_v36 = vpack.c.bf16 %v507_v29, %v503_v28  ;;  %v535_v28 = vmul.f32 0.001953125, %v407_v23  ;;  %v539_v29 = vmul.f32 0.001953125, %v411_v24  ;;  %v329_v23 = vld [vmem:[%s3332_s22 + $0x150] sm:$0xff] }
 0x138   : > { %1007 = vmatpush1.bf16.xpose.msra.mxu0 %v765_v37  ;;  %911 = vmatprep.mubr.bf16.mxu0 %v576_v38  ;;  %v781_v37 = vpack.c.bf16 %v701_v33, %v697_v32  ;;  %v592_v38 = vpack.c.bf16 %v516_v31, %v512_v30  ;;  %v418_v30 = vmul.f32 0.001953125, %v290_v26  ;;  %v422_v31 = vmul.f32 0.001953125, %v294_v27  ;;  %v729_v32 = vld [vmem:[%s3340_s9 + $0x3d0] sm:$0xff]  ;;  %v342_v26 = vld [vmem:[%s3332_s22 + $0x1b8] sm:$0xff] }
 0x139   : > { %1008 = vmatprep.subr.bf16.mxu0 %v770_v41  ;;  %v786_v41 = vpack.c.bf16 %v710_v35, %v706_v34  ;;  %v733_v33 = vld [vmem:[%s3340_s9 + $0x3f0] sm:$0xff]  ;;  %v603_v34 = vpack.c.bf16 %v539_v29, %v535_v28  ;;  %v457_v27 = vmul.f32 0.001953125, %v329_v23 }
 0x13a   : > { %v797_v35 = vpack.c.bf16 %v733_v33, %v729_v32  ;;  %v333_v24 = vld [vmem:[%s3332_s22 + $0x170] sm:$0xff] }
 0x13b   : > { %v461_v28 = vmul.f32 0.001953125, %v333_v24  ;;  %v337_v33 = vld [vmem:[%s3332_s22 + $0x190] sm:$0xff] }
 0x13f   : > { %912 = vmatmul.mubr.bf16.gmra.mrb[32].mxu0 %v575_v52  ;;  %v591_v52 = vpack.c.bf16 %v515_v45, %v511_v44  ;;  %v430_v44 = vmul.f32 0.001953125, %v302_v40 }
 0x140   : > { %1009 = vmatpush1.bf16.xpose.msra.mxu0 %v769_v53  ;;  %921 = vmatprep.mubr.bf16.mxu0 %v580_v54  ;;  %v785_v53 = vpack.c.bf16 %v709_v49, %v705_v48  ;;  %v596_v54 = vpack.c.bf16 %v524_v47, %v520_v46  ;;  %v297_v47 = vld [vmem:[%s3332_s22 + $0x50] sm:$0xff]  ;;  %v306_v49 = vld [vmem:[%s3332_s22 + $0x98] sm:$0xff] }
 0x141   : > { %1010 = vmatprep.subr.bf16.mxu0 %v774_v57  ;;  %v790_v57 = vpack.c.bf16 %v718_v51, %v714_v50  ;;  %v550_v46 = vpack.c.bf16 %v430_v44, %v426_v43  ;;  %v301_v48 = vld [vmem:[%s3332_s22 + $0x70] sm:$0xff]  ;;  %v310_v50 = vld [vmem:[%s3332_s22 + $0xb8] sm:$0xff]  ;;  %v425_v51 = vmul.f32 0.001953125, %v297_v47 }
 0x142   : > { %v345_v43 = vld [vmem:[%s3332_s22 + $0x1d0] sm:$0xff] }
 0x143   : > { %v349_v44 = vld [vmem:[%s3332_s22 + $0x1f0] sm:$0xff]  ;;  %v473_v47 = vmul.f32 0.001953125, %v345_v43 }
 0x147   : > { %922 = vmatmul.mubr.bf16.gmra.mrb[36].mxu0 %v579_v4  ;;  %v595_v4 = vpack.c.bf16 %v523_v61, %v519_v60  ;;  %v318_v60 = vld [vmem:[%s3332_s22 + $0xf8] sm:$0xff] }
 0x148   : > { %1011 = vmatpush1.bf16.xpose.msra.mxu0 %v773_v5  ;;  %931 = vmatprep.mubr.bf16.mxu0 %v584_v6  ;;  %v789_v5 = vpack.c.bf16 %v717_v1, %v713_v0  ;;  %v600_v6 = vpack.c.bf16 %v532_v63, %v528_v62  ;;  %v437_v62 = vmul.f32 0.001953125, %v309_v58  ;;  %v442_v63 = vmul.f32 0.001953125, %v314_v59 }
 0x149   : > { %1012 = vmatprep.subr.bf16.mxu0 %v778_v9  ;;  %v794_v9 = vpack.c.bf16 %v726_v3, %v722_v2  ;;  %v446_v0 = vmul.f32 0.001953125, %v318_v60  ;;  %v313_v3 = vld [vmem:[%s3332_s22 + $0xd0] sm:$0xff] }
 0x14a   : > { %v441_v7 = vmul.f32 0.001953125, %v313_v3 }
 0x14b   : > { %v558_v2 = vpack.c.bf16 %v446_v0, %v442_v63  ;;  %v361_v63 = vld [vmem:[%s3332_s22 + $0x250] sm:$0xff] }
 0x14c   : > { %v365_v0 = vld [vmem:[%s3332_s22 + $0x270] sm:$0xff]  ;;  %v489_v3 = vmul.f32 0.001953125, %v361_v63 }
 0x14f   : > { %932 = vmatmul.mubr.bf16.gmra.mrb[40].mxu0 %v583_v20  ;;  %v599_v20 = vpack.c.bf16 %v531_v13, %v527_v12  ;;  %v321_v13 = vld [vmem:[%s3332_s22 + $0x110] sm:$0xff] }
 0x150   : > { %1013 = vmatpush1.bf16.xpose.msra.mxu0 %v777_v21  ;;  %941 = vmatprep.mubr.bf16.mxu0 %v588_v22  ;;  %v793_v21 = vpack.c.bf16 %v725_v17, %v721_v16  ;;  %v604_v22 = vpack.c.bf16 %v540_v15, %v536_v14  ;;  %v325_v14 = vld [vmem:[%s3332_s22 + $0x130] sm:$0xff]  ;;  %v330_v15 = vld [vmem:[%s3332_s22 + $0x158] sm:$0xff]  ;;  %v449_v17 = vmul.f32 0.001953125, %v321_v13 }
 0x151   : > { %1014 = vmatprep.subr.bf16.mxu0 %v782_v25  ;;  %v798_v25 = vpack.c.bf16 %v734_v19, %v730_v18  ;;  %v334_v16 = vld [vmem:[%s3332_s22 + $0x178] sm:$0xff]  ;;  %v453_v18 = vmul.f32 0.001953125, %v325_v14  ;;  %v458_v19 = vmul.f32 0.001953125, %v330_v15 }
 0x157   : > { %942 = vmatmul.mubr.bf16.gmra.mrb[44].mxu0 %v587_v36  ;;  %v546_v36 = vpack.c.bf16 %v422_v31, %v418_v30  ;;  %v470_v30 = vmul.f32 0.001953125, %v342_v26  ;;  %v565_v31 = vpack.c.bf16 %v461_v28, %v457_v27 }
 0x158   : > { %1015 = vmatpush1.bf16.xpose.msra.mxu0 %v781_v37  ;;  %951 = vmatprep.mubr.bf16.mxu0 %v592_v38  ;;  %v289_v37 = vld [vmem:[%s3332_s22 + $0x10] sm:$0xff] }
 0x159   : > { %1016 = vmatprep.subr.bf16.mxu0 %v786_v41  ;;  %v293_v38 = vld [vmem:[%s3332_s22 + $0x30] sm:$0xff]  ;;  %v417_v41 = vmul.f32 0.001953125, %v289_v37  ;;  %v465_v37 = vmul.f32 0.001953125, %v337_v33 }
 0x15a   : > { %v421_v42 = vmul.f32 0.001953125, %v293_v38 }
 0x15c   : > { %v545_v45 = vpack.c.bf16 %v421_v42, %v417_v41 }
 0x15f   : > { %952 = vmatmul.mubr.bf16.gmra.mrb[48].mxu0 %v591_v52  ;;  %v429_v52 = vmul.f32 0.001953125, %v301_v48  ;;  %v477_v48 = vmul.f32 0.001953125, %v349_v44 }
 0x160   : > { %1017 = vmatpush1.bf16.xpose.msra.mxu0 %v785_v53  ;;  %961 = vmatprep.mubr.bf16.mxu0 %v596_v54  ;;  %v434_v53 = vmul.f32 0.001953125, %v306_v49  ;;  %v438_v54 = vmul.f32 0.001953125, %v310_v50 }
 0x161   : > { %1018 = vmatprep.subr.bf16.mxu0 %v790_v57  ;;  %v549_v55 = vpack.c.bf16 %v429_v52, %v425_v51  ;;  %v305_v57 = vld [vmem:[%s3332_s22 + $0x90] sm:$0xff]  ;;  %v573_v51 = vpack.c.bf16 %v477_v48, %v473_v47 }
 0x162   : > { %v554_v56 = vpack.c.bf16 %v438_v54, %v434_v53  ;;  %v433_v61 = vmul.f32 0.001953125, %v305_v57  ;;  %v353_v53 = vld [vmem:[%s3332_s22 + $0x210] sm:$0xff] }
 0x163   : > { %v357_v54 = vld [vmem:[%s3332_s22 + $0x230] sm:$0xff]  ;;  %v481_v57 = vmul.f32 0.001953125, %v353_v53 }
 0x164   : > { %v553_v1 = vpack.c.bf16 %v437_v62, %v433_v61  ;;  %v485_v58 = vmul.f32 0.001953125, %v357_v54 }
 0x166   : > { %v577_v61 = vpack.c.bf16 %v485_v58, %v481_v57 }
 0x167   : > { %962 = vmatmul.mubr.bf16.gmra.mrb[52].mxu0 %v595_v4  ;;  %v317_v4 = vld [vmem:[%s3332_s22 + $0xf0] sm:$0xff] }
 0x168   : > { %1019 = vmatpush1.bf16.xpose.msra.mxu0 %v789_v5  ;;  %971 = vmatprep.mubr.bf16.mxu0 %v600_v6  ;;  %v322_v5 = vld [vmem:[%s3332_s22 + $0x118] sm:$0xff]  ;;  %v445_v8 = vmul.f32 0.001953125, %v317_v4  ;;  %v493_v4 = vmul.f32 0.001953125, %v365_v0 }
 0x169   : > { %1020 = vmatprep.subr.bf16.mxu0 %v794_v9  ;;  %v326_v6 = vld [vmem:[%s3332_s22 + $0x138] sm:$0xff]  ;;  %v450_v9 = vmul.f32 0.001953125, %v322_v5 }
 0x16a   : > { %v454_v10 = vmul.f32 0.001953125, %v326_v6  ;;  %v557_v11 = vpack.c.bf16 %v445_v8, %v441_v7  ;;  %v581_v7 = vpack.c.bf16 %v493_v4, %v489_v3 }
 0x16c   : > { %v562_v12 = vpack.c.bf16 %v454_v10, %v450_v9  ;;  %v369_v9 = vld [vmem:[%s3332_s22 + $0x290] sm:$0xff] }
 0x16d   : > { %v373_v10 = vld [vmem:[%s3332_s22 + $0x2b0] sm:$0xff]  ;;  %v497_v13 = vmul.f32 0.001953125, %v369_v9 }
 0x16e   : > { %v501_v14 = vmul.f32 0.001953125, %v373_v10 }
 0x16f   : > { %972 = vmatmul.mubr.bf16.gmra.mrb[56].mxu0 %v599_v20  ;;  %v462_v20 = vmul.f32 0.001953125, %v334_v16 }
 0x170   : > { %1021 = vmatpush1.bf16.xpose.msra.mxu0 %v793_v21  ;;  %981 = vmatprep.mubr.bf16.mxu0 %v604_v22  ;;  %v561_v21 = vpack.c.bf16 %v453_v18, %v449_v17  ;;  %v585_v17 = vpack.c.bf16 %v501_v14, %v497_v13 }
 0x171   : > { %1022 = vmatprep.subr.bf16.mxu0 %v798_v25  ;;  %v566_v22 = vpack.c.bf16 %v462_v20, %v458_v19  ;;  %v338_v25 = vld [vmem:[%s3332_s22 + $0x198] sm:$0xff]  ;;  %v377_v19 = vld [vmem:[%s3332_s22 + $0x2d0] sm:$0xff] }
 0x172   : > { %v466_v29 = vmul.f32 0.001953125, %v338_v25  ;;  %v381_v20 = vld [vmem:[%s3332_s22 + $0x2f0] sm:$0xff]  ;;  %v505_v23 = vmul.f32 0.001953125, %v377_v19 }
 0x173   : > { %v509_v24 = vmul.f32 0.001953125, %v381_v20 }
 0x174   : > { %v570_v32 = vpack.c.bf16 %v470_v30, %v466_v29  ;;  %v385_v29 = vld [vmem:[%s3332_s22 + $0x310] sm:$0xff] }
 0x175   : > { %v589_v27 = vpack.c.bf16 %v509_v24, %v505_v23  ;;  %v389_v30 = vld [vmem:[%s3332_s22 + $0x330] sm:$0xff]  ;;  %v513_v33 = vmul.f32 0.001953125, %v385_v29 }
 0x177   : > { %982 = vmatmul.mubr.bf16.gmra.mrb[60].mxu0 %v603_v34  ;;  %v341_v34 = vld [vmem:[%s3332_s22 + $0x1b0] sm:$0xff] }
 0x178   : > { %1023 = vmatpush1.bf16.xpose.msra.mxu0 %v797_v35  ;;  %1024 = vmatprep.mubr.bf16.mxu0 %v546_v36  ;;  %v346_v35 = vld [vmem:[%s3332_s22 + $0x1d8] sm:$0xff]  ;;  %v469_v38 = vmul.f32 0.001953125, %v341_v34  ;;  %v517_v34 = vmul.f32 0.001953125, %v389_v30 }
 0x179   : > { %v350_v36 = vld [vmem:[%s3332_s22 + $0x1f8] sm:$0xff]  ;;  %v474_v39 = vmul.f32 0.001953125, %v346_v35 }
 0x17a   : > { %v478_v40 = vmul.f32 0.001953125, %v350_v36  ;;  %v569_v41 = vpack.c.bf16 %v469_v38, %v465_v37  ;;  %v593_v37 = vpack.c.bf16 %v517_v34, %v513_v33 }
 0x17c   : > { %v574_v42 = vpack.c.bf16 %v478_v40, %v474_v39  ;;  %v393_v39 = vld [vmem:[%s3332_s22 + $0x350] sm:$0xff] }
 0x17d   : > { %v397_v40 = vld [vmem:[%s3332_s22 + $0x370] sm:$0xff]  ;;  %v521_v43 = vmul.f32 0.001953125, %v393_v39 }
 0x17e   : > { %v525_v44 = vmul.f32 0.001953125, %v397_v40 }
 0x17f   : > { %1025 = vmatmul.mubr.bf16.vlgmr.msra.gmra.mrb[0].mxu0 %v545_v45  ;;  %v354_v45 = vld [vmem:[%s3332_s22 + $0x218] sm:$0xff] }
 0x180   : > { %1034 = vmatprep.mubr.bf16.mxu0 %v550_v46  ;;  %v358_v46 = vld [vmem:[%s3332_s22 + $0x238] sm:$0xff]  ;;  %v482_v49 = vmul.f32 0.001953125, %v354_v45  ;;  %v597_v47 = vpack.c.bf16 %v525_v44, %v521_v43 }
 0x181   : > { %v486_v50 = vmul.f32 0.001953125, %v358_v46 }
 0x183   : > { %v578_v52 = vpack.c.bf16 %v486_v50, %v482_v49  ;;  %v401_v49 = vld [vmem:[%s3332_s22 + $0x390] sm:$0xff] }
 0x184   : > { %v405_v50 = vld [vmem:[%s3332_s22 + $0x3b0] sm:$0xff]  ;;  %v529_v53 = vmul.f32 0.001953125, %v401_v49 }
 0x185   : > { %v533_v54 = vmul.f32 0.001953125, %v405_v50 }
 0x187   : > { %1035 = vmatmul.mubr.bf16.gmra.mrb[4].mxu0 %v549_v55  ;;  %v362_v55 = vld [vmem:[%s3332_s22 + $0x258] sm:$0xff]  ;;  %v601_v57 = vpack.c.bf16 %v533_v54, %v529_v53 }
 0x188   : > { %1044 = vmatprep.mubr.bf16.mxu0 %v554_v56  ;;  %v366_v56 = vld [vmem:[%s3332_s22 + $0x278] sm:$0xff]  ;;  %v490_v59 = vmul.f32 0.001953125, %v362_v55 }
 0x189   : > { %v494_v60 = vmul.f32 0.001953125, %v366_v56 }
 0x18b   : > { %v582_v62 = vpack.c.bf16 %v494_v60, %v490_v59  ;;  %v409_v59 = vld [vmem:[%s3332_s22 + $0x3d0] sm:$0xff] }
 0x18c   : > { %v413_v60 = vld [vmem:[%s3332_s22 + $0x3f0] sm:$0xff] }
 0x18f   : > { %1045 = vmatmul.mubr.bf16.gmra.mrb[8].mxu0 %v553_v1  ;;  %v370_v1 = vld [vmem:[%s3332_s22 + $0x298] sm:$0xff] }
 0x190   : > { %1054 = vmatprep.mubr.bf16.mxu0 %v558_v2  ;;  %v374_v2 = vld [vmem:[%s3332_s22 + $0x2b8] sm:$0xff]  ;;  %v498_v5 = vmul.f32 0.001953125, %v370_v1 }
 0x191   : > { %v502_v6 = vmul.f32 0.001953125, %v374_v2 }
 0x193   : > { %v586_v8 = vpack.c.bf16 %v502_v6, %v498_v5 }
 0x197   : > { %1055 = vmatmul.mubr.bf16.gmra.mrb[12].mxu0 %v557_v11  ;;  %v378_v11 = vld [vmem:[%s3332_s22 + $0x2d8] sm:$0xff] }
 0x198   : > { %1064 = vmatprep.mubr.bf16.mxu0 %v562_v12  ;;  %v382_v12 = vld [vmem:[%s3332_s22 + $0x2f8] sm:$0xff]  ;;  %v506_v15 = vmul.f32 0.001953125, %v378_v11 }
 0x199   : > { %v510_v16 = vmul.f32 0.001953125, %v382_v12 }
 0x19b   : > { %v590_v18 = vpack.c.bf16 %v510_v16, %v506_v15 }
 0x19f   : > { %1065 = vmatmul.mubr.bf16.gmra.mrb[16].mxu0 %v561_v21  ;;  %v386_v21 = vld [vmem:[%s3332_s22 + $0x318] sm:$0xff] }
 0x1a0   : > { %1074 = vmatprep.mubr.bf16.mxu0 %v566_v22  ;;  %v390_v22 = vld [vmem:[%s3332_s22 + $0x338] sm:$0xff]  ;;  %v514_v25 = vmul.f32 0.001953125, %v386_v21 }
 0x1a1   : > { %v518_v26 = vmul.f32 0.001953125, %v390_v22 }
 0x1a3   : > { %v594_v28 = vpack.c.bf16 %v518_v26, %v514_v25 }
 0x1a7   : > { %1075 = vmatmul.mubr.bf16.gmra.mrb[20].mxu0 %v565_v31  ;;  %v394_v31 = vld [vmem:[%s3332_s22 + $0x358] sm:$0xff] }
 0x1a8   : > { %1084 = vmatprep.mubr.bf16.mxu0 %v570_v32  ;;  %v398_v32 = vld [vmem:[%s3332_s22 + $0x378] sm:$0xff]  ;;  %v522_v35 = vmul.f32 0.001953125, %v394_v31 }
 0x1a9   : > { %v526_v36 = vmul.f32 0.001953125, %v398_v32 }
 0x1ab   : > { %v598_v38 = vpack.c.bf16 %v526_v36, %v522_v35 }
 0x1af   : > { %1085 = vmatmul.mubr.bf16.gmra.mrb[24].mxu0 %v569_v41  ;;  %v402_v41 = vld [vmem:[%s3332_s22 + $0x398] sm:$0xff] }
 0x1b0   : > { %1094 = vmatprep.mubr.bf16.mxu0 %v574_v42  ;;  %v406_v42 = vld [vmem:[%s3332_s22 + $0x3b8] sm:$0xff]  ;;  %v530_v45 = vmul.f32 0.001953125, %v402_v41 }
 0x1b1   : > { %v534_v46 = vmul.f32 0.001953125, %v406_v42 }
 0x1b3   : > { %v602_v48 = vpack.c.bf16 %v534_v46, %v530_v45 }
 0x1b7   : > { %1095 = vmatmul.mubr.bf16.gmra.mrb[28].mxu0 %v573_v51  ;;  %v410_v51 = vld [vmem:[%s3332_s22 + $0x3d8] sm:$0xff] }
 0x1b8   : > { %1104 = vmatprep.mubr.bf16.mxu0 %v578_v52  ;;  %v414_v52 = vld [vmem:[%s3332_s22 + $0x3f8] sm:$0xff]  ;;  %v538_v55 = vmul.f32 0.001953125, %v410_v51 }
 0x1b9   : > { %v542_v56 = vmul.f32 0.001953125, %v414_v52 }
 0x1bb   : > { %v606_v58 = vpack.c.bf16 %v542_v56, %v538_v55 }
 0x1bf   : > { %1105 = vmatmul.mubr.bf16.gmra.mrb[32].mxu0 %v577_v61  ;;  %v537_v61 = vmul.f32 0.001953125, %v409_v59 }
 0x1c0   : > { %1114 = vmatprep.mubr.bf16.mxu0 %v582_v62  ;;  %v541_v62 = vmul.f32 0.001953125, %v413_v60 }
 0x1c2   : > { %v605_v63 = vpack.c.bf16 %v541_v62, %v537_v61 }
 0x1c7   : > { %1115 = vmatmul.mubr.bf16.gmra.mrb[36].mxu0 %v581_v7 }
 0x1c8   : > { %1124 = vmatprep.mubr.bf16.mxu0 %v586_v8 }
 0x1cf   : > { %1125 = vmatmul.mubr.bf16.gmra.mrb[40].mxu0 %v585_v17 }
 0x1d0   : > { %1134 = vmatprep.mubr.bf16.mxu0 %v590_v18 }
 0x1d7   : > { %1135 = vmatmul.mubr.bf16.gmra.mrb[44].mxu0 %v589_v27 }
 0x1d8   : > { %1144 = vmatprep.mubr.bf16.mxu0 %v594_v28 }
 0x1df   : > { %1145 = vmatmul.mubr.bf16.gmra.mrb[48].mxu0 %v593_v37 }
 0x1e0   : > { %1154 = vmatprep.mubr.bf16.mxu0 %v598_v38 }
 0x1e7   : > { %1155 = vmatmul.mubr.bf16.gmra.mrb[52].mxu0 %v597_v47 }
 0x1e8   : > { %1164 = vmatprep.mubr.bf16.mxu0 %v602_v48 }
 0x1ef   : > { %1165 = vmatmul.mubr.bf16.gmra.mrb[56].mxu0 %v601_v57 }
 0x1f0   : > { %1174 = vmatprep.mubr.bf16.mxu0 %v606_v58 }
 0x1f7   : > { %1175 = vmatmul.mubr.bf16.gmra.mrb[60].mxu0 %v605_v63 }
 0x252   : > { %v3602_v0 = vpop.f32.mrb[0].mxu0 }
 0x253   : > { %v3604_v1 = vpop.f32.mrb[1].mxu0 }
 0x254   : > { %v3606_v2 = vpop.f32.mrb[2].mxu0  ;;  %v1185_v3 = vmax.f32 %v3602_v0, %v3604_v1 }
 0x255   : > { %v3610_v4 = vpop.f32.mrb[3].mxu0 }
 0x256   : > { %1186 = vmax.xlane.f32.xlu0 %v1185_v3  ;;  %v1188_v5 = vmax.f32 %v3606_v2, %v3610_v4 }
 0x25a   : > { %1189 = vmax.xlane.f32.xlu0 %v1188_v5  ;;  %v3614_v6 = vpop.f32.mrb[4].mxu0 }
 0x25b   : > { %v3616_v7 = vpop.f32.mrb[5].mxu0 }
 0x25c   : > { %v3618_v8 = vpop.f32.mrb[6].mxu0  ;;  %v1191_v9 = vmax.f32 %v3614_v6, %v3616_v7 }
 0x25d   : > { %v3622_v10 = vpop.f32.mrb[7].mxu0 }
 0x25e   : > { %1192 = vmax.xlane.f32.xlu1 %v1191_v9  ;;  %v1194_v11 = vmax.f32 %v3618_v8, %v3622_v10 }
 0x262   : > { %1195 = vmax.xlane.f32.xlu1 %v1194_v11  ;;  %v3626_v12 = vpop.f32.mrb[8].mxu0 }
 0x263   : > { %v3628_v13 = vpop.f32.mrb[9].mxu0 }
 0x264   : > { %v3630_v14 = vpop.f32.mrb[10].mxu0  ;;  %v1197_v15 = vmax.f32 %v3626_v12, %v3628_v13 }
 0x265   : > { %v3634_v16 = vpop.f32.mrb[11].mxu0 }
 0x266   : > { %1198 = vmax.xlane.f32.xlu0 %v1197_v15  ;;  %v1200_v17 = vmax.f32 %v3630_v14, %v3634_v16 }
 0x268   : > { %1201 = vmax.xlane.f32.xlu1 %v1200_v17 }
 0x26a   : > { %v3638_v18 = vpop.f32.mrb[12].mxu0 }
 0x26b   : > { %v3640_v19 = vpop.f32.mrb[13].mxu0 }
 0x26c   : > { %v3642_v20 = vpop.f32.mrb[14].mxu0  ;;  %v1203_v21 = vmax.f32 %v3638_v18, %v3640_v19 }
 0x26d   : > { %v3646_v22 = vpop.f32.mrb[15].mxu0 }
 0x26e   : > { %1204 = vmax.xlane.f32.xlu0 %v1203_v21  ;;  %v1206_v23 = vmax.f32 %v3642_v20, %v3646_v22 }
 0x270   : > { %1207 = vmax.xlane.f32.xlu1 %v1206_v23 }
 0x272   : > { %v3650_v24 = vpop.f32.mrb[16].mxu0 }
 0x273   : > { %v3652_v25 = vpop.f32.mrb[17].mxu0 }
 0x274   : > { %v3654_v26 = vpop.f32.mrb[18].mxu0  ;;  %v1209_v27 = vmax.f32 %v3650_v24, %v3652_v25 }
 0x275   : > { %v3658_v28 = vpop.f32.mrb[19].mxu0 }
 0x276   : > { %1210 = vmax.xlane.f32.xlu0 %v1209_v27  ;;  %v1212_v29 = vmax.f32 %v3654_v26, %v3658_v28 }
 0x278   : > { %1213 = vmax.xlane.f32.xlu1 %v1212_v29 }
 0x27a   : > { %v3662_v30 = vpop.f32.mrb[20].mxu0 }
 0x27b   : > { %v3664_v31 = vpop.f32.mrb[21].mxu0 }
 0x27c   : > { %v3666_v32 = vpop.f32.mrb[22].mxu0  ;;  %v1215_v33 = vmax.f32 %v3662_v30, %v3664_v31 }
 0x27d   : > { %v3670_v34 = vpop.f32.mrb[23].mxu0 }
 0x27e   : > { %1216 = vmax.xlane.f32.xlu0 %v1215_v33  ;;  %v1218_v35 = vmax.f32 %v3666_v32, %v3670_v34 }
 0x280   : > { %1219 = vmax.xlane.f32.xlu1 %v1218_v35  ;;  %v1666_v35 = vld [vmem:[%s3795_s18 + $0x8] sm:$0xff] }
 0x282   : > { %v3674_v36 = vpop.f32.mrb[24].mxu0 }
 0x283   : > { %v3676_v37 = vpop.f32.mrb[25].mxu0 }
 0x284   : > { %v3678_v38 = vpop.f32.mrb[26].mxu0  ;;  %v1221_v39 = vmax.f32 %v3674_v36, %v3676_v37 }
 0x285   : > { %v3682_v40 = vpop.f32.mrb[27].mxu0 }
 0x286   : > { %1222 = vmax.xlane.f32.xlu0 %v1221_v39  ;;  %v1224_v41 = vmax.f32 %v3678_v38, %v3682_v40 }
 0x288   : > { %1225 = vmax.xlane.f32.xlu1 %v1224_v41 }
 0x28a   : > { %v3686_v42 = vpop.f32.mrb[28].mxu0 }
 0x28b   : > { %v3688_v43 = vpop.f32.mrb[29].mxu0 }
 0x28c   : > { %v3690_v44 = vpop.f32.mrb[30].mxu0  ;;  %v1227_v45 = vmax.f32 %v3686_v42, %v3688_v43 }
 0x28d   : > { %4648 = vst [vmem:[#allocation15_spill] sm:$0xff] %v3690_v44  ;;  %v3694_v46 = vpop.f32.mrb[31].mxu0 }
 0x28e   : > { %4649 = vst [vmem:[#allocation16_spill] sm:$0xff] %v3694_v46  ;;  %1228 = vmax.xlane.f32.xlu0 %v1227_v45  ;;  %v1230_v47 = vmax.f32 %v3690_v44, %v3694_v46  ;;  %v1706_v46 = vld [vmem:[%s3795_s18 + $0x148] sm:$0xff] }
 0x28f   : > { %v1710_v44 = vld [vmem:[%s3795_s18 + $0x168] sm:$0xff] }
 0x290   : > { %1231 = vmax.xlane.f32.xlu1 %v1230_v47 }
 0x292   : > { %v3698_v48 = vpop.f32.mrb[32].mxu0 }
 0x293   : > { %4650 = vst [vmem:[#allocation17_spill] sm:$0xff] %v3698_v48  ;;  %v3700_v49 = vpop.f32.mrb[33].mxu0 }
 0x294   : > { %4651 = vst [vmem:[#allocation18_spill] sm:$0xff] %v3700_v49  ;;  %v3702_v50 = vpop.f32.mrb[34].mxu0  ;;  %v1233_v51 = vmax.f32 %v3698_v48, %v3700_v49  ;;  %v1685_v49 = vld [vmem:[%s3795_s18 + $0xa0] sm:$0xff]  ;;  %v1690_v48 = vld [vmem:[%s3795_s18 + $0xc8] sm:$0xff] }
 0x295   : > { %4652 = vst [vmem:[#allocation19_spill] sm:$0xff] %v3702_v50  ;;  %v3706_v52 = vpop.f32.mrb[35].mxu0 }
 0x296   : > { %4653 = vst [vmem:[#allocation20_spill] sm:$0xff] %v3706_v52  ;;  %1234 = vmax.xlane.f32.xlu0 %v1233_v51  ;;  %v1236_v53 = vmax.f32 %v3702_v50, %v3706_v52  ;;  %v1686_v52 = vld [vmem:[%s3795_s18 + $0xa8] sm:$0xff] }
 0x298   : > { %1237 = vmax.xlane.f32.xlu1 %v1236_v53 }
 0x29a   : > { %v3710_v54 = vpop.f32.mrb[36].mxu0 }
 0x29b   : > { %4654 = vst [vmem:[#allocation21_spill] sm:$0xff] %v3710_v54  ;;  %v3712_v55 = vpop.f32.mrb[37].mxu0 }
 0x29c   : > { %4655 = vst [vmem:[#allocation22_spill] sm:$0xff] %v3712_v55  ;;  %v3714_v56 = vpop.f32.mrb[38].mxu0  ;;  %v1239_v57 = vmax.f32 %v3710_v54, %v3712_v55  ;;  %v1677_v55 = vld [vmem:[%s3795_s18 + $0x60] sm:$0xff]  ;;  %v1682_v54 = vld [vmem:[%s3795_s18 + $0x88] sm:$0xff] }
 0x29d   : > { %4656 = vst [vmem:[#allocation23_spill] sm:$0xff] %v3714_v56  ;;  %v3718_v58 = vpop.f32.mrb[39].mxu0 }
 0x29e   : > { %4657 = vst [vmem:[#allocation24_spill] sm:$0xff] %v3718_v58  ;;  %1240 = vmax.xlane.f32.xlu0 %v1239_v57  ;;  %v1242_v59 = vmax.f32 %v3714_v56, %v3718_v58  ;;  %v1673_v56 = vld [vmem:[%s3795_s18 + $0x40] sm:$0xff] }
 0x29f   : > { %v1797_v50 = vpack.c.bf16 %v1677_v55, %v1673_v56  ;;  %v1702_v55 = vld [vmem:[%s3795_s18 + $0x128] sm:$0xff]  ;;  %v1697_v56 = vld [vmem:[%s3795_s18 + $0x100] sm:$0xff] }
 0x2a0   : > { %1243 = vmax.xlane.f32.xlu1 %v1242_v59  ;;  %v1665_v59 = vld [vmem:[%s3795_s18] sm:$0xff] }
 0x2a2   : > { %v3722_v60 = vpop.f32.mrb[40].mxu0 }
 0x2a3   : > { %4658 = vst [vmem:[#allocation25_spill] sm:$0xff] %v3722_v60  ;;  %v3724_v61 = vpop.f32.mrb[41].mxu0 }
 0x2a4   : > { %4659 = vst [vmem:[#allocation26_spill] sm:$0xff] %v3724_v61  ;;  %v3726_v62 = vpop.f32.mrb[42].mxu0  ;;  %v1245_v63 = vmax.f32 %v3722_v60, %v3724_v61  ;;  %v1678_v61 = vld [vmem:[%s3795_s18 + $0x68] sm:$0xff] }
 0x2a5   : > { %4660 = vst [vmem:[#allocation27_spill] sm:$0xff] %v3726_v62  ;;  %v3730_v3 = vpop.f32.mrb[43].mxu0 }
 0x2a6   : > { %4661 = vst [vmem:[#allocation28_spill] sm:$0xff] %v3730_v3  ;;  %1246 = vmax.xlane.f32.xlu0 %v1245_v63  ;;  %v1248_v5 = vmax.f32 %v3726_v62, %v3730_v3  ;;  %v1669_v62 = vld [vmem:[%s3795_s18 + $0x20] sm:$0xff] }
 0x2a7   : > { %v1793_v60 = vpack.c.bf16 %v1669_v62, %v1665_v59  ;;  %v1693_v59 = vld [vmem:[%s3795_s18 + $0xe0] sm:$0xff] }
 0x2a8   : > { %1249 = vmax.xlane.f32.xlu1 %v1248_v5 }
 0x2aa   : > { %v3734_v9 = vpop.f32.mrb[44].mxu0 }
 0x2ab   : > { %4662 = vst [vmem:[#allocation29_spill] sm:$0xff] %v3734_v9  ;;  %v3736_v11 = vpop.f32.mrb[45].mxu0 }
 0x2ac   : > { %4663 = vst [vmem:[#allocation30_spill] sm:$0xff] %v3736_v11  ;;  %v3738_v15 = vpop.f32.mrb[46].mxu0  ;;  %v1251_v17 = vmax.f32 %v3734_v9, %v3736_v11  ;;  %v1674_v9 = vld [vmem:[%s3795_s18 + $0x48] sm:$0xff] }
 0x2ad   : > { %4664 = vst [vmem:[#allocation31_spill] sm:$0xff] %v3738_v15  ;;  %v3742_v21 = vpop.f32.mrb[47].mxu0  ;;  %v1798_v58 = vpack.c.bf16 %v1678_v61, %v1674_v9  ;;  %v1694_v61 = vld [vmem:[%s3795_s18 + $0xe8] sm:$0xff] }
 0x2ae   : > { %4665 = vst [vmem:[#allocation32_spill] sm:$0xff] %v3742_v21  ;;  %1252 = vmax.xlane.f32.xlu0 %v1251_v17  ;;  %v1254_v23 = vmax.f32 %v3738_v15, %v3742_v21  ;;  %v1806_v9 = vpack.c.bf16 %v1694_v61, %v1690_v48  ;;  %v1814_v48 = vpack.c.bf16 %v1710_v44, %v1706_v46  ;;  %v1714_v61 = vld [vmem:[%s3795_s18 + $0x188] sm:$0xff]  ;;  %v1717_v44 = vld [vmem:[%s3795_s18 + $0x1a0] sm:$0xff] }
 0x2b0   : > { %1255 = vmax.xlane.f32.xlu1 %v1254_v23  ;;  %v1670_v23 = vld [vmem:[%s3795_s18 + $0x28] sm:$0xff] }
 0x2b1   : > { %v1794_v3 = vpack.c.bf16 %v1670_v23, %v1666_v35  ;;  %v1802_v35 = vpack.c.bf16 %v1686_v52, %v1682_v54  ;;  %v1681_v23 = vld [vmem:[%s3795_s18 + $0x80] sm:$0xff] }
 0x2b2   : > { %v3746_v27 = vpop.f32.mrb[48].mxu0  ;;  %v1801_v62 = vpack.c.bf16 %v1685_v49, %v1681_v23 }
 0x2b3   : > { %v3748_v29 = vpop.f32.mrb[49].mxu0  ;;  %1889 = vmatprep.subr.bf16.mxu1 %v1794_v3  ;;  %v1689_v3 = vld [vmem:[%s3795_s18 + $0xc0] sm:$0xff] }
 0x2b4   : > { %v3750_v33 = vpop.f32.mrb[50].mxu0  ;;  %1890 = vmatpush1.bf16.msra.mxu1 %v1793_v60  ;;  %v1698_v60 = vld [vmem:[%s3795_s18 + $0x108] sm:$0xff]  ;;  %v1805_v52 = vpack.c.bf16 %v1693_v59, %v1689_v3 }
 0x2b5   : > { %v3754_v39 = vpop.f32.mrb[51].mxu0  ;;  %1891 = vmatprep.subr.bf16.mxu1 %v1798_v58  ;;  %v1810_v54 = vpack.c.bf16 %v1702_v55, %v1698_v60  ;;  %v1701_v58 = vld [vmem:[%s3795_s18 + $0x120] sm:$0xff] }
 0x2b6   : > { %v1809_v49 = vpack.c.bf16 %v1701_v58, %v1697_v56  ;;  %v1722_v56 = vld [vmem:[%s3795_s18 + $0x1c8] sm:$0xff] }
 0x2b7   : > { %v1726_v58 = vld [vmem:[%s3795_s18 + $0x1e8] sm:$0xff] }
 0x2b8   : > { %1892 = vmatpush1.bf16.msra.mxu1 %v1797_v50  ;;  %v1705_v50 = vld [vmem:[%s3795_s18 + $0x140] sm:$0xff] }
 0x2b9   : > { %1893 = vmatprep.subr.bf16.mxu1 %v1802_v35  ;;  %v1709_v35 = vld [vmem:[%s3795_s18 + $0x160] sm:$0xff] }
 0x2ba   : > { %v3758_v45 = vpop.f32.mrb[52].mxu0  ;;  %v1813_v59 = vpack.c.bf16 %v1709_v35, %v1705_v50  ;;  %v1822_v35 = vpack.c.bf16 %v1726_v58, %v1722_v56  ;;  %v1738_v56 = vld [vmem:[%s3795_s18 + $0x248] sm:$0xff] }
 0x2bb   : > { %v3760_v47 = vpop.f32.mrb[53].mxu0  ;;  %v1742_v58 = vld [vmem:[%s3795_s18 + $0x268] sm:$0xff] }
 0x2bc   : > { %v3762_v51 = vpop.f32.mrb[54].mxu0  ;;  %1894 = vmatpush1.bf16.msra.mxu1 %v1801_v62  ;;  %v1718_v62 = vld [vmem:[%s3795_s18 + $0x1a8] sm:$0xff] }
 0x2bd   : > { %v3766_v57 = vpop.f32.mrb[55].mxu0  ;;  %1895 = vmatprep.subr.bf16.mxu1 %v1806_v9 }
 0x2c0   : > { %1896 = vmatpush1.bf16.msra.mxu1 %v1805_v52  ;;  %v1818_v52 = vpack.c.bf16 %v1718_v62, %v1714_v61  ;;  %v1725_v61 = vld [vmem:[%s3795_s18 + $0x1e0] sm:$0xff] }
 0x2c1   : > { %1897 = vmatprep.subr.bf16.mxu1 %v1810_v54  ;;  %v1713_v54 = vld [vmem:[%s3795_s18 + $0x180] sm:$0xff] }
 0x2c2   : > { %v3770_v63 = vpop.f32.mrb[56].mxu0 }
 0x2c3   : > { %v3772_v5 = vpop.f32.mrb[57].mxu0 }
 0x2c4   : > { %v3774_v17 = vpop.f32.mrb[58].mxu0  ;;  %1898 = vmatpush1.bf16.msra.mxu1 %v1809_v49  ;;  %v1817_v49 = vpack.c.bf16 %v1717_v44, %v1713_v54  ;;  %v1729_v54 = vld [vmem:[%s3795_s18 + $0x200] sm:$0xff] }
 0x2c5   : > { %v3778_v41 = vpop.f32.mrb[59].mxu0  ;;  %1899 = vmatprep.subr.bf16.mxu1 %v1814_v48  ;;  %v1733_v44 = vld [vmem:[%s3795_s18 + $0x220] sm:$0xff] }
 0x2c8   : > { %1900 = vmatpush1.bf16.msra.mxu1 %v1813_v59 }
 0x2c9   : > { %1901 = vmatprep.subr.bf16.mxu1 %v1818_v52 }
 0x2ca   : > { %v3782_v53 = vpop.f32.mrb[60].mxu0 }
 0x2cb   : > { %v3784_v21 = vpop.f32.mrb[61].mxu0 }
 0x2cc   : > { %v3786_v15 = vpop.f32.mrb[62].mxu0  ;;  %1902 = vmatpush1.bf16.msra.mxu1 %v1817_v49 }
 0x2cd   : > { %v3790_v11 = vpop.f32.mrb[63].mxu0  ;;  %1903 = vmatprep.subr.bf16.mxu1 %v1822_v35  ;;  %v1737_v35 = vld [vmem:[%s3795_s18 + $0x240] sm:$0xff] }
 0x2e3   : > { %v1187_v23 = vpop.xlane.xlu0 %1186 }
 0x2e4   : > { %v1281_v9 = vsub.f32 %v3602_v0, %v1187_v23  ;;  %v1282_v3 = vsub.f32 %v3604_v1, %v1187_v23  ;;  %v1721_v23 = vld [vmem:[%s3795_s18 + $0x1c0] sm:$0xff] }
 0x2e5   : > { %v1821_v59 = vpack.c.bf16 %v1725_v61, %v1721_v23  ;;  %v1741_v23 = vld [vmem:[%s3795_s18 + $0x260] sm:$0xff] }
 0x2e6   : > { %v1345_v60 = vmul.f32 1.442695, %v1281_v9  ;;  %v1347_v55 = vmul.f32 1.442695, %v1282_v3  ;;  %v1730_v9 = vld [vmem:[%s3795_s18 + $0x208] sm:$0xff] }
 0x2e7   : > { %v1190_v46 = vpop.xlane.xlu0 %1189  ;;  %v1734_v3 = vld [vmem:[%s3795_s18 + $0x228] sm:$0xff]  ;;  %1904 = vmatpush1.bf16.msra.mxu1 %v1821_v59  ;;  %v1829_v59 = vpack.c.bf16 %v1741_v23, %v1737_v35 }
 0x2e8   : > { %2717 = vpow2.f32 %v1345_v60  ;;  %v1283_v0 = vsub.f32 %v3606_v2, %v1190_v46  ;;  %v1284_v1 = vsub.f32 %v3610_v4, %v1190_v46  ;;  %v1826_v52 = vpack.c.bf16 %v1734_v3, %v1730_v9  ;;  %v1746_v3 = vld [vmem:[%s3795_s18 + $0x288] sm:$0xff] }
 0x2e9   : > { %2719 = vpow2.f32 %v1347_v55 }
 0x2ea   : > { %v1349_v50 = vmul.f32 1.442695, %v1283_v0  ;;  %v1351_v48 = vmul.f32 1.442695, %v1284_v1  ;;  %1905 = vmatprep.subr.bf16.mxu1 %v1826_v52 }
 0x2eb   : > { %v1193_v62 = vpop.xlane.xlu1 %1192 }
 0x2ec   : > { %2721 = vpow2.f32 %v1349_v50  ;;  %v1285_v2 = vsub.f32 %v3614_v6, %v1193_v62  ;;  %v1286_v4 = vsub.f32 %v3616_v7, %v1193_v62  ;;  %v1825_v7 = vpack.c.bf16 %v1733_v44, %v1729_v54  ;;  %v1749_v44 = vld [vmem:[%s3795_s18 + $0x2a0] sm:$0xff] }
 0x2ed   : > { %2723 = vpow2.f32 %v1351_v48  ;;  %v1830_v48 = vpack.c.bf16 %v1742_v58, %v1738_v56 }
 0x2ee   : > { %v1353_v60 = vmul.f32 1.442695, %v1285_v2  ;;  %v1355_v55 = vmul.f32 1.442695, %v1286_v4  ;;  %v1750_v2 = vld [vmem:[%s3795_s18 + $0x2a8] sm:$0xff]  ;;  %1906 = vmatpush1.bf16.msra.mxu1 %v1825_v7 }
 0x2ef   : > { %v1196_v46 = vpop.xlane.xlu1 %1195  ;;  %1907 = vmatprep.subr.bf16.mxu1 %v1830_v48  ;;  %v1834_v56 = vpack.c.bf16 %v1750_v2, %v1746_v3 }
 0x2f0   : > { %2725 = vpow2.f32 %v1353_v60  ;;  %v1287_v0 = vsub.f32 %v3618_v8, %v1196_v46  ;;  %v1288_v6 = vsub.f32 %v3622_v10, %v1196_v46 }
 0x2f1   : > { %2727 = vpow2.f32 %v1355_v55 }
 0x2f2   : > { %v3843_v1 = vpop.eup %2717  ;;  %v1357_v49 = vmul.f32 1.442695, %v1287_v0  ;;  %v1359_v50 = vmul.f32 1.442695, %v1288_v6  ;;  %1908 = vmatpush1.bf16.msra.mxu1 %v1829_v59 }
 0x2f3   : > { %v3847_v61 = vpop.eup %2719  ;;  %v1199_v62 = vpop.xlane.xlu0 %1198  ;;  %1909 = vmatprep.subr.bf16.mxu1 %v1834_v56  ;;  %v1753_v56 = vld [vmem:[%s3795_s18 + $0x2c0] sm:$0xff] }
 0x2f4   : > { %2729 = vpow2.f32 %v1357_v49  ;;  %v1289_v8 = vsub.f32 %v3626_v12, %v1199_v62  ;;  %v1290_v10 = vsub.f32 %v3628_v13, %v1199_v62  ;;  %v1473_v9 = vadd.f32 %v3847_v61, %v3843_v1  ;;  %v1745_v13 = vld [vmem:[%s3795_s18 + $0x280] sm:$0xff] }
 0x2f5   : > { %2731 = vpow2.f32 %v1359_v50  ;;  %v1202_v4 = vpop.xlane.xlu1 %1201  ;;  %v1833_v7 = vpack.c.bf16 %v1749_v44, %v1745_v13 }
 0x2f6   : > { %v3855_v60 = vpop.eup %2721  ;;  %v1361_v55 = vmul.f32 1.442695, %v1289_v8  ;;  %v1363_v52 = vmul.f32 1.442695, %v1290_v10  ;;  %v1291_v54 = vsub.f32 %v3630_v14, %v1202_v4  ;;  %v1292_v12 = vsub.f32 %v3634_v16, %v1202_v4  ;;  %1474 = vadd.xlane.f32.xlu0 %v1473_v9 }
 0x2f7   : > { %v3861_v46 = vpop.eup %2723  ;;  %v4666_v14 = vmax.f32 %v3746_v27, %v3748_v29  ;;  %1910 = vmatpush1.bf16.msra.mxu1 %v1833_v7 }
 0x2f8   : > { %2733 = vpow2.f32 %v1361_v55  ;;  %v1365_v58 = vmul.f32 1.442695, %v1291_v54  ;;  %v1367_v0 = vmul.f32 1.442695, %v1292_v12  ;;  %v1476_v6 = vadd.f32 %v3861_v46, %v3855_v60  ;;  %v1758_v54 = vld [vmem:[%s3795_s18 + $0x2e8] sm:$0xff] }
 0x2f9   : > { %2735 = vpow2.f32 %v1363_v52 }
 0x2fa   : > { %v3865_v49 = vpop.eup %2725  ;;  %2737 = vpow2.f32 %v1365_v58  ;;  %1477 = vadd.xlane.f32.xlu1 %v1476_v6  ;;  %1258 = vmax.xlane.f32.xlu0 %v4666_v14  ;;  %v1757_v58 = vld [vmem:[%s3795_s18 + $0x2e0] sm:$0xff] }
 0x2fb   : > { %v3870_v16 = vpop.eup %2727  ;;  %2739 = vpow2.f32 %v1367_v0  ;;  %v1205_v50 = vpop.xlane.xlu0 %1204 }
 0x2fc   : > { %v1293_v48 = vsub.f32 %v3638_v18, %v1205_v50  ;;  %v1294_v35 = vsub.f32 %v3640_v19, %v1205_v50  ;;  %v1479_v23 = vadd.f32 %v3870_v16, %v3865_v49  ;;  %v4667_v18 = vmax.f32 %v3750_v33, %v3754_v39 }
 0x2fd   : > { %v1208_v62 = vpop.xlane.xlu1 %1207  ;;  %v1837_v50 = vpack.c.bf16 %v1757_v58, %v1753_v56  ;;  %v1774_v56 = vld [vmem:[%s3795_s18 + $0x368] sm:$0xff] }
 0x2fe   : > { %v3876_v8 = vpop.eup %2729  ;;  %v1369_v10 = vmul.f32 1.442695, %v1293_v48  ;;  %v1371_v9 = vmul.f32 1.442695, %v1294_v35  ;;  %v1295_v3 = vsub.f32 %v3642_v20, %v1208_v62  ;;  %v1296_v2 = vsub.f32 %v3646_v22, %v1208_v62  ;;  %1480 = vadd.xlane.f32.xlu0 %v1479_v23  ;;  %1261 = vmax.xlane.f32.xlu1 %v4667_v18  ;;  %v1754_v22 = vld [vmem:[%s3795_s18 + $0x2c8] sm:$0xff] }
 0x2ff   : > { %v3883_v19 = vpop.eup %2731  ;;  %v4668_v20 = vmax.f32 %v3758_v45, %v3760_v47  ;;  %v1838_v44 = vpack.c.bf16 %v1758_v54, %v1754_v22  ;;  %v4670_v22 = vmax.f32 %v3770_v63, %v3772_v5 }
 0x300   : > { %2741 = vpow2.f32 %v1369_v10  ;;  %v1373_v4 = vmul.f32 1.442695, %v1295_v3  ;;  %v1375_v59 = vmul.f32 1.442695, %v1296_v2  ;;  %v1482_v55 = vadd.f32 %v3883_v19, %v3876_v8  ;;  %v1766_v3 = vld [vmem:[%s3795_s18 + $0x328] sm:$0xff] }
 0x301   : > { %2743 = vpow2.f32 %v1371_v9  ;;  %1911 = vmatprep.subr.bf16.mxu1 %v1838_v44  ;;  %v1770_v44 = vld [vmem:[%s3795_s18 + $0x348] sm:$0xff] }
 0x302   : > { %v3887_v52 = vpop.eup %2733  ;;  %2745 = vpow2.f32 %v1373_v4  ;;  %1483 = vadd.xlane.f32.xlu1 %v1482_v55  ;;  %1264 = vmax.xlane.f32.xlu0 %v4668_v20  ;;  %v1761_v4 = vld [vmem:[%s3795_s18 + $0x300] sm:$0xff] }
 0x303   : > { %v3894_v12 = vpop.eup %2735  ;;  %2747 = vpow2.f32 %v1375_v59  ;;  %v1211_v13 = vpop.xlane.xlu0 %1210  ;;  %1912 = vmatpush1.bf16.msra.mxu1 %v1837_v50  ;;  %v1765_v59 = vld [vmem:[%s3795_s18 + $0x320] sm:$0xff]  ;;  %v1846_v50 = vpack.c.bf16 %v1774_v56, %v1770_v44 }
 0x304   : > { %v3898_v0 = vpop.eup %2737  ;;  %v1297_v6 = vsub.f32 %v3650_v24, %v1211_v13  ;;  %v1298_v7 = vsub.f32 %v3652_v25, %v1211_v13  ;;  %v1485_v14 = vadd.f32 %v3894_v12, %v3887_v52  ;;  %v4669_v24 = vmax.f32 %v3762_v51, %v3766_v57  ;;  %v1762_v25 = vld [vmem:[%s3795_s18 + $0x308] sm:$0xff] }
 0x305   : > { %v3904_v48 = vpop.eup %2739  ;;  %v1214_v35 = vpop.xlane.xlu1 %1213  ;;  %v1842_v18 = vpack.c.bf16 %v1766_v3, %v1762_v25  ;;  %v4671_v3 = vmax.f32 %v3774_v17, %v3778_v41 }
 0x306   : > { %v1377_v23 = vmul.f32 1.442695, %v1297_v6  ;;  %v1379_v62 = vmul.f32 1.442695, %v1298_v7  ;;  %v1299_v10 = vsub.f32 %v3654_v26, %v1214_v35  ;;  %v1300_v9 = vsub.f32 %v3658_v28, %v1214_v35  ;;  %1486 = vadd.xlane.f32.xlu0 %v1485_v14  ;;  %1267 = vmax.xlane.f32.xlu1 %v4669_v24  ;;  %v1769_v35 = vld [vmem:[%s3795_s18 + $0x340] sm:$0xff] }
 0x307   : > { %v1488_v2 = vadd.f32 %v3904_v48, %v3898_v0  ;;  %v1841_v28 = vpack.c.bf16 %v1765_v59, %v1761_v4  ;;  %1913 = vmatprep.subr.bf16.mxu1 %v1842_v18  ;;  %v1778_v18 = vld [vmem:[%s3795_s18 + $0x388] sm:$0xff] }
 0x308   : > { %2749 = vpow2.f32 %v1377_v23  ;;  %v1381_v26 = vmul.f32 1.442695, %v1299_v10  ;;  %v1383_v55 = vmul.f32 1.442695, %v1300_v9  ;;  %v1773_v23 = vld [vmem:[%s3795_s18 + $0x360] sm:$0xff]  ;;  %v1782_v4 = vld [vmem:[%s3795_s18 + $0x3a8] sm:$0xff] }
 0x309   : > { %2751 = vpow2.f32 %v1379_v62  ;;  %1914 = vmatpush1.bf16.msra.mxu1 %v1841_v28  ;;  %v1845_v9 = vpack.c.bf16 %v1773_v23, %v1769_v35 }
 0x30a   : > { %v3917_v20 = vpop.eup %2741  ;;  %2753 = vpow2.f32 %v1381_v26  ;;  %1489 = vadd.xlane.f32.xlu1 %v1488_v2  ;;  %1270 = vmax.xlane.f32.xlu0 %v4670_v22 }
 0x30b   : > { %v3922_v54 = vpop.eup %2743  ;;  %2755 = vpow2.f32 %v1383_v55  ;;  %v1217_v13 = vpop.xlane.xlu0 %1216  ;;  %1915 = vmatprep.subr.bf16.mxu1 %v1846_v50  ;;  %v1777_v55 = vld [vmem:[%s3795_s18 + $0x380] sm:$0xff] }
 0x30c   : > { %v3926_v58 = vpop.eup %2745  ;;  %v1301_v6 = vsub.f32 %v3662_v30, %v1217_v13  ;;  %v1302_v7 = vsub.f32 %v3664_v31, %v1217_v13  ;;  %v1491_v14 = vadd.f32 %v3922_v54, %v3917_v20  ;;  %v4672_v13 = vmax.f32 %v3782_v53, %v3784_v21 }
 0x30d   : > { %v3934_v62 = vpop.eup %2747  ;;  %v1220_v10 = vpop.xlane.xlu1 %1219  ;;  %1916 = vmatpush1.bf16.msra.mxu1 %v1845_v9  ;;  %v1785_v9 = vld [vmem:[%s3795_s18 + $0x3c0] sm:$0xff] }
 0x30e   : > { %v1385_v24 = vmul.f32 1.442695, %v1301_v6  ;;  %v1387_v25 = vmul.f32 1.442695, %v1302_v7  ;;  %v1303_v30 = vsub.f32 %v3666_v32, %v1220_v10  ;;  %v1304_v31 = vsub.f32 %v3670_v34, %v1220_v10  ;;  %1492 = vadd.xlane.f32.xlu0 %v1491_v14  ;;  %1273 = vmax.xlane.f32.xlu1 %v4671_v3  ;;  %v1781_v34 = vld [vmem:[%s3795_s18 + $0x3a0] sm:$0xff]  ;;  %v1786_v6 = vld [vmem:[%s3795_s18 + $0x3c8] sm:$0xff] }
 0x30f   : > { %v1494_v2 = vadd.f32 %v3934_v62, %v3926_v58  ;;  %v1850_v32 = vpack.c.bf16 %v1782_v4, %v1778_v18  ;;  %v1849_v28 = vpack.c.bf16 %v1781_v34, %v1777_v55  ;;  %v1790_v7 = vld [vmem:[%s3795_s18 + $0x3e8] sm:$0xff] }
 0x310   : > { %2757 = vpow2.f32 %v1385_v24  ;;  %v1389_v59 = vmul.f32 1.442695, %v1303_v30  ;;  %v1391_v26 = vmul.f32 1.442695, %v1304_v31  ;;  %v1854_v10 = vpack.c.bf16 %v1790_v7, %v1786_v6  ;;  %v1789_v24 = vld [vmem:[%s3795_s18 + $0x3e0] sm:$0xff] }
 0x311   : > { %2759 = vpow2.f32 %v1387_v25  ;;  %1917 = vmatprep.subr.bf16.mxu1 %v1850_v32  ;;  %v1853_v31 = vpack.c.bf16 %v1789_v24, %v1785_v9 }
 0x312   : > { %v3947_v22 = vpop.eup %2749  ;;  %2761 = vpow2.f32 %v1389_v59  ;;  %1495 = vadd.xlane.f32.xlu1 %v1494_v2  ;;  %1276 = vmax.xlane.f32.xlu0 %v4672_v13 }
 0x313   : > { %v3952_v44 = vpop.eup %2751  ;;  %2763 = vpow2.f32 %v1391_v26  ;;  %v1223_v56 = vpop.xlane.xlu0 %1222  ;;  %1918 = vmatpush1.bf16.msra.mxu1 %v1849_v28 }
 0x314   : > { %v3956_v14 = vpop.eup %2753  ;;  %v1305_v50 = vsub.f32 %v3674_v36, %v1223_v56  ;;  %v1306_v35 = vsub.f32 %v3676_v37, %v1223_v56  ;;  %v1497_v23 = vadd.f32 %v3952_v44, %v3947_v22  ;;  %v4673_v36 = vmax.f32 %v3786_v15, %v3790_v11  ;;  %1919 = vmatprep.subr.bf16.mxu1 %v1854_v10  ;;  %v4675_v10 = vld [vmem:[#allocation16_spill] sm:$0xff] }
 0x315   : > { %v3964_v25 = vpop.eup %2755  ;;  %v1226_v30 = vpop.xlane.xlu1 %1225 }
 0x316   : > { %v1393_v3 = vmul.f32 1.442695, %v1305_v50  ;;  %v1395_v2 = vmul.f32 1.442695, %v1306_v35  ;;  %v1307_v18 = vsub.f32 %v3678_v38, %v1226_v30  ;;  %v1308_v4 = vsub.f32 %v3682_v40, %v1226_v30  ;;  %1498 = vadd.xlane.f32.xlu0 %v1497_v23  ;;  %1279 = vmax.xlane.f32.xlu1 %v4673_v36  ;;  %v4674_v35 = vld [vmem:[#allocation15_spill] sm:$0xff]  ;;  %v4677_v36 = vld [vmem:[#allocation18_spill] sm:$0xff] }
 0x317   : > { %v1500_v26 = vadd.f32 %v3964_v25, %v3956_v14  ;;  %1920 = vmatpush1.bf16.msra.mxu1 %v1853_v31 }
 0x318   : > { %2765 = vpow2.f32 %v1393_v3  ;;  %v1397_v37 = vmul.f32 1.442695, %v1307_v18  ;;  %v1399_v59 = vmul.f32 1.442695, %v1308_v4  ;;  %v4676_v18 = vld [vmem:[#allocation17_spill] sm:$0xff] }
 0x319   : > { %2767 = vpow2.f32 %v1395_v2 }
 0x31a   : > { %v3973_v32 = vpop.eup %2757  ;;  %2769 = vpow2.f32 %v1397_v37  ;;  %1501 = vadd.xlane.f32.xlu1 %v1500_v26 }
 0x31b   : > { %v3975_v38 = vpop.eup %2759  ;;  %2771 = vpow2.f32 %v1399_v59  ;;  %v1229_v40 = vpop.xlane.xlu0 %1228 }
 0x31c   : > { %v3977_v55 = vpop.eup %2761  ;;  %v1309_v34 = vsub.f32 %v3686_v42, %v1229_v40  ;;  %v1310_v28 = vsub.f32 %v3688_v43, %v1229_v40  ;;  %v1503_v13 = vadd.f32 %v3975_v38, %v3973_v32 }
 0x31d   : > { %v3983_v56 = vpop.eup %2763  ;;  %v1232_v6 = vpop.xlane.xlu1 %1231 }
 0x31e   : > { %v1401_v7 = vmul.f32 1.442695, %v1309_v34  ;;  %v1403_v50 = vmul.f32 1.442695, %v1310_v28  ;;  %v1311_v23 = vsub.f32 %v4674_v35, %v1232_v6  ;;  %v1312_v9 = vsub.f32 %v4675_v10, %v1232_v6  ;;  %1504 = vadd.xlane.f32.xlu0 %v1503_v13  ;;  %v4678_v13 = vld [vmem:[#allocation19_spill] sm:$0xff] }
 0x31f   : > { %v1506_v24 = vadd.f32 %v3983_v56, %v3977_v55 }
 0x320   : > { %2773 = vpow2.f32 %v1401_v7  ;;  %v1405_v42 = vmul.f32 1.442695, %v1311_v23  ;;  %v1407_v30 = vmul.f32 1.442695, %v1312_v9  ;;  %v4679_v7 = vld [vmem:[#allocation20_spill] sm:$0xff] }
 0x321   : > { %2775 = vpow2.f32 %v1403_v50  ;;  %1507 = vadd.xlane.f32.xlu1 %v1506_v24 }
 0x322   : > { %v3989_v43 = vpop.eup %2765  ;;  %2777 = vpow2.f32 %v1405_v42 }
 0x323   : > { %v3991_v31 = vpop.eup %2767  ;;  %2779 = vpow2.f32 %v1407_v30  ;;  %v1235_v3 = vpop.xlane.xlu0 %1234 }
 0x324   : > { %v3993_v2 = vpop.eup %2769  ;;  %v1313_v4 = vsub.f32 %v4676_v18, %v1235_v3  ;;  %v1314_v37 = vsub.f32 %v4677_v36, %v1235_v3  ;;  %v1509_v59 = vadd.f32 %v3991_v31, %v3989_v43  ;;  %v4682_v3 = vld [vmem:[#allocation21_spill] sm:$0xff] }
 0x325   : > { %v3999_v26 = vpop.eup %2771  ;;  %v1238_v40 = vpop.xlane.xlu1 %1237 }
 0x326   : > { %v1409_v34 = vmul.f32 1.442695, %v1313_v4  ;;  %v1411_v28 = vmul.f32 1.442695, %v1314_v37  ;;  %v1315_v6 = vsub.f32 %v4678_v13, %v1238_v40  ;;  %v1316_v50 = vsub.f32 %v4679_v7, %v1238_v40  ;;  %1510 = vadd.xlane.f32.xlu0 %v1509_v59  ;;  %v4683_v4 = vld [vmem:[#allocation22_spill] sm:$0xff]  ;;  %v4685_v13 = vld [vmem:[#allocation23_spill] sm:$0xff] }
 0x327   : > { %v1512_v35 = vadd.f32 %v3999_v26, %v3993_v2  ;;  %v4686_v7 = vld [vmem:[#allocation24_spill] sm:$0xff] }
 0x328   : > { %2781 = vpow2.f32 %v1409_v34  ;;  %v1413_v23 = vmul.f32 1.442695, %v1315_v6  ;;  %v1415_v10 = vmul.f32 1.442695, %v1316_v50 }
 0x329   : > { %2783 = vpow2.f32 %v1411_v28  ;;  %1513 = vadd.xlane.f32.xlu1 %v1512_v35 }
 0x32a   : > { %v4005_v9 = vpop.eup %2773  ;;  %2785 = vpow2.f32 %v1413_v23 }
 0x32b   : > { %4680 = vst [vmem:[#allocation15_spill] sm:$0xff] %v4005_v9  ;;  %v4007_v24 = vpop.eup %2775  ;;  %2787 = vpow2.f32 %v1415_v10  ;;  %v1241_v42 = vpop.xlane.xlu0 %1240 }
 0x32c   : > { %v4009_v30 = vpop.eup %2777  ;;  %v1317_v18 = vsub.f32 %v4682_v3, %v1241_v42  ;;  %v1318_v36 = vsub.f32 %v4683_v4, %v1241_v42  ;;  %v1515_v37 = vadd.f32 %v4007_v24, %v4005_v9  ;;  %v4694_v9 = vld [vmem:[#allocation28_spill] sm:$0xff] }
 0x32d   : > { %4681 = vst [vmem:[#allocation16_spill] sm:$0xff] %v4009_v30  ;;  %v4015_v59 = vpop.eup %2779  ;;  %v1244_v40 = vpop.xlane.xlu1 %1243 }
 0x32e   : > { %4684 = vst [vmem:[#allocation17_spill] sm:$0xff] %v4015_v59  ;;  %v1417_v34 = vmul.f32 1.442695, %v1317_v18  ;;  %v1419_v28 = vmul.f32 1.442695, %v1318_v36  ;;  %v1319_v6 = vsub.f32 %v4685_v13, %v1244_v40  ;;  %v1320_v50 = vsub.f32 %v4686_v7, %v1244_v40  ;;  %1516 = vadd.xlane.f32.xlu0 %v1515_v37  ;;  %v4690_v36 = vld [vmem:[#allocation25_spill] sm:$0xff] }
 0x32f   : > { %v1518_v35 = vadd.f32 %v4015_v59, %v4009_v30  ;;  %v4691_v37 = vld [vmem:[#allocation26_spill] sm:$0xff] }
 0x330   : > { %2789 = vpow2.f32 %v1417_v34  ;;  %v1421_v23 = vmul.f32 1.442695, %v1319_v6  ;;  %v1423_v10 = vmul.f32 1.442695, %v1320_v50 }
 0x331   : > { %2791 = vpow2.f32 %v1419_v28  ;;  %1519 = vadd.xlane.f32.xlu1 %v1518_v35  ;;  %v4693_v35 = vld [vmem:[#allocation27_spill] sm:$0xff] }
 0x332   : > { %v4021_v42 = vpop.eup %2781  ;;  %2793 = vpow2.f32 %v1421_v23 }
 0x333   : > { %4687 = vst [vmem:[#allocation18_spill] sm:$0xff] %v4021_v42  ;;  %v4023_v3 = vpop.eup %2783  ;;  %2795 = vpow2.f32 %v1423_v10  ;;  %v1247_v18 = vpop.xlane.xlu0 %1246 }
 0x334   : > { %4688 = vst [vmem:[#allocation19_spill] sm:$0xff] %v4023_v3  ;;  %v4025_v4 = vpop.eup %2785  ;;  %v1321_v40 = vsub.f32 %v4690_v36, %v1247_v18  ;;  %v1322_v13 = vsub.f32 %v4691_v37, %v1247_v18  ;;  %v1521_v34 = vadd.f32 %v4023_v3, %v4021_v42  ;;  %v4697_v42 = vld [vmem:[#allocation31_spill] sm:$0xff] }
 0x335   : > { %4689 = vst [vmem:[#allocation20_spill] sm:$0xff] %v4025_v4  ;;  %v4031_v6 = vpop.eup %2787  ;;  %v1250_v28 = vpop.xlane.xlu1 %1249 }
 0x336   : > { %4692 = vst [vmem:[#allocation21_spill] sm:$0xff] %v4031_v6  ;;  %v1425_v7 = vmul.f32 1.442695, %v1321_v40  ;;  %v1427_v50 = vmul.f32 1.442695, %v1322_v13  ;;  %v1323_v23 = vsub.f32 %v4693_v35, %v1250_v28  ;;  %v1324_v30 = vsub.f32 %v4694_v9, %v1250_v28  ;;  %1522 = vadd.xlane.f32.xlu0 %v1521_v34  ;;  %v4695_v35 = vld [vmem:[#allocation29_spill] sm:$0xff] }
 0x337   : > { %v1524_v10 = vadd.f32 %v4031_v6, %v4025_v4  ;;  %v4696_v34 = vld [vmem:[#allocation30_spill] sm:$0xff]  ;;  %v4698_v4 = vld [vmem:[#allocation32_spill] sm:$0xff] }
 0x338   : > { %2797 = vpow2.f32 %v1425_v7  ;;  %v1429_v36 = vmul.f32 1.442695, %v1323_v23  ;;  %v1431_v59 = vmul.f32 1.442695, %v1324_v30 }
 0x339   : > { %2799 = vpow2.f32 %v1427_v50  ;;  %1525 = vadd.xlane.f32.xlu1 %v1524_v10 }
 0x33a   : > { %v4037_v18 = vpop.eup %2789  ;;  %2801 = vpow2.f32 %v1429_v36 }
 0x33b   : > { %v4039_v37 = vpop.eup %2791  ;;  %2803 = vpow2.f32 %v1431_v59  ;;  %v1253_v40 = vpop.xlane.xlu0 %1252 }
 0x33c   : > { %v4041_v13 = vpop.eup %2793  ;;  %v1325_v9 = vsub.f32 %v4695_v35, %v1253_v40  ;;  %v1326_v28 = vsub.f32 %v4696_v34, %v1253_v40  ;;  %v1527_v7 = vadd.f32 %v4039_v37, %v4037_v18 }
 0x33d   : > { %v4047_v23 = vpop.eup %2795  ;;  %v1256_v30 = vpop.xlane.xlu1 %1255 }
 0x33e   : > { %v1433_v50 = vmul.f32 1.442695, %v1325_v9  ;;  %v1435_v10 = vmul.f32 1.442695, %v1326_v28  ;;  %v1327_v36 = vsub.f32 %v4697_v42, %v1256_v30  ;;  %v1328_v6 = vsub.f32 %v4698_v4, %v1256_v30  ;;  %1528 = vadd.xlane.f32.xlu0 %v1527_v7 }
 0x33f   : > { %v1530_v59 = vadd.f32 %v4047_v23, %v4041_v13 }
 0x340   : > { %2805 = vpow2.f32 %v1433_v50  ;;  %v1437_v35 = vmul.f32 1.442695, %v1327_v36  ;;  %v1439_v3 = vmul.f32 1.442695, %v1328_v6  ;;  %v1668_v36 = vld [vmem:[%s3795_s18 + $0x18] sm:$0xff] }
 0x341   : > { %2807 = vpow2.f32 %v1435_v10  ;;  %1531 = vadd.xlane.f32.xlu1 %v1530_v59  ;;  %v1672_v59 = vld [vmem:[%s3795_s18 + $0x38] sm:$0xff] }
 0x342   : > { %v4053_v40 = vpop.eup %2797  ;;  %2809 = vpow2.f32 %v1437_v35  ;;  %v1796_v35 = vpack.c.bf16 %v1672_v59, %v1668_v36 }
 0x343   : > { %4699 = vst [vmem:[#allocation22_spill] sm:$0xff] %v4053_v40  ;;  %v4055_v34 = vpop.eup %2799  ;;  %2811 = vpow2.f32 %v1439_v3 }
 0x344   : > { %4700 = vst [vmem:[#allocation23_spill] sm:$0xff] %v4055_v34  ;;  %v4057_v42 = vpop.eup %2801  ;;  %v1533_v4 = vadd.f32 %v4055_v34, %v4053_v40  ;;  %2082 = vmatprep.subr.bf16.mxu1 %v1796_v35 }
 0x345   : > { %4701 = vst [vmem:[#allocation24_spill] sm:$0xff] %v4057_v42  ;;  %v4061_v9 = vpop.eup %2803 }
 0x346   : > { %4702 = vst [vmem:[#allocation25_spill] sm:$0xff] %v4061_v9  ;;  %1534 = vadd.xlane.f32.xlu0 %v1533_v4  ;;  %v1536_v6 = vadd.f32 %v4061_v9, %v4057_v42 }
 0x348   : > { %1537 = vadd.xlane.f32.xlu1 %v1536_v6 }
 0x34a   : > { %v4065_v28 = vpop.eup %2805 }
 0x34b   : > { %4703 = vst [vmem:[#allocation26_spill] sm:$0xff] %v4065_v28  ;;  %v4067_v7 = vpop.eup %2807 }
 0x34c   : > { %4704 = vst [vmem:[#allocation27_spill] sm:$0xff] %v4067_v7  ;;  %v4069_v30 = vpop.eup %2809  ;;  %v1539_v3 = vadd.f32 %v4067_v7, %v4065_v28 }
 0x34d   : > { %4705 = vst [vmem:[#allocation28_spill] sm:$0xff] %v4069_v30  ;;  %v4073_v50 = vpop.eup %2811 }
 0x34e   : > { %1540 = vadd.xlane.f32.xlu0 %v1539_v3  ;;  %v1542_v10 = vadd.f32 %v4073_v50, %v4069_v30 }
 0x350   : > { %1543 = vadd.xlane.f32.xlu1 %v1542_v10 }
 0x383   : > { %v1475_v4 = vpop.xlane.xlu0 %1474 }
 0x384   : > { %2813 = vrcp.f32 %v1475_v4 }
 0x387   : > { %v1478_v6 = vpop.xlane.xlu1 %1477  ;;  %v1259_v40 = vpop.xlane.xlu0 %1258 }
 0x388   : > { %2815 = vrcp.f32 %v1478_v6  ;;  %v1329_v42 = vsub.f32 %v3746_v27, %v1259_v40  ;;  %v1330_v28 = vsub.f32 %v3748_v29, %v1259_v40 }
 0x38a   : > { %v1441_v7 = vmul.f32 1.442695, %v1329_v42  ;;  %v1443_v9 = vmul.f32 1.442695, %v1330_v28  ;;  %v1667_v42 = vld [vmem:[%s3795_s18 + $0x10] sm:$0xff] }
 0x38b   : > { %v1481_v3 = vpop.xlane.xlu0 %1480  ;;  %v1262_v34 = vpop.xlane.xlu1 %1261 }
 0x38c   : > { %2817 = vpow2.f32 %v1441_v7  ;;  %v1331_v10 = vsub.f32 %v3750_v33, %v1262_v34  ;;  %v1332_v30 = vsub.f32 %v3754_v39, %v1262_v34 }
 0x38d   : > { %2819 = vpow2.f32 %v1443_v9  ;;  %v1671_v9 = vld [vmem:[%s3795_s18 + $0x30] sm:$0xff] }
 0x38e   : > { %2821 = vrcp.f32 %v1481_v3  ;;  %v1445_v36 = vmul.f32 1.442695, %v1331_v10  ;;  %v1447_v59 = vmul.f32 1.442695, %v1332_v30  ;;  %v2814_v27 = vpop.eup %2813  ;;  %v1680_v10 = vld [vmem:[%s3795_s18 + $0x78] sm:$0xff] }
 0x38f   : > { %v1484_v35 = vpop.xlane.xlu1 %1483  ;;  %v1265_v4 = vpop.xlane.xlu0 %1264  ;;  %v1602_v30 = vmul.f32 %v2814_v27, %v3847_v61  ;;  %v1601_v3 = vmul.f32 %v2814_v27, %v3843_v1 }
 0x390   : > { %2823 = vpow2.f32 %v1445_v36  ;;  %v1333_v29 = vsub.f32 %v3758_v45, %v1265_v4  ;;  %v1334_v40 = vsub.f32 %v3760_v47, %v1265_v4  ;;  %v1676_v47 = vld [vmem:[%s3795_s18 + $0x58] sm:$0xff] }
 0x391   : > { %2825 = vpow2.f32 %v1447_v59  ;;  %v1800_v27 = vpack.c.bf16 %v1680_v10, %v1676_v47 }
 0x392   : > { %v2816_v33 = vpop.eup %2815  ;;  %2827 = vrcp.f32 %v1484_v35  ;;  %v1449_v39 = vmul.f32 1.442695, %v1333_v29  ;;  %v1451_v34 = vmul.f32 1.442695, %v1334_v40  ;;  %v1675_v29 = vld [vmem:[%s3795_s18 + $0x50] sm:$0xff] }
 0x393   : > { %v1487_v28 = vpop.xlane.xlu0 %1486  ;;  %v1268_v7 = vpop.xlane.xlu1 %1267  ;;  %v1604_v6 = vmul.f32 %v2816_v33, %v3861_v46  ;;  %v1603_v45 = vmul.f32 %v2816_v33, %v3855_v60  ;;  %v1795_v46 = vpack.c.bf16 %v1671_v9, %v1667_v42 }
 0x394   : > { %2829 = vpow2.f32 %v1449_v39  ;;  %v1335_v36 = vsub.f32 %v3762_v51, %v1268_v7  ;;  %v1336_v59 = vsub.f32 %v3766_v57, %v1268_v7  ;;  %v1679_v51 = vld [vmem:[%s3795_s18 + $0x70] sm:$0xff]  ;;  %v1684_v39 = vld [vmem:[%s3795_s18 + $0x98] sm:$0xff] }
 0x395   : > { %2831 = vpow2.f32 %v1451_v34  ;;  %v4095_v35 = vpack.c.bf16 %v1604_v6, %v1602_v30  ;;  %v4097_v61 = vpack.c.bf16 %v1603_v45, %v1601_v3  ;;  %v1688_v34 = vld [vmem:[%s3795_s18 + $0xb8] sm:$0xff]  ;;  %v1683_v30 = vld [vmem:[%s3795_s18 + $0x90] sm:$0xff]  ;;  %v1799_v3 = vpack.c.bf16 %v1679_v51, %v1675_v29 }
 0x396   : > { %v4099_v1 = vpop.eup %2817  ;;  %2833 = vrcp.f32 %v1487_v28  ;;  %v1453_v60 = vmul.f32 1.442695, %v1335_v36  ;;  %v1455_v4 = vmul.f32 1.442695, %v1336_v59  ;;  %v1687_v6 = vld [vmem:[%s3795_s18 + $0xb0] sm:$0xff] }
 0x397   : > { %v4103_v40 = vpop.eup %2819  ;;  %1921 = vmatprep.mubr.bf16.mxu1 %v4095_v35  ;;  %v1490_v57 = vpop.xlane.xlu1 %1489 }
 0x398   : > { %v1271_v33 = vpop.xlane.xlu0 %1270  ;;  %v2822_v7 = vpop.eup %2821  ;;  %2835 = vpow2.f32 %v1453_v60  ;;  %1922 = vmatmul.mubr.bf16.vlgmr.msra.gmra.mrb[0].mxu1 %v4097_v61  ;;  %v1545_v28 = vadd.f32 %v4103_v40, %v4099_v1 }
 0x399   : > { %v1337_v42 = vsub.f32 %v3770_v63, %v1271_v33  ;;  %v1338_v9 = vsub.f32 %v3772_v5, %v1271_v33  ;;  %2837 = vpow2.f32 %v1455_v4  ;;  %2083 = vmatpush1.bf16.msra.mxu1 %v1795_v46  ;;  %v1804_v63 = vpack.c.bf16 %v1688_v34, %v1684_v39 }
 0x39a   : > { %v4115_v45 = vpop.eup %2823  ;;  %2839 = vrcp.f32 %v1490_v57  ;;  %1546 = vadd.xlane.f32.xlu0 %v1545_v28  ;;  %2084 = vmatprep.subr.bf16.mxu1 %v1800_v27  ;;  %v1606_v60 = vmul.f32 %v2822_v7, %v3870_v16  ;;  %v1803_v33 = vpack.c.bf16 %v1687_v6, %v1683_v30  ;;  %v1692_v27 = vld [vmem:[%s3795_s18 + $0xd8] sm:$0xff]  ;;  %v1605_v34 = vmul.f32 %v2822_v7, %v3865_v49  ;;  %v1695_v28 = vld [vmem:[%s3795_s18 + $0xf0] sm:$0xff] }
 0x39b   : > { %v1457_v47 = vmul.f32 1.442695, %v1337_v42  ;;  %v1459_v10 = vmul.f32 1.442695, %v1338_v9  ;;  %v4117_v5 = vpop.eup %2825  ;;  %v1274_v59 = vpop.xlane.xlu1 %1273  ;;  %v1696_v57 = vld [vmem:[%s3795_s18 + $0xf8] sm:$0xff] }
 0x39c   : > { %v1493_v36 = vpop.xlane.xlu0 %1492  ;;  %v2828_v4 = vpop.eup %2827  ;;  %v1339_v46 = vsub.f32 %v3774_v17, %v1274_v59  ;;  %v1340_v29 = vsub.f32 %v3778_v41, %v1274_v59  ;;  %v1548_v51 = vadd.f32 %v4117_v5, %v4115_v45  ;;  %v1691_v41 = vld [vmem:[%s3795_s18 + $0xd0] sm:$0xff]  ;;  %v1808_v6 = vpack.c.bf16 %v1696_v57, %v1692_v27 }
 0x39d   : > { %2841 = vpow2.f32 %v1457_v47  ;;  %v1608_v39 = vmul.f32 %v2828_v4, %v3883_v19  ;;  %v1607_v16 = vmul.f32 %v2828_v4, %v3876_v8  ;;  %2085 = vmatpush1.bf16.msra.mxu1 %v1799_v3  ;;  %v1700_v3 = vld [vmem:[%s3795_s18 + $0x118] sm:$0xff] }
 0x39e   : > { %2843 = vpow2.f32 %v1459_v10  ;;  %v4129_v42 = vpop.eup %2829  ;;  %v1461_v17 = vmul.f32 1.442695, %v1339_v46  ;;  %v1463_v9 = vmul.f32 1.442695, %v1340_v29  ;;  %1549 = vadd.xlane.f32.xlu1 %v1548_v51  ;;  %2086 = vmatprep.subr.bf16.mxu1 %v1804_v63  ;;  %v1704_v47 = vld [vmem:[%s3795_s18 + $0x138] sm:$0xff]  ;;  %v1699_v46 = vld [vmem:[%s3795_s18 + $0x110] sm:$0xff] }
 0x39f   : > { %v4133_v30 = vpop.eup %2831  ;;  %2845 = vrcp.f32 %v1493_v36  ;;  %v4135_v19 = vpack.c.bf16 %v1608_v39, %v1606_v60  ;;  %v1496_v49 = vpop.xlane.xlu1 %1495  ;;  %v4137_v7 = vpack.c.bf16 %v1607_v16, %v1605_v34  ;;  %v1703_v36 = vld [vmem:[%s3795_s18 + $0x130] sm:$0xff]  ;;  %v1807_v60 = vpack.c.bf16 %v1695_v28, %v1691_v41  ;;  %v1708_v28 = vld [vmem:[%s3795_s18 + $0x158] sm:$0xff] }
 0x3a0   : > { %v1277_v8 = vpop.xlane.xlu0 %1276  ;;  %v2834_v10 = vpop.eup %2833  ;;  %2847 = vpow2.f32 %v1461_v17  ;;  %v1551_v4 = vadd.f32 %v4133_v30, %v4129_v42  ;;  %v1811_v34 = vpack.c.bf16 %v1703_v36, %v1699_v46  ;;  %v1720_v46 = vld [vmem:[%s3795_s18 + $0x1b8] sm:$0xff] }
 0x3a1   : > { %v1341_v63 = vsub.f32 %v3782_v53, %v1277_v8  ;;  %v1342_v59 = vsub.f32 %v3784_v21, %v1277_v8  ;;  %2849 = vpow2.f32 %v1463_v9  ;;  %1931 = vmatprep.mubr.bf16.mxu1 %v4135_v19  ;;  %2087 = vmatpush1.bf16.msra.mxu1 %v1803_v33  ;;  %v1812_v21 = vpack.c.bf16 %v1704_v47, %v1700_v3 }
 0x3a2   : > { %v4148_v29 = vpop.eup %2835  ;;  %2851 = vrcp.f32 %v1496_v49  ;;  %1932 = vmatmul.mubr.bf16.gmra.mrb[4].mxu1 %v4137_v7  ;;  %1552 = vadd.xlane.f32.xlu0 %v1551_v4  ;;  %v1610_v39 = vmul.f32 %v2834_v10, %v3894_v12  ;;  %v1712_v49 = vld [vmem:[%s3795_s18 + $0x178] sm:$0xff]  ;;  %v1609_v12 = vmul.f32 %v2834_v10, %v3887_v52 }
 0x3a3   : > { %v1465_v51 = vmul.f32 1.442695, %v1341_v63  ;;  %v1467_v27 = vmul.f32 1.442695, %v1342_v59  ;;  %v4151_v53 = vpop.eup %2837  ;;  %v1280_v57 = vpop.xlane.xlu1 %1279  ;;  %2088 = vmatprep.subr.bf16.mxu1 %v1808_v6  ;;  %v1711_v63 = vld [vmem:[%s3795_s18 + $0x170] sm:$0xff]  ;;  %v1716_v4 = vld [vmem:[%s3795_s18 + $0x198] sm:$0xff] }
 0x3a4   : > { %v2840_v33 = vpop.eup %2839  ;;  %v1499_v16 = vpop.xlane.xlu0 %1498  ;;  %v1343_v17 = vsub.f32 %v3786_v15, %v1280_v57  ;;  %v1344_v9 = vsub.f32 %v3790_v11, %v1280_v57  ;;  %v1554_v41 = vadd.f32 %v4151_v53, %v4148_v29  ;;  %v1707_v11 = vld [vmem:[%s3795_s18 + $0x150] sm:$0xff] }
 0x3a5   : > { %2853 = vpow2.f32 %v1465_v51  ;;  %v1612_v8 = vmul.f32 %v2840_v33, %v3904_v48  ;;  %v1611_v6 = vmul.f32 %v2840_v33, %v3898_v0  ;;  %2089 = vmatpush1.bf16.msra.mxu1 %v1807_v60  ;;  %v1816_v0 = vpack.c.bf16 %v1712_v49, %v1708_v28  ;;  %v1724_v28 = vld [vmem:[%s3795_s18 + $0x1d8] sm:$0xff] }
 0x3a6   : > { %2855 = vpow2.f32 %v1467_v27  ;;  %v1469_v15 = vmul.f32 1.442695, %v1343_v17  ;;  %v1471_v47 = vmul.f32 1.442695, %v1344_v9  ;;  %1555 = vadd.xlane.f32.xlu1 %v1554_v41  ;;  %2090 = vmatprep.subr.bf16.mxu1 %v1812_v21  ;;  %v1815_v51 = vpack.c.bf16 %v1711_v63, %v1707_v11  ;;  %v1715_v27 = vld [vmem:[%s3795_s18 + $0x190] sm:$0xff]  ;;  %v1728_v49 = vld [vmem:[%s3795_s18 + $0x1f8] sm:$0xff] }
 0x3a7   : > { %v4163_v3 = vpop.eup %2841  ;;  %2857 = vrcp.f32 %v1499_v16  ;;  %v4169_v48 = vpack.c.bf16 %v1612_v8, %v1610_v39  ;;  %v1502_v52 = vpop.xlane.xlu1 %1501  ;;  %v4171_v10 = vpack.c.bf16 %v1611_v6, %v1609_v12  ;;  %v1719_v21 = vld [vmem:[%s3795_s18 + $0x1b0] sm:$0xff]  ;;  %v1820_v39 = vpack.c.bf16 %v1720_v46, %v1716_v4 }
 0x3a8   : > { %v4167_v59 = vpop.eup %2843  ;;  %2859 = vpow2.f32 %v1469_v15  ;;  %v1819_v41 = vpack.c.bf16 %v1719_v21, %v1715_v27  ;;  %v1727_v11 = vld [vmem:[%s3795_s18 + $0x1f0] sm:$0xff] }
 0x3a9   : > { %v1557_v36 = vadd.f32 %v4167_v59, %v4163_v3  ;;  %v2846_v60 = vpop.eup %2845  ;;  %2861 = vpow2.f32 %v1471_v47  ;;  %1941 = vmatprep.mubr.bf16.mxu1 %v4169_v48  ;;  %2091 = vmatpush1.bf16.msra.mxu1 %v1811_v34 }
 0x3aa   : > { %v4180_v57 = vpop.eup %2847  ;;  %2863 = vrcp.f32 %v1502_v52  ;;  %1942 = vmatmul.mubr.bf16.gmra.mrb[8].mxu1 %v4171_v10  ;;  %2092 = vmatprep.subr.bf16.mxu1 %v1816_v0  ;;  %v1614_v9 = vmul.f32 %v2846_v60, %v3922_v54  ;;  %v1613_v12 = vmul.f32 %v2846_v60, %v3917_v20  ;;  %v1723_v54 = vld [vmem:[%s3795_s18 + $0x1d0] sm:$0xff]  ;;  %v1824_v20 = vpack.c.bf16 %v1728_v49, %v1724_v28  ;;  %v1732_v0 = vld [vmem:[%s3795_s18 + $0x218] sm:$0xff] }
 0x3ab   : > { %1558 = vadd.xlane.f32.xlu0 %v1557_v36  ;;  %v4183_v33 = vpop.eup %2849  ;;  %v1505_v16 = vpop.xlane.xlu0 %1504  ;;  %v1823_v36 = vpack.c.bf16 %v1727_v11, %v1723_v54  ;;  %v1731_v60 = vld [vmem:[%s3795_s18 + $0x210] sm:$0xff] }
 0x3ac   : > { %v2852_v17 = vpop.eup %2851  ;;  %v1560_v34 = vadd.f32 %v4183_v33, %v4180_v57  ;;  %2865 = vrcp.f32 %v1505_v16  ;;  %v1739_v11 = vld [vmem:[%s3795_s18 + $0x250] sm:$0xff] }
 0x3ad   : > { %v1616_v8 = vmul.f32 %v2852_v17, %v3934_v62  ;;  %v1615_v6 = vmul.f32 %v2852_v17, %v3926_v58  ;;  %2093 = vmatpush1.bf16.msra.mxu1 %v1815_v51  ;;  %v1736_v58 = vld [vmem:[%s3795_s18 + $0x238] sm:$0xff]  ;;  %v1735_v51 = vld [vmem:[%s3795_s18 + $0x230] sm:$0xff] }
 0x3ae   : > { %1561 = vadd.xlane.f32.xlu1 %v1560_v34  ;;  %v1508_v47 = vpop.xlane.xlu1 %1507  ;;  %2094 = vmatprep.subr.bf16.mxu1 %v1820_v39  ;;  %v1828_v21 = vpack.c.bf16 %v1736_v58, %v1732_v0  ;;  %v1740_v17 = vld [vmem:[%s3795_s18 + $0x258] sm:$0xff]  ;;  %v1827_v49 = vpack.c.bf16 %v1735_v51, %v1731_v60  ;;  %v1747_v51 = vld [vmem:[%s3795_s18 + $0x290] sm:$0xff] }
 0x3af   : > { %v4193_v15 = vpop.eup %2853  ;;  %2867 = vrcp.f32 %v1508_v47  ;;  %v4199_v52 = vpack.c.bf16 %v1616_v8, %v1614_v9  ;;  %v4201_v62 = vpack.c.bf16 %v1615_v6, %v1613_v12  ;;  %v1744_v34 = vld [vmem:[%s3795_s18 + $0x278] sm:$0xff] }
 0x3b0   : > { %v4197_v63 = vpop.eup %2855  ;;  %v1832_v54 = vpack.c.bf16 %v1744_v34, %v1740_v17  ;;  %v1756_v17 = vld [vmem:[%s3795_s18 + $0x2d8] sm:$0xff] }
 0x3b1   : > { %v1563_v4 = vadd.f32 %v4197_v63, %v4193_v15  ;;  %v2858_v46 = vpop.eup %2857  ;;  %1951 = vmatprep.mubr.bf16.mxu1 %v4199_v52  ;;  %2095 = vmatpush1.bf16.msra.mxu1 %v1819_v41  ;;  %v1760_v34 = vld [vmem:[%s3795_s18 + $0x2f8] sm:$0xff] }
 0x3b2   : > { %v4210_v27 = vpop.eup %2859  ;;  %1952 = vmatmul.mubr.bf16.gmra.mrb[12].mxu1 %v4201_v62  ;;  %2096 = vmatprep.subr.bf16.mxu1 %v1824_v20  ;;  %v1618_v28 = vmul.f32 %v2858_v46, %v3952_v44  ;;  %v1617_v12 = vmul.f32 %v2858_v46, %v3947_v22  ;;  %v1743_v20 = vld [vmem:[%s3795_s18 + $0x270] sm:$0xff]  ;;  %v1748_v22 = vld [vmem:[%s3795_s18 + $0x298] sm:$0xff] }
 0x3b3   : > { %1564 = vadd.xlane.f32.xlu0 %v1563_v4  ;;  %v4213_v39 = vpop.eup %2861  ;;  %v1511_v16 = vpop.xlane.xlu0 %1510  ;;  %v1831_v4 = vpack.c.bf16 %v1743_v20, %v1739_v11 }
 0x3b4   : > { %v2864_v9 = vpop.eup %2863  ;;  %v1566_v41 = vadd.f32 %v4213_v39, %v4210_v27  ;;  %2869 = vrcp.f32 %v1511_v16 }
 0x3b5   : > { %v1620_v8 = vmul.f32 %v2864_v9, %v3964_v25  ;;  %v1619_v6 = vmul.f32 %v2864_v9, %v3956_v14  ;;  %2097 = vmatpush1.bf16.msra.mxu1 %v1823_v36  ;;  %v1752_v25 = vld [vmem:[%s3795_s18 + $0x2b8] sm:$0xff] }
 0x3b6   : > { %1567 = vadd.xlane.f32.xlu1 %v1566_v41  ;;  %v1514_v47 = vpop.xlane.xlu1 %1513  ;;  %2098 = vmatprep.subr.bf16.mxu1 %v1828_v21  ;;  %v2866_v0 = vpop.eup %2865  ;;  %v1836_v60 = vpack.c.bf16 %v1752_v25, %v1748_v22  ;;  %v1751_v21 = vld [vmem:[%s3795_s18 + $0x2b0] sm:$0xff] }
 0x3b7   : > { %2871 = vrcp.f32 %v1514_v47  ;;  %v4225_v44 = vpack.c.bf16 %v1620_v8, %v1618_v28  ;;  %v4227_v58 = vpack.c.bf16 %v1619_v6, %v1617_v12  ;;  %v1622_v46 = vmul.f32 %v2866_v0, %v3975_v38  ;;  %v1755_v8 = vld [vmem:[%s3795_s18 + $0x2d0] sm:$0xff]  ;;  %v1764_v47 = vld [vmem:[%s3795_s18 + $0x318] sm:$0xff] }
 0x3b8   : > { %v1835_v38 = vpack.c.bf16 %v1751_v21, %v1747_v51  ;;  %v1621_v28 = vmul.f32 %v2866_v0, %v3973_v32  ;;  %v1759_v12 = vld [vmem:[%s3795_s18 + $0x2f0] sm:$0xff]  ;;  %v1776_v51 = vld [vmem:[%s3795_s18 + $0x378] sm:$0xff] }
 0x3b9   : > { %v2868_v14 = vpop.eup %2867  ;;  %1961 = vmatprep.mubr.bf16.mxu1 %v4225_v44  ;;  %2099 = vmatpush1.bf16.msra.mxu1 %v1827_v49  ;;  %v1840_v49 = vpack.c.bf16 %v1760_v34, %v1756_v17  ;;  %v1839_v20 = vpack.c.bf16 %v1759_v12, %v1755_v8  ;;  %v1763_v25 = vld [vmem:[%s3795_s18 + $0x310] sm:$0xff] }
 0x3ba   : > { %1962 = vmatmul.mubr.bf16.gmra.mrb[16].mxu1 %v4227_v58  ;;  %v1624_v36 = vmul.f32 %v2868_v14, %v3983_v56  ;;  %2100 = vmatprep.subr.bf16.mxu1 %v1832_v54  ;;  %v1623_v41 = vmul.f32 %v2868_v14, %v3977_v55  ;;  %v1768_v54 = vld [vmem:[%s3795_s18 + $0x338] sm:$0xff]  ;;  %v1767_v14 = vld [vmem:[%s3795_s18 + $0x330] sm:$0xff] }
 0x3bb   : > { %v1517_v16 = vpop.xlane.xlu0 %1516  ;;  %v1844_v22 = vpack.c.bf16 %v1768_v54, %v1764_v47  ;;  %v1843_v21 = vpack.c.bf16 %v1767_v14, %v1763_v25  ;;  %v1771_v17 = vld [vmem:[%s3795_s18 + $0x350] sm:$0xff]  ;;  %v1780_v54 = vld [vmem:[%s3795_s18 + $0x398] sm:$0xff]  ;;  %v4708_v25 = vld [vmem:[#allocation15_spill] sm:$0xff] }
 0x3bc   : > { %v4239_v9 = vpack.c.bf16 %v1624_v36, %v1622_v46  ;;  %2873 = vrcp.f32 %v1517_v16  ;;  %v4248_v55 = vpack.c.bf16 %v1623_v41, %v1621_v28  ;;  %v1775_v34 = vld [vmem:[%s3795_s18 + $0x370] sm:$0xff] }
 0x3bd   : > { %2101 = vmatpush1.bf16.msra.mxu1 %v1831_v4 }
 0x3be   : > { %1971 = vmatprep.mubr.bf16.mxu1 %v4239_v9  ;;  %v1520_v56 = vpop.xlane.xlu1 %1519  ;;  %2102 = vmatprep.subr.bf16.mxu1 %v1836_v60  ;;  %v2870_v6 = vpop.eup %2869  ;;  %v1772_v60 = vld [vmem:[%s3795_s18 + $0x358] sm:$0xff] }
 0x3bf   : > { %2875 = vrcp.f32 %v1520_v56  ;;  %v1626_v32 = vmul.f32 %v2870_v6, %v3991_v31  ;;  %v1848_v16 = vpack.c.bf16 %v1776_v51, %v1772_v60  ;;  %v1847_v56 = vpack.c.bf16 %v1775_v34, %v1771_v17  ;;  %v4709_v51 = vld [vmem:[#allocation19_spill] sm:$0xff]  ;;  %v4711_v34 = vld [vmem:[#allocation20_spill] sm:$0xff] }
 0x3c1   : > { %v2872_v11 = vpop.eup %2871  ;;  %2103 = vmatpush1.bf16.msra.mxu1 %v1835_v38 }
 0x3c2   : > { %1972 = vmatmul.mubr.bf16.gmra.mrb[20].mxu1 %v4248_v55  ;;  %v1628_v0 = vmul.f32 %v2872_v11, %v3999_v26  ;;  %2104 = vmatprep.subr.bf16.mxu1 %v1840_v49  ;;  %v1627_v36 = vmul.f32 %v2872_v11, %v3993_v2  ;;  %v1625_v26 = vmul.f32 %v2870_v6, %v3989_v43  ;;  %v4706_v43 = vld [vmem:[#allocation17_spill] sm:$0xff]  ;;  %v4707_v6 = vld [vmem:[#allocation16_spill] sm:$0xff]  ;;  %v1784_v11 = vld [vmem:[%s3795_s18 + $0x3b8] sm:$0xff] }
 0x3c3   : > { %v1523_v4 = vpop.xlane.xlu0 %1522 }
 0x3c4   : > { %v4255_v46 = vpack.c.bf16 %v1628_v0, %v1626_v32  ;;  %2877 = vrcp.f32 %v1523_v4  ;;  %v4264_v2 = vpack.c.bf16 %v1627_v36, %v1625_v26  ;;  %v1852_v32 = vpack.c.bf16 %v1784_v11, %v1780_v54  ;;  %v1783_v0 = vld [vmem:[%s3795_s18 + $0x3b0] sm:$0xff] }
 0x3c5   : > { %2105 = vmatpush1.bf16.msra.mxu1 %v1839_v20  ;;  %v1779_v20 = vld [vmem:[%s3795_s18 + $0x390] sm:$0xff] }
 0x3c6   : > { %1981 = vmatprep.mubr.bf16.mxu1 %v4255_v46  ;;  %v1526_v31 = vpop.xlane.xlu1 %1525  ;;  %2106 = vmatprep.subr.bf16.mxu1 %v1844_v22  ;;  %v2874_v41 = vpop.eup %2873  ;;  %v1851_v14 = vpack.c.bf16 %v1783_v0, %v1779_v20 }
 0x3c7   : > { %2879 = vrcp.f32 %v1526_v31  ;;  %v1630_v28 = vmul.f32 %v2874_v41, %v4007_v24  ;;  %v1629_v24 = vmul.f32 %v2874_v41, %v4708_v25  ;;  %v4710_v31 = vld [vmem:[#allocation21_spill] sm:$0xff] }
 0x3c9   : > { %v2876_v38 = vpop.eup %2875  ;;  %2107 = vmatpush1.bf16.msra.mxu1 %v1843_v21 }
 0x3ca   : > { %1982 = vmatmul.mubr.bf16.gmra.mrb[24].mxu1 %v4264_v2  ;;  %v1632_v49 = vmul.f32 %v2876_v38, %v4706_v43  ;;  %2108 = vmatprep.subr.bf16.mxu1 %v1848_v16  ;;  %v1631_v47 = vmul.f32 %v2876_v38, %v4707_v6  ;;  %v1788_v38 = vld [vmem:[%s3795_s18 + $0x3d8] sm:$0xff] }
 0x3cb   : > { %v1529_v8 = vpop.xlane.xlu0 %1528  ;;  %v4712_v6 = vld [vmem:[#allocation18_spill] sm:$0xff] }
 0x3cc   : > { %v4269_v12 = vpack.c.bf16 %v1632_v49, %v1630_v28  ;;  %2881 = vrcp.f32 %v1529_v8  ;;  %v4278_v36 = vpack.c.bf16 %v1631_v47, %v1629_v24  ;;  %v1787_v28 = vld [vmem:[%s3795_s18 + $0x3d0] sm:$0xff] }
 0x3cd   : > { %2109 = vmatpush1.bf16.msra.mxu1 %v1847_v56  ;;  %v1792_v56 = vld [vmem:[%s3795_s18 + $0x3f8] sm:$0xff]  ;;  %v1791_v8 = vld [vmem:[%s3795_s18 + $0x3f0] sm:$0xff] }
 0x3ce   : > { %1991 = vmatprep.mubr.bf16.mxu1 %v4269_v12  ;;  %v1532_v22 = vpop.xlane.xlu1 %1531  ;;  %v2878_v4 = vpop.eup %2877  ;;  %2110 = vmatprep.subr.bf16.mxu1 %v1852_v32  ;;  %v1856_v49 = vpack.c.bf16 %v1792_v56, %v1788_v38  ;;  %v1855_v54 = vpack.c.bf16 %v1791_v8, %v1787_v28  ;;  %v4716_v56 = vld [vmem:[#allocation22_spill] sm:$0xff] }
 0x3cf   : > { %2883 = vrcp.f32 %v1532_v22  ;;  %v1634_v21 = vmul.f32 %v2878_v4, %v4709_v51  ;;  %v1633_v47 = vmul.f32 %v2878_v4, %v4712_v6 }
 0x3d1   : > { %v2880_v60 = vpop.eup %2879  ;;  %2111 = vmatpush1.bf16.msra.mxu1 %v1851_v14 }
 0x3d2   : > { %1992 = vmatmul.mubr.bf16.gmra.mrb[28].mxu1 %v4278_v36  ;;  %v1636_v26 = vmul.f32 %v2880_v60, %v4710_v31  ;;  %v1635_v41 = vmul.f32 %v2880_v60, %v4711_v34  ;;  %2112 = vmatprep.subr.bf16.mxu1 %v1856_v49  ;;  %v4717_v49 = vld [vmem:[#allocation27_spill] sm:$0xff] }
 0x3d3   : > { %v1535_v16 = vpop.xlane.xlu0 %1534 }
 0x3d4   : > { %2885 = vrcp.f32 %v1535_v16  ;;  %v4283_v17 = vpack.c.bf16 %v1636_v26, %v1634_v21  ;;  %v4292_v20 = vpack.c.bf16 %v1635_v41, %v1633_v47  ;;  %v4713_v26 = vld [vmem:[#allocation23_spill] sm:$0xff]  ;;  %v4714_v16 = vld [vmem:[#allocation25_spill] sm:$0xff]  ;;  %v4715_v41 = vld [vmem:[#allocation24_spill] sm:$0xff] }
 0x3d5   : > { %v1538_v43 = vpop.xlane.xlu1 %1537  ;;  %2113 = vmatpush1.bf16.msra.mxu1 %v1855_v54  ;;  %v4718_v54 = vld [vmem:[#allocation28_spill] sm:$0xff] }
 0x3d6   : > { %2001 = vmatprep.mubr.bf16.mxu1 %v4283_v17  ;;  %2887 = vrcp.f32 %v1538_v43  ;;  %v2882_v11 = vpop.eup %2881 }
 0x3d7   : > { %v1638_v0 = vmul.f32 %v2882_v11, %v4039_v37  ;;  %v1637_v51 = vmul.f32 %v2882_v11, %v4037_v18 }
 0x3d9   : > { %v2884_v32 = vpop.eup %2883 }
 0x3da   : > { %2002 = vmatmul.mubr.bf16.gmra.mrb[32].mxu1 %v4292_v20  ;;  %v1640_v22 = vmul.f32 %v2884_v32, %v4047_v23  ;;  %v1639_v14 = vmul.f32 %v2884_v32, %v4041_v13  ;;  %v4719_v32 = vld [vmem:[#allocation26_spill] sm:$0xff] }
 0x3db   : > { %v1541_v25 = vpop.xlane.xlu0 %1540 }
 0x3dc   : > { %2889 = vrcp.f32 %v1541_v25  ;;  %v4297_v24 = vpack.c.bf16 %v1640_v22, %v1638_v0  ;;  %v4302_v31 = vpack.c.bf16 %v1639_v14, %v1637_v51 }
 0x3dd   : > { %v1544_v4 = vpop.xlane.xlu1 %1543 }
 0x3de   : > { %v2886_v60 = vpop.eup %2885  ;;  %2011 = vmatprep.mubr.bf16.mxu1 %v4297_v24  ;;  %2891 = vrcp.f32 %v1544_v4 }
 0x3df   : > { %v1642_v37 = vmul.f32 %v2886_v60, %v4713_v26  ;;  %v1641_v28 = vmul.f32 %v2886_v60, %v4716_v56 }
 0x3e0   : > { %v2888_v21 = vpop.eup %2887 }
 0x3e1   : > { %v1644_v23 = vmul.f32 %v2888_v21, %v4714_v16  ;;  %v1643_v13 = vmul.f32 %v2888_v21, %v4715_v41 }
 0x3e2   : > { %2012 = vmatmul.mubr.bf16.gmra.mrb[36].mxu1 %v4302_v31 }
 0x3e3   : > { %v4307_v34 = vpack.c.bf16 %v1644_v23, %v1642_v37  ;;  %v4312_v18 = vpack.c.bf16 %v1643_v13, %v1641_v28 }
 0x3e5   : > { %2021 = vmatprep.mubr.bf16.mxu1 %v4307_v34 }
 0x3e6   : > { %v2890_v38 = vpop.eup %2889 }
 0x3e7   : > { %v1646_v8 = vmul.f32 %v2890_v38, %v4717_v49  ;;  %v1645_v0 = vmul.f32 %v2890_v38, %v4719_v32 }
 0x3e8   : > { %v2892_v43 = vpop.eup %2891 }
 0x3e9   : > { %v1648_v6 = vmul.f32 %v2892_v43, %v4073_v50  ;;  %v1647_v11 = vmul.f32 %v2892_v43, %v4718_v54 }
 0x3ea   : > { %2022 = vmatmul.mubr.bf16.gmra.mrb[40].mxu1 %v4312_v18 }
 0x3eb   : > { %v4317_v47 = vpack.c.bf16 %v1648_v6, %v1646_v8  ;;  %v4322_v22 = vpack.c.bf16 %v1647_v11, %v1645_v0 }
 0x3ed   : > { %2031 = vmatprep.mubr.bf16.mxu1 %v4317_v47 }
 0x3f2   : > { %2032 = vmatmul.mubr.bf16.gmra.mrb[44].mxu1 %v4322_v22 }
 0x427   : > { %v1547_v25 = vpop.xlane.xlu0 %1546 }
 0x428   : > { %2893 = vrcp.f32 %v1547_v25 }
 0x42b   : > { %v1550_v14 = vpop.xlane.xlu1 %1549 }
 0x42c   : > { %2895 = vrcp.f32 %v1550_v14 }
 0x42f   : > { %v1553_v4 = vpop.xlane.xlu0 %1552 }
 0x430   : > { %2897 = vrcp.f32 %v1553_v4 }
 0x432   : > { %v2894_v60 = vpop.eup %2893 }
 0x433   : > { %v1556_v50 = vpop.xlane.xlu1 %1555  ;;  %v1650_v26 = vmul.f32 %v2894_v60, %v4103_v40  ;;  %v1649_v16 = vmul.f32 %v2894_v60, %v4099_v1 }
 0x434   : > { %2899 = vrcp.f32 %v1556_v50 }
 0x436   : > { %v2896_v51 = vpop.eup %2895 }
 0x437   : > { %v1652_v37 = vmul.f32 %v2896_v51, %v4117_v5  ;;  %v1651_v23 = vmul.f32 %v2896_v51, %v4115_v45 }
 0x438   : > { %v1559_v21 = vpop.xlane.xlu0 %1558 }
 0x439   : > { %v4329_v41 = vpack.c.bf16 %v1652_v37, %v1650_v26  ;;  %v4331_v13 = vpack.c.bf16 %v1651_v23, %v1649_v16  ;;  %2901 = vrcp.f32 %v1559_v21 }
 0x43a   : > { %v2898_v56 = vpop.eup %2897 }
 0x43b   : > { %2041 = vmatprep.mubr.bf16.mxu1 %v4329_v41  ;;  %v1562_v38 = vpop.xlane.xlu1 %1561  ;;  %v1654_v5 = vmul.f32 %v2898_v56, %v4133_v30  ;;  %v1653_v45 = vmul.f32 %v2898_v56, %v4129_v42 }
 0x43c   : > { %2903 = vrcp.f32 %v1562_v38  ;;  %2042 = vmatmul.mubr.bf16.gmra.mrb[48].mxu1 %v4331_v13 }
 0x43e   : > { %v2900_v28 = vpop.eup %2899 }
 0x43f   : > { %v1656_v1 = vmul.f32 %v2900_v28, %v4151_v53  ;;  %v1655_v43 = vmul.f32 %v2900_v28, %v4148_v29 }
 0x440   : > { %v1565_v40 = vpop.xlane.xlu0 %1564 }
 0x441   : > { %v4339_v49 = vpack.c.bf16 %v1656_v1, %v1654_v5  ;;  %v4341_v8 = vpack.c.bf16 %v1655_v43, %v1653_v45  ;;  %2905 = vrcp.f32 %v1565_v40 }
 0x443   : > { %2051 = vmatprep.mubr.bf16.mxu1 %v4339_v49  ;;  %v1568_v6 = vpop.xlane.xlu1 %1567  ;;  %v2902_v54 = vpop.eup %2901 }
 0x444   : > { %2907 = vrcp.f32 %v1568_v6  ;;  %2052 = vmatmul.mubr.bf16.gmra.mrb[52].mxu1 %v4341_v8  ;;  %v1658_v30 = vmul.f32 %v2902_v54, %v4167_v59  ;;  %v1657_v42 = vmul.f32 %v2902_v54, %v4163_v3 }
 0x446   : > { %v2904_v11 = vpop.eup %2903 }
 0x447   : > { %v1660_v53 = vmul.f32 %v2904_v11, %v4183_v33  ;;  %v1659_v29 = vmul.f32 %v2904_v11, %v4180_v57 }
 0x449   : > { %v4349_v32 = vpack.c.bf16 %v1660_v53, %v1658_v30  ;;  %v4351_v0 = vpack.c.bf16 %v1659_v29, %v1657_v42 }
 0x44b   : > { %2061 = vmatprep.mubr.bf16.mxu1 %v4349_v32  ;;  %v2906_v25 = vpop.eup %2905 }
 0x44c   : > { %2062 = vmatmul.mubr.bf16.gmra.mrb[56].mxu1 %v4351_v0  ;;  %v1662_v4 = vmul.f32 %v2906_v25, %v4197_v63  ;;  %v1661_v33 = vmul.f32 %v2906_v25, %v4193_v15 }
 0x44e   : > { %v2908_v14 = vpop.eup %2907 }
 0x44f   : > { %v1664_v59 = vmul.f32 %v2908_v14, %v4213_v39  ;;  %v1663_v3 = vmul.f32 %v2908_v14, %v4210_v27 }
 0x451   : > { %v4359_v57 = vpack.c.bf16 %v1664_v59, %v1662_v4  ;;  %v4361_v50 = vpack.c.bf16 %v1663_v3, %v1661_v33 }
 0x453   : > { %2071 = vmatprep.mubr.bf16.mxu1 %v4359_v57 }
 0x454   : > { %2072 = vmatmul.mubr.bf16.gmra.mrb[60].mxu1 %v4361_v50 }
 0x455   : > { %2114 = vmatprep.mubr.bf16.mxu1 %v4095_v35 }
 0x45c   : > { %2115 = vmatmul.mubr.bf16.vlgmr.msra.gmra.mrb[64].mxu1 %v4097_v61 }
 0x45d   : > { %2124 = vmatprep.mubr.bf16.mxu1 %v4135_v19 }
 0x464   : > { %2125 = vmatmul.mubr.bf16.gmra.mrb[68].mxu1 %v4137_v7 }
 0x465   : > { %2134 = vmatprep.mubr.bf16.mxu1 %v4169_v48 }
 0x46b   : > { %v1923_v15 = vpop.f32.mrb[0].mxu1 }
 0x46c   : > { %2275 = vst [vmem:[%s4371_s24] sm:$0xff] %v1923_v15  ;;  %2135 = vmatmul.mubr.bf16.gmra.mrb[72].mxu1 %v4171_v10  ;;  %v1925_v35 = vpop.f32.mrb[1].mxu1 }
 0x46d   : > { %2276 = vst [vmem:[%s4371_s24 + $0x8] sm:$0xff] %v1925_v35  ;;  %2144 = vmatprep.mubr.bf16.mxu1 %v4199_v52  ;;  %v1927_v61 = vpop.f32.mrb[2].mxu1 }
 0x46e   : > { %2279 = vst [vmem:[%s4371_s24 + $0x20] sm:$0xff] %v1927_v61  ;;  %v1929_v19 = vpop.f32.mrb[3].mxu1 }
 0x46f   : > { %2280 = vst [vmem:[%s4371_s24 + $0x28] sm:$0xff] %v1929_v19 }
 0x474   : > { %2145 = vmatmul.mubr.bf16.gmra.mrb[76].mxu1 %v4201_v62 }
 0x475   : > { %v1933_v7 = vpop.f32.mrb[4].mxu1  ;;  %2154 = vmatprep.mubr.bf16.mxu1 %v4225_v44 }
 0x476   : > { %2283 = vst [vmem:[%s4371_s24 + $0x40] sm:$0xff] %v1933_v7  ;;  %v1935_v48 = vpop.f32.mrb[5].mxu1 }
 0x477   : > { %2284 = vst [vmem:[%s4371_s24 + $0x48] sm:$0xff] %v1935_v48  ;;  %v1937_v10 = vpop.f32.mrb[6].mxu1 }
 0x478   : > { %2287 = vst [vmem:[%s4371_s24 + $0x60] sm:$0xff] %v1937_v10  ;;  %v1939_v63 = vpop.f32.mrb[7].mxu1 }
 0x479   : > { %2288 = vst [vmem:[%s4371_s24 + $0x68] sm:$0xff] %v1939_v63 }
 0x47c   : > { %2155 = vmatmul.mubr.bf16.gmra.mrb[80].mxu1 %v4227_v58 }
 0x47d   : > { %v1943_v52 = vpop.f32.mrb[8].mxu1  ;;  %2164 = vmatprep.mubr.bf16.mxu1 %v4239_v9 }
 0x47e   : > { %2291 = vst [vmem:[%s4371_s24 + $0x80] sm:$0xff] %v1943_v52  ;;  %v1945_v62 = vpop.f32.mrb[9].mxu1 }
 0x47f   : > { %2292 = vst [vmem:[%s4371_s24 + $0x88] sm:$0xff] %v1945_v62  ;;  %v1947_v27 = vpop.f32.mrb[10].mxu1 }
 0x480   : > { %2295 = vst [vmem:[%s4371_s24 + $0xa0] sm:$0xff] %v1947_v27  ;;  %v1949_v39 = vpop.f32.mrb[11].mxu1 }
 0x481   : > { %2296 = vst [vmem:[%s4371_s24 + $0xa8] sm:$0xff] %v1949_v39 }
 0x484   : > { %2165 = vmatmul.mubr.bf16.gmra.mrb[84].mxu1 %v4248_v55 }
 0x485   : > { %v1953_v44 = vpop.f32.mrb[12].mxu1  ;;  %2174 = vmatprep.mubr.bf16.mxu1 %v4255_v46 }
 0x486   : > { %2299 = vst [vmem:[%s4371_s24 + $0xc0] sm:$0xff] %v1953_v44  ;;  %v1955_v58 = vpop.f32.mrb[13].mxu1 }
 0x487   : > { %2300 = vst [vmem:[%s4371_s24 + $0xc8] sm:$0xff] %v1955_v58  ;;  %v1957_v9 = vpop.f32.mrb[14].mxu1 }
 0x488   : > { %2303 = vst [vmem:[%s4371_s24 + $0xe0] sm:$0xff] %v1957_v9  ;;  %v1959_v60 = vpop.f32.mrb[15].mxu1 }
 0x489   : > { %2304 = vst [vmem:[%s4371_s24 + $0xe8] sm:$0xff] %v1959_v60 }
 0x48c   : > { %2175 = vmatmul.mubr.bf16.gmra.mrb[88].mxu1 %v4264_v2 }
 0x48d   : > { %v1963_v51 = vpop.f32.mrb[16].mxu1  ;;  %2184 = vmatprep.mubr.bf16.mxu1 %v4269_v12 }
 0x48e   : > { %2307 = vst [vmem:[%s4371_s24 + $0x100] sm:$0xff] %v1963_v51  ;;  %v1965_v55 = vpop.f32.mrb[17].mxu1 }
 0x48f   : > { %2308 = vst [vmem:[%s4371_s24 + $0x108] sm:$0xff] %v1965_v55  ;;  %v1967_v46 = vpop.f32.mrb[18].mxu1 }
 0x490   : > { %2311 = vst [vmem:[%s4371_s24 + $0x120] sm:$0xff] %v1967_v46  ;;  %v1969_v21 = vpop.f32.mrb[19].mxu1 }
 0x491   : > { %2312 = vst [vmem:[%s4371_s24 + $0x128] sm:$0xff] %v1969_v21 }
 0x494   : > { %2185 = vmatmul.mubr.bf16.gmra.mrb[92].mxu1 %v4278_v36 }
 0x495   : > { %v1973_v26 = vpop.f32.mrb[20].mxu1  ;;  %2194 = vmatprep.mubr.bf16.mxu1 %v4283_v17 }
 0x496   : > { %2315 = vst [vmem:[%s4371_s24 + $0x140] sm:$0xff] %v1973_v26  ;;  %v1975_v2 = vpop.f32.mrb[21].mxu1 }
 0x497   : > { %2316 = vst [vmem:[%s4371_s24 + $0x148] sm:$0xff] %v1975_v2  ;;  %v1977_v12 = vpop.f32.mrb[22].mxu1 }
 0x498   : > { %2319 = vst [vmem:[%s4371_s24 + $0x160] sm:$0xff] %v1977_v12  ;;  %v1979_v37 = vpop.f32.mrb[23].mxu1 }
 0x499   : > { %2320 = vst [vmem:[%s4371_s24 + $0x168] sm:$0xff] %v1979_v37 }
 0x49c   : > { %2195 = vmatmul.mubr.bf16.gmra.mrb[96].mxu1 %v4292_v20 }
 0x49d   : > { %v1983_v16 = vpop.f32.mrb[24].mxu1  ;;  %2204 = vmatprep.mubr.bf16.mxu1 %v4297_v24 }
 0x49e   : > { %2323 = vst [vmem:[%s4371_s24 + $0x180] sm:$0xff] %v1983_v16  ;;  %v1985_v36 = vpop.f32.mrb[25].mxu1 }
 0x49f   : > { %2324 = vst [vmem:[%s4371_s24 + $0x188] sm:$0xff] %v1985_v36  ;;  %v1987_v17 = vpop.f32.mrb[26].mxu1 }
 0x4a0   : > { %2327 = vst [vmem:[%s4371_s24 + $0x1a0] sm:$0xff] %v1987_v17  ;;  %v1989_v23 = vpop.f32.mrb[27].mxu1 }
 0x4a1   : > { %2328 = vst [vmem:[%s4371_s24 + $0x1a8] sm:$0xff] %v1989_v23 }
 0x4a4   : > { %2205 = vmatmul.mubr.bf16.gmra.mrb[100].mxu1 %v4302_v31 }
 0x4a5   : > { %v1993_v38 = vpop.f32.mrb[28].mxu1  ;;  %2214 = vmatprep.mubr.bf16.mxu1 %v4307_v34 }
 0x4a6   : > { %2331 = vst [vmem:[%s4371_s24 + $0x1c0] sm:$0xff] %v1993_v38  ;;  %v1995_v20 = vpop.f32.mrb[29].mxu1 }
 0x4a7   : > { %2332 = vst [vmem:[%s4371_s24 + $0x1c8] sm:$0xff] %v1995_v20  ;;  %v1997_v24 = vpop.f32.mrb[30].mxu1 }
 0x4a8   : > { %2335 = vst [vmem:[%s4371_s24 + $0x1e0] sm:$0xff] %v1997_v24  ;;  %v1999_v56 = vpop.f32.mrb[31].mxu1 }
 0x4a9   : > { %2336 = vst [vmem:[%s4371_s24 + $0x1e8] sm:$0xff] %v1999_v56 }
 0x4ac   : > { %2215 = vmatmul.mubr.bf16.gmra.mrb[104].mxu1 %v4312_v18 }
 0x4ad   : > { %v2003_v28 = vpop.f32.mrb[32].mxu1  ;;  %2224 = vmatprep.mubr.bf16.mxu1 %v4317_v47 }
 0x4ae   : > { %2339 = vst [vmem:[%s4371_s24 + $0x200] sm:$0xff] %v2003_v28  ;;  %v2005_v31 = vpop.f32.mrb[33].mxu1 }
 0x4af   : > { %2340 = vst [vmem:[%s4371_s24 + $0x208] sm:$0xff] %v2005_v31  ;;  %v2007_v34 = vpop.f32.mrb[34].mxu1 }
 0x4b0   : > { %2343 = vst [vmem:[%s4371_s24 + $0x220] sm:$0xff] %v2007_v34  ;;  %v2009_v40 = vpop.f32.mrb[35].mxu1 }
 0x4b1   : > { %2344 = vst [vmem:[%s4371_s24 + $0x228] sm:$0xff] %v2009_v40 }
 0x4b4   : > { %2225 = vmatmul.mubr.bf16.gmra.mrb[108].mxu1 %v4322_v22 }
 0x4b5   : > { %v2013_v5 = vpop.f32.mrb[36].mxu1  ;;  %2234 = vmatprep.mubr.bf16.mxu1 %v4329_v41 }
 0x4b6   : > { %2347 = vst [vmem:[%s4371_s24 + $0x240] sm:$0xff] %v2013_v5  ;;  %v2015_v18 = vpop.f32.mrb[37].mxu1 }
 0x4b7   : > { %2348 = vst [vmem:[%s4371_s24 + $0x248] sm:$0xff] %v2015_v18  ;;  %v2017_v47 = vpop.f32.mrb[38].mxu1 }
 0x4b8   : > { %2351 = vst [vmem:[%s4371_s24 + $0x260] sm:$0xff] %v2017_v47  ;;  %v2019_v1 = vpop.f32.mrb[39].mxu1 }
 0x4b9   : > { %2352 = vst [vmem:[%s4371_s24 + $0x268] sm:$0xff] %v2019_v1 }
 0x4bc   : > { %2235 = vmatmul.mubr.bf16.gmra.mrb[112].mxu1 %v4331_v13 }
 0x4bd   : > { %v2023_v45 = vpop.f32.mrb[40].mxu1  ;;  %2244 = vmatprep.mubr.bf16.mxu1 %v4339_v49 }
 0x4be   : > { %2355 = vst [vmem:[%s4371_s24 + $0x280] sm:$0xff] %v2023_v45  ;;  %v2025_v22 = vpop.f32.mrb[41].mxu1 }
 0x4bf   : > { %2356 = vst [vmem:[%s4371_s24 + $0x288] sm:$0xff] %v2025_v22  ;;  %v2027_v41 = vpop.f32.mrb[42].mxu1 }
 0x4c0   : > { %2359 = vst [vmem:[%s4371_s24 + $0x2a0] sm:$0xff] %v2027_v41  ;;  %v2029_v43 = vpop.f32.mrb[43].mxu1 }
 0x4c1   : > { %2360 = vst [vmem:[%s4371_s24 + $0x2a8] sm:$0xff] %v2029_v43 }
 0x4c4   : > { %2245 = vmatmul.mubr.bf16.gmra.mrb[116].mxu1 %v4341_v8 }
 0x4c5   : > { %v2033_v6 = vpop.f32.mrb[44].mxu1  ;;  %2254 = vmatprep.mubr.bf16.mxu1 %v4349_v32 }
 0x4c6   : > { %2363 = vst [vmem:[%s4371_s24 + $0x2c0] sm:$0xff] %v2033_v6  ;;  %v2035_v13 = vpop.f32.mrb[45].mxu1 }
 0x4c7   : > { %2364 = vst [vmem:[%s4371_s24 + $0x2c8] sm:$0xff] %v2035_v13  ;;  %v2037_v49 = vpop.f32.mrb[46].mxu1 }
 0x4c8   : > { %2367 = vst [vmem:[%s4371_s24 + $0x2e0] sm:$0xff] %v2037_v49  ;;  %v2039_v54 = vpop.f32.mrb[47].mxu1 }
 0x4c9   : > { %2368 = vst [vmem:[%s4371_s24 + $0x2e8] sm:$0xff] %v2039_v54 }
 0x4cc   : > { %2255 = vmatmul.mubr.bf16.gmra.mrb[120].mxu1 %v4351_v0 }
 0x4cd   : > { %2264 = vmatprep.mubr.bf16.mxu1 %v4359_v57 }
 0x4d4   : > { %2265 = vmatmul.mubr.bf16.gmra.mrb[124].mxu1 %v4361_v50 }
 0x50f   : > { %v2043_v8 = vpop.f32.mrb[48].mxu1 }
 0x510   : > { %2371 = vst [vmem:[%s4371_s24 + $0x300] sm:$0xff] %v2043_v8  ;;  %v2045_v11 = vpop.f32.mrb[49].mxu1 }
 0x511   : > { %2372 = vst [vmem:[%s4371_s24 + $0x308] sm:$0xff] %v2045_v11  ;;  %v2047_v30 = vpop.f32.mrb[50].mxu1 }
 0x512   : > { %2375 = vst [vmem:[%s4371_s24 + $0x320] sm:$0xff] %v2047_v30  ;;  %v2049_v53 = vpop.f32.mrb[51].mxu1 }
 0x513   : > { %2376 = vst [vmem:[%s4371_s24 + $0x328] sm:$0xff] %v2049_v53 }
 0x517   : > { %v2053_v42 = vpop.f32.mrb[52].mxu1 }
 0x518   : > { %2379 = vst [vmem:[%s4371_s24 + $0x340] sm:$0xff] %v2053_v42  ;;  %v2055_v29 = vpop.f32.mrb[53].mxu1 }
 0x519   : > { %2380 = vst [vmem:[%s4371_s24 + $0x348] sm:$0xff] %v2055_v29  ;;  %v2057_v32 = vpop.f32.mrb[54].mxu1 }
 0x51a   : > { %2383 = vst [vmem:[%s4371_s24 + $0x360] sm:$0xff] %v2057_v32  ;;  %v2059_v0 = vpop.f32.mrb[55].mxu1 }
 0x51b   : > { %2384 = vst [vmem:[%s4371_s24 + $0x368] sm:$0xff] %v2059_v0 }
 0x51f   : > { %v2063_v25 = vpop.f32.mrb[56].mxu1 }
 0x520   : > { %2387 = vst [vmem:[%s4371_s24 + $0x380] sm:$0xff] %v2063_v25  ;;  %v2065_v14 = vpop.f32.mrb[57].mxu1 }
 0x521   : > { %2388 = vst [vmem:[%s4371_s24 + $0x388] sm:$0xff] %v2065_v14  ;;  %v2067_v4 = vpop.f32.mrb[58].mxu1 }
 0x522   : > { %2391 = vst [vmem:[%s4371_s24 + $0x3a0] sm:$0xff] %v2067_v4  ;;  %v2069_v59 = vpop.f32.mrb[59].mxu1 }
 0x523   : > { %2392 = vst [vmem:[%s4371_s24 + $0x3a8] sm:$0xff] %v2069_v59 }
 0x527   : > { %v2073_v33 = vpop.f32.mrb[60].mxu1 }
 0x528   : > { %2395 = vst [vmem:[%s4371_s24 + $0x3c0] sm:$0xff] %v2073_v33  ;;  %v2075_v3 = vpop.f32.mrb[61].mxu1 }
 0x529   : > { %2396 = vst [vmem:[%s4371_s24 + $0x3c8] sm:$0xff] %v2075_v3  ;;  %v2077_v57 = vpop.f32.mrb[62].mxu1 }
 0x52a   : > { %2399 = vst [vmem:[%s4371_s24 + $0x3e0] sm:$0xff] %v2077_v57  ;;  %v2079_v50 = vpop.f32.mrb[63].mxu1 }
 0x52b   : > { %2400 = vst [vmem:[%s4371_s24 + $0x3e8] sm:$0xff] %v2079_v50 }
 0x52f   : > { %v2116_v15 = vpop.f32.mrb[64].mxu1 }
 0x530   : > { %2277 = vst [vmem:[%s4371_s24 + $0x10] sm:$0xff] %v2116_v15  ;;  %v2118_v35 = vpop.f32.mrb[65].mxu1 }
 0x531   : > { %2278 = vst [vmem:[%s4371_s24 + $0x18] sm:$0xff] %v2118_v35  ;;  %v2120_v61 = vpop.f32.mrb[66].mxu1 }
 0x532   : > { %2281 = vst [vmem:[%s4371_s24 + $0x30] sm:$0xff] %v2120_v61  ;;  %v2122_v19 = vpop.f32.mrb[67].mxu1 }
 0x533   : > { %2282 = vst [vmem:[%s4371_s24 + $0x38] sm:$0xff] %v2122_v19 }
 0x537   : > { %v2126_v7 = vpop.f32.mrb[68].mxu1 }
 0x538   : > { %2285 = vst [vmem:[%s4371_s24 + $0x50] sm:$0xff] %v2126_v7  ;;  %v2128_v48 = vpop.f32.mrb[69].mxu1 }
 0x539   : > { %2286 = vst [vmem:[%s4371_s24 + $0x58] sm:$0xff] %v2128_v48  ;;  %v2130_v10 = vpop.f32.mrb[70].mxu1 }
 0x53a   : > { %2289 = vst [vmem:[%s4371_s24 + $0x70] sm:$0xff] %v2130_v10  ;;  %v2132_v63 = vpop.f32.mrb[71].mxu1 }
 0x53b   : > { %2290 = vst [vmem:[%s4371_s24 + $0x78] sm:$0xff] %v2132_v63 }
 0x53f   : > { %v2136_v52 = vpop.f32.mrb[72].mxu1 }
 0x540   : > { %2293 = vst [vmem:[%s4371_s24 + $0x90] sm:$0xff] %v2136_v52  ;;  %v2138_v62 = vpop.f32.mrb[73].mxu1 }
 0x541   : > { %2294 = vst [vmem:[%s4371_s24 + $0x98] sm:$0xff] %v2138_v62  ;;  %v2140_v27 = vpop.f32.mrb[74].mxu1 }
 0x542   : > { %2297 = vst [vmem:[%s4371_s24 + $0xb0] sm:$0xff] %v2140_v27  ;;  %v2142_v39 = vpop.f32.mrb[75].mxu1 }
 0x543   : > { %2298 = vst [vmem:[%s4371_s24 + $0xb8] sm:$0xff] %v2142_v39 }
 0x547   : > { %v2146_v44 = vpop.f32.mrb[76].mxu1 }
 0x548   : > { %2301 = vst [vmem:[%s4371_s24 + $0xd0] sm:$0xff] %v2146_v44  ;;  %v2148_v58 = vpop.f32.mrb[77].mxu1 }
 0x549   : > { %2302 = vst [vmem:[%s4371_s24 + $0xd8] sm:$0xff] %v2148_v58  ;;  %v2150_v9 = vpop.f32.mrb[78].mxu1 }
 0x54a   : > { %2305 = vst [vmem:[%s4371_s24 + $0xf0] sm:$0xff] %v2150_v9  ;;  %v2152_v60 = vpop.f32.mrb[79].mxu1 }
 0x54b   : > { %2306 = vst [vmem:[%s4371_s24 + $0xf8] sm:$0xff] %v2152_v60 }
 0x54f   : > { %v2156_v51 = vpop.f32.mrb[80].mxu1 }
 0x550   : > { %2309 = vst [vmem:[%s4371_s24 + $0x110] sm:$0xff] %v2156_v51  ;;  %v2158_v55 = vpop.f32.mrb[81].mxu1 }
 0x551   : > { %2310 = vst [vmem:[%s4371_s24 + $0x118] sm:$0xff] %v2158_v55  ;;  %v2160_v46 = vpop.f32.mrb[82].mxu1 }
 0x552   : > { %2313 = vst [vmem:[%s4371_s24 + $0x130] sm:$0xff] %v2160_v46  ;;  %v2162_v21 = vpop.f32.mrb[83].mxu1 }
 0x553   : > { %2314 = vst [vmem:[%s4371_s24 + $0x138] sm:$0xff] %v2162_v21 }
 0x557   : > { %v2166_v26 = vpop.f32.mrb[84].mxu1 }
 0x558   : > { %2317 = vst [vmem:[%s4371_s24 + $0x150] sm:$0xff] %v2166_v26  ;;  %v2168_v2 = vpop.f32.mrb[85].mxu1 }
 0x559   : > { %2318 = vst [vmem:[%s4371_s24 + $0x158] sm:$0xff] %v2168_v2  ;;  %v2170_v12 = vpop.f32.mrb[86].mxu1 }
 0x55a   : > { %2321 = vst [vmem:[%s4371_s24 + $0x170] sm:$0xff] %v2170_v12  ;;  %v2172_v37 = vpop.f32.mrb[87].mxu1 }
 0x55b   : > { %2322 = vst [vmem:[%s4371_s24 + $0x178] sm:$0xff] %v2172_v37 }
 0x55f   : > { %v2176_v16 = vpop.f32.mrb[88].mxu1 }
 0x560   : > { %2325 = vst [vmem:[%s4371_s24 + $0x190] sm:$0xff] %v2176_v16  ;;  %v2178_v36 = vpop.f32.mrb[89].mxu1 }
 0x561   : > { %2326 = vst [vmem:[%s4371_s24 + $0x198] sm:$0xff] %v2178_v36  ;;  %v2180_v17 = vpop.f32.mrb[90].mxu1 }
 0x562   : > { %2329 = vst [vmem:[%s4371_s24 + $0x1b0] sm:$0xff] %v2180_v17  ;;  %v2182_v23 = vpop.f32.mrb[91].mxu1 }
 0x563   : > { %2330 = vst [vmem:[%s4371_s24 + $0x1b8] sm:$0xff] %v2182_v23 }
 0x567   : > { %v2186_v38 = vpop.f32.mrb[92].mxu1 }
 0x568   : > { %2333 = vst [vmem:[%s4371_s24 + $0x1d0] sm:$0xff] %v2186_v38  ;;  %v2188_v20 = vpop.f32.mrb[93].mxu1 }
 0x569   : > { %2334 = vst [vmem:[%s4371_s24 + $0x1d8] sm:$0xff] %v2188_v20  ;;  %v2190_v24 = vpop.f32.mrb[94].mxu1 }
 0x56a   : > { %2337 = vst [vmem:[%s4371_s24 + $0x1f0] sm:$0xff] %v2190_v24  ;;  %v2192_v56 = vpop.f32.mrb[95].mxu1 }
 0x56b   : > { %2338 = vst [vmem:[%s4371_s24 + $0x1f8] sm:$0xff] %v2192_v56 }
 0x56f   : > { %v2196_v28 = vpop.f32.mrb[96].mxu1 }
 0x570   : > { %2341 = vst [vmem:[%s4371_s24 + $0x210] sm:$0xff] %v2196_v28  ;;  %v2198_v31 = vpop.f32.mrb[97].mxu1 }
 0x571   : > { %2342 = vst [vmem:[%s4371_s24 + $0x218] sm:$0xff] %v2198_v31  ;;  %v2200_v34 = vpop.f32.mrb[98].mxu1 }
 0x572   : > { %2345 = vst [vmem:[%s4371_s24 + $0x230] sm:$0xff] %v2200_v34  ;;  %v2202_v40 = vpop.f32.mrb[99].mxu1 }
 0x573   : > { %2346 = vst [vmem:[%s4371_s24 + $0x238] sm:$0xff] %v2202_v40 }
 0x577   : > { %v2206_v5 = vpop.f32.mrb[100].mxu1 }
 0x578   : > { %2349 = vst [vmem:[%s4371_s24 + $0x250] sm:$0xff] %v2206_v5  ;;  %v2208_v18 = vpop.f32.mrb[101].mxu1 }
 0x579   : > { %2350 = vst [vmem:[%s4371_s24 + $0x258] sm:$0xff] %v2208_v18  ;;  %v2210_v47 = vpop.f32.mrb[102].mxu1 }
 0x57a   : > { %2353 = vst [vmem:[%s4371_s24 + $0x270] sm:$0xff] %v2210_v47  ;;  %v2212_v1 = vpop.f32.mrb[103].mxu1 }
 0x57b   : > { %2354 = vst [vmem:[%s4371_s24 + $0x278] sm:$0xff] %v2212_v1 }
 0x57f   : > { %v2216_v45 = vpop.f32.mrb[104].mxu1 }
 0x580   : > { %2357 = vst [vmem:[%s4371_s24 + $0x290] sm:$0xff] %v2216_v45  ;;  %v2218_v22 = vpop.f32.mrb[105].mxu1 }
 0x581   : > { %2358 = vst [vmem:[%s4371_s24 + $0x298] sm:$0xff] %v2218_v22  ;;  %v2220_v41 = vpop.f32.mrb[106].mxu1 }
 0x582   : > { %2361 = vst [vmem:[%s4371_s24 + $0x2b0] sm:$0xff] %v2220_v41  ;;  %v2222_v43 = vpop.f32.mrb[107].mxu1 }
 0x583   : > { %2362 = vst [vmem:[%s4371_s24 + $0x2b8] sm:$0xff] %v2222_v43 }
 0x587   : > { %v2226_v6 = vpop.f32.mrb[108].mxu1 }
 0x588   : > { %2365 = vst [vmem:[%s4371_s24 + $0x2d0] sm:$0xff] %v2226_v6  ;;  %v2228_v13 = vpop.f32.mrb[109].mxu1 }
 0x589   : > { %2366 = vst [vmem:[%s4371_s24 + $0x2d8] sm:$0xff] %v2228_v13  ;;  %v2230_v49 = vpop.f32.mrb[110].mxu1 }
 0x58a   : > { %2369 = vst [vmem:[%s4371_s24 + $0x2f0] sm:$0xff] %v2230_v49  ;;  %v2232_v54 = vpop.f32.mrb[111].mxu1 }
 0x58b   : > { %2370 = vst [vmem:[%s4371_s24 + $0x2f8] sm:$0xff] %v2232_v54 }
 0x58f   : > { %v2236_v8 = vpop.f32.mrb[112].mxu1 }
 0x590   : > { %2373 = vst [vmem:[%s4371_s24 + $0x310] sm:$0xff] %v2236_v8  ;;  %v2238_v11 = vpop.f32.mrb[113].mxu1 }
 0x591   : > { %2374 = vst [vmem:[%s4371_s24 + $0x318] sm:$0xff] %v2238_v11  ;;  %v2240_v30 = vpop.f32.mrb[114].mxu1 }
 0x592   : > { %2377 = vst [vmem:[%s4371_s24 + $0x330] sm:$0xff] %v2240_v30  ;;  %v2242_v53 = vpop.f32.mrb[115].mxu1 }
 0x593   : > { %2378 = vst [vmem:[%s4371_s24 + $0x338] sm:$0xff] %v2242_v53 }
 0x597   : > { %v2246_v42 = vpop.f32.mrb[116].mxu1 }
 0x598   : > { %2381 = vst [vmem:[%s4371_s24 + $0x350] sm:$0xff] %v2246_v42  ;;  %v2248_v29 = vpop.f32.mrb[117].mxu1 }
 0x599   : > { %2382 = vst [vmem:[%s4371_s24 + $0x358] sm:$0xff] %v2248_v29  ;;  %v2250_v32 = vpop.f32.mrb[118].mxu1 }
 0x59a   : > { %2385 = vst [vmem:[%s4371_s24 + $0x370] sm:$0xff] %v2250_v32  ;;  %v2252_v0 = vpop.f32.mrb[119].mxu1 }
 0x59b   : > { %2386 = vst [vmem:[%s4371_s24 + $0x378] sm:$0xff] %v2252_v0 }
 0x59f   : > { %v2256_v25 = vpop.f32.mrb[120].mxu1 }
 0x5a0   : > { %2389 = vst [vmem:[%s4371_s24 + $0x390] sm:$0xff] %v2256_v25  ;;  %v2258_v14 = vpop.f32.mrb[121].mxu1 }
 0x5a1   : > { %2390 = vst [vmem:[%s4371_s24 + $0x398] sm:$0xff] %v2258_v14  ;;  %v2260_v4 = vpop.f32.mrb[122].mxu1 }
 0x5a2   : > { %2393 = vst [vmem:[%s4371_s24 + $0x3b0] sm:$0xff] %v2260_v4  ;;  %v2262_v59 = vpop.f32.mrb[123].mxu1 }
 0x5a3   : > { %2394 = vst [vmem:[%s4371_s24 + $0x3b8] sm:$0xff] %v2262_v59 }
 0x5a7   : > { %v2266_v33 = vpop.f32.mrb[124].mxu1 }
 0x5a8   : > { %2397 = vst [vmem:[%s4371_s24 + $0x3d0] sm:$0xff] %v2266_v33  ;;  %v2268_v3 = vpop.f32.mrb[125].mxu1 }
 0x5a9   : > { %2398 = vst [vmem:[%s4371_s24 + $0x3d8] sm:$0xff] %v2268_v3  ;;  %v2270_v57 = vpop.f32.mrb[126].mxu1 }
 0x5aa   : > { %2401 = vst [vmem:[%s4371_s24 + $0x3f0] sm:$0xff] %v2270_v57  ;;  %v2272_v50 = vpop.f32.mrb[127].mxu1 }
 0x5ab   : > { %2402 = vst [vmem:[%s4371_s24 + $0x3f8] sm:$0xff] %v2272_v50 }
 0x5ac   : > { %3012 = shalt.err (!%p3009_p13)
}
 0x5ad   : > { %s3013_s28 = scalar_lea.hbm %s4530_s30, 16384  ;;  %s3017_s10 = scalar_lea.hbm %s4587_s3, 32768 }
 0x5ae   : > { %p3014_p11 = scmp.ne.s32.totalorder %s4530_s30, %s3013_s28  ;;  %p3018_p7 = scmp.lt.u32.totalorder %s4530_s30, %s4587_s3 }
 0x5af   : > { %p3019_p4 = scmp.lt.u32.totalorder %s3017_s10, %s3013_s28  ;;  %p3021_p0 = scmp.lt.u32.totalorder %s3013_s28, %s4530_s30 }
 0x5b0   : > { %p3015_p2 = pnand %p3014_p11, %p4720_p10 }
 0x5b1   : > { %p3020_p3 = por %p3019_p4, %p3018_p7 }
 0x5b2   : > { %p3016_p5 = pneg %p3015_p2 }
 0x5b3   : > { %p3022_p8 = por %p3021_p0, %p3020_p3 }
 0x5b5   : > { %p3023_p9 = pnand %p3022_p8, %p3016_p5 }
 0x5b7   : > { %3026 = shalt.err (!%p3023_p9)
}
 0x5b8   : > { %s3093_s11 = smov 512   ;;  %s3094_s19 = smov 32  }
 0x5b9   : > { %2647 = dma.vmem_to_hbm [thread:$0]  (%p4720_p10), %s4532_s20, 16384, %s4530_s30, %s2404_s15, %s3093_s11, %s3093_s11, %s3094_s19  }
 0x5ba PF: > { %s2435_s9 = sand.u32 1, %s3065_s12   ;;  %p4721_p12 = scmp.ne.s32.totalorder %s4636_s27, 0 }
 0x5bb   : > { %p4722_p1 = scmp.ge.s32.totalorder %s3085_s17, 2  ;;  %s2436_s18 = scalar_lea.sflag [#allocation4], %s2435_s9 }
 0x5bd   : > { %p2660_p6 = pnand %p4722_p1, %p4721_p12 }
 0x5bf   : > { %3060 = dma.done.wait (!%p2660_p6), %s2436_s18, 16384  }
 0x5c0   : > { %3062 = vsyncadd (!%p2660_p6), %s2436_s18, 4294950912  ;;  %s22_s17 = sadd.s32 1, %s3085_s17   ;;  %s4723_s24 = sld [smem:[#allocation14_spill]] }
 0x5c1   : > { %p19_p13 = scmp.ge.s32.totalorder %s22_s17, 4   ;;  %s4724_s15 = sld [smem:[#allocation12_spill]] }
 0x5c2   : > { %s4725_s16 = sld [smem:[#allocation13_spill]]  ;;  %s4726_s12 = smov %s3069_s13 }
 0x5c3   : > { %s4727_s13 = smov %s3073_s14  ;;  %21 = sbr.rel (!%p19_p13) target bundleno = 10 (0xa), region = 101 }
 0x5c6   : > { %s4728_s14 = smov %s4723_s24 }
 0x5ca   :  { %2441 = vsyncpa [#allocation3], 1 }
 0x5cb   :  { %2443 = vsyncpa [#allocation3 + $0x1], 1 }
 0x5cc   :  { %2444 = vsyncpa [#allocation6], 1 }
 0x5cd   :  { %2446 = vsyncpa [#allocation6 + $0x1], 1 }
 0x5ce   :  { %2447 = vsyncpa [#allocation4], 1 }
 0x5cf   :  { %2449 = vsyncpa [#allocation4 + $0x1], 1 }

</bundles_post_ra>
